<compile_context>
chip_gen: v7x
topology: tpu7x:2x2x1
jax: 0.10.0
libtpu: 0.0.40
codegen_flags: <defaults>
</compile_context>

<pallas_src>
import functools

import jax
import jax.numpy as jnp
from jax.experimental import pallas as pl
from jax.experimental.pallas import tpu as pltpu


def _correlation_kernel(in1_ref, in2_ref, out_ref, hpad_ref, *,
                        pad, disp, hei, wid, chan, inv_c, fold_scale):
    """One (batch, dy) grid step.

    in1_ref : (H, W, C)        current batch element of in1 (NHWC)
    in2_ref : (H, W, C)        current batch element of in2 (NHWC)
    out_ref : (D, H, W)        output channels dy*D .. dy*D + D-1
    hpad_ref: (H + 2*pad, W, C) VMEM scratch: in2 zero-padded along H only.
    """
    dy = pl.program_id(1)

    # Build the H-padded copy of in2 once per batch element.  dy == 0 is the
    # first inner-grid step for every b; the dy axis is "arbitrary" (never
    # split across cores), so the later dy steps always see this init.
    @pl.when(dy == 0)
    def _init():
        if pad > 0:
            halo = jnp.zeros((pad, wid, chan), hpad_ref.dtype)
            hpad_ref[0:pad] = halo
            hpad_ref[pad + hei:pad + hei + pad] = halo
        hpad_ref[pad:pad + hei] = in2_ref[...]

    x1 = in1_ref[...]                                    # (H, W, C)
    if fold_scale:
        # Small-C regime: fold the 1/C of the mean into x1 once per step
        # (H*W*C multiplies) instead of scaling every (H, W) corr slice
        # below (D*H*W multiplies).
        x1 = x1.astype(jnp.float32) * inv_c

    # Rows dy .. dy+H-1 of the H-padded in2 (cheap: untiled leading dim).
    slab = hpad_ref[pl.ds(dy, hei)]                      # (H, W, C)

    # band[h, w, v] = sum_c x1[h, w, c] * slab[h, v, c]   -- MXU, f32 accum.
    band = jnp.einsum("hwc,hvc->hwv", x1, slab,
                      preferred_element_type=jnp.float32)   # (H, W, W)

    # Extract the 9 diagonals v = w + (dx - pad).  Entries falling outside
    # [0, W) are simply absent from the mask, which reproduces the zero
    # W-padding of the reference without materialising a W-padded tensor.
    w_idx = jax.lax.broadcasted_iota(jnp.int32, (wid, wid), 0)
    v_idx = jax.lax.broadcasted_iota(jnp.int32, (wid, wid), 1)
    for dx in range(disp):                               # 9x unrolled (bounded)
        sel = v_idx == (w_idx + (dx - pad))              # (W, W) bool
        corr = jnp.where(sel[None, :, :], band, 0.0).sum(axis=-1)   # (H, W)
        if not fold_scale:
            corr = corr * inv_c
        out_ref[dx] = corr.astype(out_ref.dtype)


def correlation_layer(in1, in2, *, pad_size=4, max_displacement=4):
    """Pallas equivalent of CorrelationLayer.forward (NCHW in, NCHW out)."""
    assert in1.shape == in2.shape and in1.dtype == in2.dtype
    assert pad_size >= max_displacement
    B, C, H, W = in1.shape
    D = 2 * max_displacement + 1
    p = pad_size
    Hp = H + 2 * p

    # NHWC presentation for the kernel: C on the lane axis.
    in1_nhwc = jnp.transpose(in1, (0, 2, 3, 1))
    in2_nhwc = jnp.transpose(in2, (0, 2, 3, 1))

    # Fold the mean's 1/C into in1 only when that is cheaper than scaling the
    # per-offset correlation slices (x1 is re-scaled once per dy step).
    fold_scale = (C < D) and (in1.dtype == jnp.float32)

    kernel = functools.partial(
        _correlation_kernel, pad=p, disp=D, hei=H, wid=W, chan=C,
        inv_c=1.0 / C, fold_scale=fold_scale)

    # Explicit VMEM budget: double-buffered in/out blocks + scratch + live
    # f32 band; clamp to [32 MiB, 64 MiB] so it is valid on v7x (64 MiB
    # physical VMEM) as well as v5e/v6e.
    isz = in1.dtype.itemsize
    est = (2 * (2 * H * W * C + D * H * W) * isz          # pipelined blocks
           + Hp * W * C * isz                             # hpad scratch
           + (H * W * W + 2 * H * W) * 4)                 # band + temporaries
    vmem_limit = int(min(max(4 * est, 32 * 1024 * 1024), 64 * 1024 * 1024))

    return pl.pallas_call(
        kernel,
        out_shape=jax.ShapeDtypeStruct((B, D * D, H, W), in1.dtype),
        grid_spec=pltpu.PrefetchScalarGridSpec(
            num_scalar_prefetch=0,
            grid=(B, D),                                  # (batch, dy)
            in_specs=[
                # Block index is constant across dy, so in1/in2 are DMA'd
                # once per batch element and stay VMEM-resident for all 9 dy
                # steps (no re-fetch).
                pl.BlockSpec((None, H, W, C), lambda b, dy: (b, 0, 0, 0)),
                pl.BlockSpec((None, H, W, C), lambda b, dy: (b, 0, 0, 0)),
            ],
            out_specs=pl.BlockSpec((None, D, H, W),
                                   lambda b, dy: (b, dy, 0, 0)),
            scratch_shapes=[pltpu.VMEM((Hp, W, C), in2.dtype)],
        ),
        compiler_params=pltpu.CompilerParams(
            # dy must stay "arbitrary": the hpad scratch is written at dy == 0
            # and reused by the remaining steps of the same batch element.
            dimension_semantics=("parallel", "arbitrary"),
            vmem_limit_bytes=vmem_limit,
        ),
    )(in1_nhwc, in2_nhwc)


# Jitted forward: the NHWC transposes and all glue fuse into one XLA program
# around the pallas_call (no eager op-by-op dispatch, no jnp.pad of in2).
correlation_forward = jax.jit(
    correlation_layer, static_argnames=("pad_size", "max_displacement"))


def _reference(in1, in2, *, pad_size=4, max_displacement=4):
    """Pure-JAX transcription of the PyTorch forward, for correctness checks."""
    D = 2 * max_displacement + 1
    B, C, H, W = in1.shape
    in2p = jnp.pad(in2, ((0, 0), (0, 0), (pad_size, pad_size),
                         (pad_size, pad_size)))
    outs = []
    for dy in range(D):          # offsety varies slowly (meshgrid + reshape(-1))
        for dx in range(D):      # offsetx varies fast
            outs.append(jnp.mean(in1 * in2p[:, :, dy:dy + H, dx:dx + W],
                                 axis=1, keepdims=True))
    return jnp.concatenate(outs, axis=1)


if __name__ == "__main__":
    key = jax.random.PRNGKey(0)
    k1, k2, k3, k4 = jax.random.split(key, 4)

    # Tolerance is loose enough to absorb reduced-precision MXU passes for
    # f32 matmuls on some TPU generations; functional errors (wrong window
    # offsets / channel ordering) show up as O(1) mismatches.
    TOL = 5e-2

    # Primary small case (shapes consistent with the module's intended use).
    B, C, H, W = 2, 4, 16, 16
    in1 = jax.random.normal(k1, (B, C, H, W), jnp.float32)
    in2 = jax.random.normal(k2, (B, C, H, W), jnp.float32)
    out = jax.block_until_ready(correlation_forward(in1, in2))
    assert out.shape == (B, 81, H, W), out.shape
    assert bool(jnp.all(jnp.isfinite(out)))
    err = float(jnp.max(jnp.abs(out - _reference(in1, in2))))
    assert err < TOL, err

    # Secondary case: larger channel count so the band matmul has a
    # non-trivial contraction (same code path, more MXU-meaningful K).
    a = jax.random.normal(k3, (1, 64, 8, 16), jnp.float32)
    b = jax.random.normal(k4, (1, 64, 8, 16), jnp.float32)
    out2 = jax.block_until_ready(correlation_forward(a, b))
    assert out2.shape == (1, 81, 8, 16), out2.shape
    err2 = float(jnp.max(jnp.abs(out2 - _reference(a, b))))
    assert err2 < TOL, err2

    print("KERNEL_OK")
</pallas_src>

<mosaic_0001>
module attributes {stable_mosaic.version = 11 : i64} {
  func.func @_correlation_kernel(%arg0: i32, %arg1: i32, %arg2: memref<1x16x16x4xf32, #tpu.memory_space<vmem>>, %arg3: memref<1x16x16x4xf32, #tpu.memory_space<vmem>>, %arg4: memref<1x9x16x16xf32, #tpu.memory_space<vmem>>, %arg5: memref<24x16x4xf32, #tpu.memory_space<vmem>>) attributes {dimension_semantics = [#tpu.dimension_semantics<parallel>, #tpu.dimension_semantics<arbitrary>], iteration_bounds = array<i64: 2, 9>, scalar_prefetch = 0 : i64, scratch_operands = 1 : i64, tpu.core_type = #tpu.core_type<tc>, window_params = [{transform_indices = @transform_0, window_bounds = array<i64: 1, 16, 16, 4>}, {transform_indices = @transform_1, window_bounds = array<i64: 1, 16, 16, 4>}, {transform_indices = @transform_2, window_bounds = array<i64: 1, 9, 16, 16>}]} {
    %c0_i32 = arith.constant 0 : i32
    %0 = arith.cmpi eq, %arg1, %c0_i32 : i32
    %1 = arith.extui %0 : i1 to i32
    %c0_i32_0 = arith.constant 0 : i32
    %2 = arith.cmpi ne, %1, %c0_i32_0 : i32
    scf.if %2 {
      %cst_54 = arith.constant 0.000000e+00 : f32
      %120 = vector.broadcast %cst_54 : f32 to vector<4x16x4xf32>
      %c0_55 = arith.constant 0 : index
      %c0_56 = arith.constant 0 : index
      %c0_57 = arith.constant 0 : index
      %121 = vector.load %arg5[%c0_55, %c0_56, %c0_57] : memref<24x16x4xf32, #tpu.memory_space<vmem>>, vector<4x16x4xf32>
      tpu.vector_store %arg5[%c0_55, %c0_56, %c0_57], %120 {strides = array<i32>} : memref<24x16x4xf32, #tpu.memory_space<vmem>>, vector<4x16x4xf32>,
      %c20 = arith.constant 20 : index
      %c0_58 = arith.constant 0 : index
      %c0_59 = arith.constant 0 : index
      %122 = vector.load %arg5[%c20, %c0_58, %c0_59] : memref<24x16x4xf32, #tpu.memory_space<vmem>>, vector<4x16x4xf32>
      tpu.vector_store %arg5[%c20, %c0_58, %c0_59], %120 {strides = array<i32>} : memref<24x16x4xf32, #tpu.memory_space<vmem>>, vector<4x16x4xf32>,
      %c0_60 = arith.constant 0 : index
      %c0_61 = arith.constant 0 : index
      %c0_62 = arith.constant 0 : index
      %c0_63 = arith.constant 0 : index
      %123 = vector.load %arg3[%c0_60, %c0_61, %c0_62, %c0_63] : memref<1x16x16x4xf32, #tpu.memory_space<vmem>>, vector<1x16x16x4xf32>
      %124 = vector.shape_cast %123 : vector<1x16x16x4xf32> to vector<16x16x4xf32>
      %c4_64 = arith.constant 4 : index
      %c0_65 = arith.constant 0 : index
      %c0_66 = arith.constant 0 : index
      %125 = vector.load %arg5[%c4_64, %c0_65, %c0_66] : memref<24x16x4xf32, #tpu.memory_space<vmem>>, vector<16x16x4xf32>
      tpu.vector_store %arg5[%c4_64, %c0_65, %c0_66], %124 {strides = array<i32>} : memref<24x16x4xf32, #tpu.memory_space<vmem>>, vector<16x16x4xf32>,
    } else {
    }
    %c0 = arith.constant 0 : index
    %c0_1 = arith.constant 0 : index
    %c0_2 = arith.constant 0 : index
    %c0_3 = arith.constant 0 : index
    %3 = vector.load %arg2[%c0, %c0_1, %c0_2, %c0_3] : memref<1x16x16x4xf32, #tpu.memory_space<vmem>>, vector<1x16x16x4xf32>
    %4 = vector.shape_cast %3 : vector<1x16x16x4xf32> to vector<16x16x4xf32>
    %cst = arith.constant 2.500000e-01 : f32
    %5 = vector.broadcast %cst : f32 to vector<16x16x4xf32>
    %6 = arith.mulf %4, %5 : vector<16x16x4xf32>
    %7 = arith.index_cast %arg1 : i32 to index
    %c0_4 = arith.constant 0 : index
    %c0_5 = arith.constant 0 : index
    %8 = vector.load %arg5[%7, %c0_4, %c0_5] : memref<24x16x4xf32, #tpu.memory_space<vmem>>, vector<16x16x4xf32>
    "tpu.trace_start"() <{level = 10 : i32, message = "hwc,hvc->hwv"}> : () -> ()
    %cst_6 = arith.constant dense<0.000000e+00> : vector<16x16x16xf32>
    %9 = tpu.matmul %6, %8, %cst_6 {dimension_numbers = #tpu.dot_dimension_numbers<[2], [2], [1], [1], [0, 0, 0, 1, 1, 1], [0], [0]>} : vector<16x16x4xf32>, vector<16x16x4xf32>, vector<16x16x16xf32> -> vector<16x16x16xf32>
    "tpu.trace_stop"() : () -> ()
    %10 = tpu.iota {dimensions = array<i32: 0>} : vector<16x16xi32>
    %11 = tpu.iota {dimensions = array<i32: 1>} : vector<16x16xi32>
    %c-4_i32 = arith.constant -4 : i32
    %12 = vector.broadcast %c-4_i32 : i32 to vector<16x16xi32>
    %13 = arith.addi %10, %12 : vector<16x16xi32>
    %14 = arith.cmpi eq, %11, %13 : vector<16x16xi32>
    %15 = vector.shape_cast %14 : vector<16x16xi1> to vector<1x16x16xi1>
    %cst_7 = arith.constant 0.000000e+00 : f32
    %16 = vector.shape_cast %15 : vector<1x16x16xi1> to vector<1x16x16xi1>
    %17 = vector.broadcast %16 : vector<1x16x16xi1> to vector<16x16x16xi1>
    %18 = vector.broadcast %cst_7 : f32 to vector<16x16x16xf32>
    %19 = arith.select %17, %9, %18 : vector<16x16x16xi1>, vector<16x16x16xf32>
    %cst_8 = arith.constant dense<0.000000e+00> : vector<16x16xf32>
    %20 = vector.multi_reduction <add>, %19, %cst_8 [2] : vector<16x16x16xf32> to vector<16x16xf32>
    %c0_9 = arith.constant 0 : index
    %c0_10 = arith.constant 0 : index
    %c0_11 = arith.constant 0 : index
    %c0_12 = arith.constant 0 : index
    %21 = vector.load %arg4[%c0_9, %c0_10, %c0_11, %c0_12] : memref<1x9x16x16xf32, #tpu.memory_space<vmem>>, vector<1x1x16x16xf32>
    %22 = vector.shape_cast %21 : vector<1x1x16x16xf32> to vector<16x16xf32>
    %23 = vector.shape_cast %20 : vector<16x16xf32> to vector<1x1x16x16xf32>
    tpu.vector_store %arg4[%c0_9, %c0_10, %c0_11, %c0_12], %23 {strides = array<i32>} : memref<1x9x16x16xf32, #tpu.memory_space<vmem>>, vector<1x1x16x16xf32>,
    %c-3_i32 = arith.constant -3 : i32
    %24 = vector.broadcast %c-3_i32 : i32 to vector<16x16xi32>
    %25 = arith.addi %10, %24 : vector<16x16xi32>
    %26 = arith.cmpi eq, %11, %25 : vector<16x16xi32>
    %27 = vector.shape_cast %26 : vector<16x16xi1> to vector<1x16x16xi1>
    %cst_13 = arith.constant 0.000000e+00 : f32
    %28 = vector.shape_cast %27 : vector<1x16x16xi1> to vector<1x16x16xi1>
    %29 = vector.broadcast %28 : vector<1x16x16xi1> to vector<16x16x16xi1>
    %30 = vector.broadcast %cst_13 : f32 to vector<16x16x16xf32>
    %31 = arith.select %29, %9, %30 : vector<16x16x16xi1>, vector<16x16x16xf32>
    %cst_14 = arith.constant dense<0.000000e+00> : vector<16x16xf32>
    %32 = vector.multi_reduction <add>, %31, %cst_14 [2] : vector<16x16x16xf32> to vector<16x16xf32>
    %c0_15 = arith.constant 0 : index
    %c1 = arith.constant 1 : index
    %c0_16 = arith.constant 0 : index
    %c0_17 = arith.constant 0 : index
    %33 = vector.load %arg4[%c0_15, %c1, %c0_16, %c0_17] : memref<1x9x16x16xf32, #tpu.memory_space<vmem>>, vector<1x1x16x16xf32>
    %34 = vector.shape_cast %33 : vector<1x1x16x16xf32> to vector<16x16xf32>
    %35 = vector.shape_cast %32 : vector<16x16xf32> to vector<1x1x16x16xf32>
    tpu.vector_store %arg4[%c0_15, %c1, %c0_16, %c0_17], %35 {strides = array<i32>} : memref<1x9x16x16xf32, #tpu.memory_space<vmem>>, vector<1x1x16x16xf32>,
    %c-2_i32 = arith.constant -2 : i32
    %36 = vector.broadcast %c-2_i32 : i32 to vector<16x16xi32>
    %37 = arith.addi %10, %36 : vector<16x16xi32>
    %38 = arith.cmpi eq, %11, %37 : vector<16x16xi32>
    %39 = vector.shape_cast %38 : vector<16x16xi1> to vector<1x16x16xi1>
    %cst_18 = arith.constant 0.000000e+00 : f32
    %40 = vector.shape_cast %39 : vector<1x16x16xi1> to vector<1x16x16xi1>
    %41 = vector.broadcast %40 : vector<1x16x16xi1> to vector<16x16x16xi1>
    %42 = vector.broadcast %cst_18 : f32 to vector<16x16x16xf32>
    %43 = arith.select %41, %9, %42 : vector<16x16x16xi1>, vector<16x16x16xf32>
    %cst_19 = arith.constant dense<0.000000e+00> : vector<16x16xf32>
    %44 = vector.multi_reduction <add>, %43, %cst_19 [2] : vector<16x16x16xf32> to vector<16x16xf32>
    %c0_20 = arith.constant 0 : index
    %c2 = arith.constant 2 : index
    %c0_21 = arith.constant 0 : index
    %c0_22 = arith.constant 0 : index
    %45 = vector.load %arg4[%c0_20, %c2, %c0_21, %c0_22] : memref<1x9x16x16xf32, #tpu.memory_space<vmem>>, vector<1x1x16x16xf32>
    %46 = vector.shape_cast %45 : vector<1x1x16x16xf32> to vector<16x16xf32>
    %47 = vector.shape_cast %44 : vector<16x16xf32> to vector<1x1x16x16xf32>
    tpu.vector_store %arg4[%c0_20, %c2, %c0_21, %c0_22], %47 {strides = array<i32>} : memref<1x9x16x16xf32, #tpu.memory_space<vmem>>, vector<1x1x16x16xf32>,
    %c-1_i32 = arith.constant -1 : i32
    %48 = vector.broadcast %c-1_i32 : i32 to vector<16x16xi32>
    %49 = arith.addi %10, %48 : vector<16x16xi32>
    %50 = arith.cmpi eq, %11, %49 : vector<16x16xi32>
    %51 = vector.shape_cast %50 : vector<16x16xi1> to vector<1x16x16xi1>
    %cst_23 = arith.constant 0.000000e+00 : f32
    %52 = vector.shape_cast %51 : vector<1x16x16xi1> to vector<1x16x16xi1>
    %53 = vector.broadcast %52 : vector<1x16x16xi1> to vector<16x16x16xi1>
    %54 = vector.broadcast %cst_23 : f32 to vector<16x16x16xf32>
    %55 = arith.select %53, %9, %54 : vector<16x16x16xi1>, vector<16x16x16xf32>
    %cst_24 = arith.constant dense<0.000000e+00> : vector<16x16xf32>
    %56 = vector.multi_reduction <add>, %55, %cst_24 [2] : vector<16x16x16xf32> to vector<16x16xf32>
    %c0_25 = arith.constant 0 : index
    %c3 = arith.constant 3 : index
    %c0_26 = arith.constant 0 : index
    %c0_27 = arith.constant 0 : index
    %57 = vector.load %arg4[%c0_25, %c3, %c0_26, %c0_27] : memref<1x9x16x16xf32, #tpu.memory_space<vmem>>, vector<1x1x16x16xf32>
    %58 = vector.shape_cast %57 : vector<1x1x16x16xf32> to vector<16x16xf32>
    %59 = vector.shape_cast %56 : vector<16x16xf32> to vector<1x1x16x16xf32>
    tpu.vector_store %arg4[%c0_25, %c3, %c0_26, %c0_27], %59 {strides = array<i32>} : memref<1x9x16x16xf32, #tpu.memory_space<vmem>>, vector<1x1x16x16xf32>,
    %c0_i32_28 = arith.constant 0 : i32
    %60 = vector.broadcast %c0_i32_28 : i32 to vector<16x16xi32>
    %61 = arith.addi %10, %60 : vector<16x16xi32>
    %62 = arith.cmpi eq, %11, %61 : vector<16x16xi32>
    %63 = vector.shape_cast %62 : vector<16x16xi1> to vector<1x16x16xi1>
    %cst_29 = arith.constant 0.000000e+00 : f32
    %64 = vector.shape_cast %63 : vector<1x16x16xi1> to vector<1x16x16xi1>
    %65 = vector.broadcast %64 : vector<1x16x16xi1> to vector<16x16x16xi1>
    %66 = vector.broadcast %cst_29 : f32 to vector<16x16x16xf32>
    %67 = arith.select %65, %9, %66 : vector<16x16x16xi1>, vector<16x16x16xf32>
    %cst_30 = arith.constant dense<0.000000e+00> : vector<16x16xf32>
    %68 = vector.multi_reduction <add>, %67, %cst_30 [2] : vector<16x16x16xf32> to vector<16x16xf32>
    %c0_31 = arith.constant 0 : index
    %c4 = arith.constant 4 : index
    %c0_32 = arith.constant 0 : index
    %c0_33 = arith.constant 0 : index
    %69 = vector.load %arg4[%c0_31, %c4, %c0_32, %c0_33] : memref<1x9x16x16xf32, #tpu.memory_space<vmem>>, vector<1x1x16x16xf32>
    %70 = vector.shape_cast %69 : vector<1x1x16x16xf32> to vector<16x16xf32>
    %71 = vector.shape_cast %68 : vector<16x16xf32> to vector<1x1x16x16xf32>
    tpu.vector_store %arg4[%c0_31, %c4, %c0_32, %c0_33], %71 {strides = array<i32>} : memref<1x9x16x16xf32, #tpu.memory_space<vmem>>, vector<1x1x16x16xf32>,
    %c1_i32 = arith.constant 1 : i32
    %72 = vector.broadcast %c1_i32 : i32 to vector<16x16xi32>
    %73 = arith.addi %10, %72 : vector<16x16xi32>
    %74 = arith.cmpi eq, %11, %73 : vector<16x16xi32>
    %75 = vector.shape_cast %74 : vector<16x16xi1> to vector<1x16x16xi1>
    %cst_34 = arith.constant 0.000000e+00 : f32
    %76 = vector.shape_cast %75 : vector<1x16x16xi1> to vector<1x16x16xi1>
    %77 = vector.broadcast %76 : vector<1x16x16xi1> to vector<16x16x16xi1>
    %78 = vector.broadcast %cst_34 : f32 to vector<16x16x16xf32>
    %79 = arith.select %77, %9, %78 : vector<16x16x16xi1>, vector<16x16x16xf32>
    %cst_35 = arith.constant dense<0.000000e+00> : vector<16x16xf32>
    %80 = vector.multi_reduction <add>, %79, %cst_35 [2] : vector<16x16x16xf32> to vector<16x16xf32>
    %c0_36 = arith.constant 0 : index
    %c5 = arith.constant 5 : index
    %c0_37 = arith.constant 0 : index
    %c0_38 = arith.constant 0 : index
    %81 = vector.load %arg4[%c0_36, %c5, %c0_37, %c0_38] : memref<1x9x16x16xf32, #tpu.memory_space<vmem>>, vector<1x1x16x16xf32>
    %82 = vector.shape_cast %81 : vector<1x1x16x16xf32> to vector<16x16xf32>
    %83 = vector.shape_cast %80 : vector<16x16xf32> to vector<1x1x16x16xf32>
    tpu.vector_store %arg4[%c0_36, %c5, %c0_37, %c0_38], %83 {strides = array<i32>} : memref<1x9x16x16xf32, #tpu.memory_space<vmem>>, vector<1x1x16x16xf32>,
    %c2_i32 = arith.constant 2 : i32
    %84 = vector.broadcast %c2_i32 : i32 to vector<16x16xi32>
    %85 = arith.addi %10, %84 : vector<16x16xi32>
    %86 = arith.cmpi eq, %11, %85 : vector<16x16xi32>
    %87 = vector.shape_cast %86 : vector<16x16xi1> to vector<1x16x16xi1>
    %cst_39 = arith.constant 0.000000e+00 : f32
    %88 = vector.shape_cast %87 : vector<1x16x16xi1> to vector<1x16x16xi1>
    %89 = vector.broadcast %88 : vector<1x16x16xi1> to vector<16x16x16xi1>
    %90 = vector.broadcast %cst_39 : f32 to vector<16x16x16xf32>
    %91 = arith.select %89, %9, %90 : vector<16x16x16xi1>, vector<16x16x16xf32>
    %cst_40 = arith.constant dense<0.000000e+00> : vector<16x16xf32>
    %92 = vector.multi_reduction <add>, %91, %cst_40 [2] : vector<16x16x16xf32> to vector<16x16xf32>
    %c0_41 = arith.constant 0 : index
    %c6 = arith.constant 6 : index
    %c0_42 = arith.constant 0 : index
    %c0_43 = arith.constant 0 : index
    %93 = vector.load %arg4[%c0_41, %c6, %c0_42, %c0_43] : memref<1x9x16x16xf32, #tpu.memory_space<vmem>>, vector<1x1x16x16xf32>
    %94 = vector.shape_cast %93 : vector<1x1x16x16xf32> to vector<16x16xf32>
    %95 = vector.shape_cast %92 : vector<16x16xf32> to vector<1x1x16x16xf32>
    tpu.vector_store %arg4[%c0_41, %c6, %c0_42, %c0_43], %95 {strides = array<i32>} : memref<1x9x16x16xf32, #tpu.memory_space<vmem>>, vector<1x1x16x16xf32>,
    %c3_i32 = arith.constant 3 : i32
    %96 = vector.broadcast %c3_i32 : i32 to vector<16x16xi32>
    %97 = arith.addi %10, %96 : vector<16x16xi32>
    %98 = arith.cmpi eq, %11, %97 : vector<16x16xi32>
    %99 = vector.shape_cast %98 : vector<16x16xi1> to vector<1x16x16xi1>
    %cst_44 = arith.constant 0.000000e+00 : f32
    %100 = vector.shape_cast %99 : vector<1x16x16xi1> to vector<1x16x16xi1>
    %101 = vector.broadcast %100 : vector<1x16x16xi1> to vector<16x16x16xi1>
    %102 = vector.broadcast %cst_44 : f32 to vector<16x16x16xf32>
    %103 = arith.select %101, %9, %102 : vector<16x16x16xi1>, vector<16x16x16xf32>
    %cst_45 = arith.constant dense<0.000000e+00> : vector<16x16xf32>
    %104 = vector.multi_reduction <add>, %103, %cst_45 [2] : vector<16x16x16xf32> to vector<16x16xf32>
    %c0_46 = arith.constant 0 : index
    %c7 = arith.constant 7 : index
    %c0_47 = arith.constant 0 : index
    %c0_48 = arith.constant 0 : index
    %105 = vector.load %arg4[%c0_46, %c7, %c0_47, %c0_48] : memref<1x9x16x16xf32, #tpu.memory_space<vmem>>, vector<1x1x16x16xf32>
    %106 = vector.shape_cast %105 : vector<1x1x16x16xf32> to vector<16x16xf32>
    %107 = vector.shape_cast %104 : vector<16x16xf32> to vector<1x1x16x16xf32>
    tpu.vector_store %arg4[%c0_46, %c7, %c0_47, %c0_48], %107 {strides = array<i32>} : memref<1x9x16x16xf32, #tpu.memory_space<vmem>>, vector<1x1x16x16xf32>,
    %c4_i32 = arith.constant 4 : i32
    %108 = vector.broadcast %c4_i32 : i32 to vector<16x16xi32>
    %109 = arith.addi %10, %108 : vector<16x16xi32>
    %110 = arith.cmpi eq, %11, %109 : vector<16x16xi32>
    %111 = vector.shape_cast %110 : vector<16x16xi1> to vector<1x16x16xi1>
    %cst_49 = arith.constant 0.000000e+00 : f32
    %112 = vector.shape_cast %111 : vector<1x16x16xi1> to vector<1x16x16xi1>
    %113 = vector.broadcast %112 : vector<1x16x16xi1> to vector<16x16x16xi1>
    %114 = vector.broadcast %cst_49 : f32 to vector<16x16x16xf32>
    %115 = arith.select %113, %9, %114 : vector<16x16x16xi1>, vector<16x16x16xf32>
    %cst_50 = arith.constant dense<0.000000e+00> : vector<16x16xf32>
    %116 = vector.multi_reduction <add>, %115, %cst_50 [2] : vector<16x16x16xf32> to vector<16x16xf32>
    %c0_51 = arith.constant 0 : index
    %c8 = arith.constant 8 : index
    %c0_52 = arith.constant 0 : index
    %c0_53 = arith.constant 0 : index
    %117 = vector.load %arg4[%c0_51, %c8, %c0_52, %c0_53] : memref<1x9x16x16xf32, #tpu.memory_space<vmem>>, vector<1x1x16x16xf32>
    %118 = vector.shape_cast %117 : vector<1x1x16x16xf32> to vector<16x16xf32>
    %119 = vector.shape_cast %116 : vector<16x16xf32> to vector<1x1x16x16xf32>
    tpu.vector_store %arg4[%c0_51, %c8, %c0_52, %c0_53], %119 {strides = array<i32>} : memref<1x9x16x16xf32, #tpu.memory_space<vmem>>, vector<1x1x16x16xf32>,
    return
  }
  func.func @transform_0(%arg0: i32, %arg1: i32) -> (i32, i32, i32, i32) {
    %c0_i32 = arith.constant 0 : i32
    %c0_i32_0 = arith.constant 0 : i32
    %c0_i32_1 = arith.constant 0 : i32
    %c0_i32_2 = arith.constant 0 : i32
    return %arg0, %c0_i32, %c0_i32_0, %c0_i32_1 : i32, i32, i32, i32
  }
  func.func @transform_1(%arg0: i32, %arg1: i32) -> (i32, i32, i32, i32) {
    %c0_i32 = arith.constant 0 : i32
    %c0_i32_0 = arith.constant 0 : i32
    %c0_i32_1 = arith.constant 0 : i32
    %c0_i32_2 = arith.constant 0 : i32
    return %arg0, %c0_i32, %c0_i32_0, %c0_i32_1 : i32, i32, i32, i32
  }
  func.func @transform_2(%arg0: i32, %arg1: i32) -> (i32, i32, i32, i32) {
    %c0_i32 = arith.constant 0 : i32
    %c0_i32_0 = arith.constant 0 : i32
    %c0_i32_1 = arith.constant 0 : i32
    return %arg0, %arg1, %c0_i32, %c0_i32_0 : i32, i32, i32, i32
  }
}

</mosaic_0001>

<bundles_post_ra>
// kernel: correlation_layer.1
= control target key start
LH: loop header
LB: loop body
LE: loop exit
PB: predicated region body
PF: predicated region fallthrough
CT: control target
= control target key end

     0   :  { %s5329_s9 = smov 0   ;;  %s5331_s10 = smov 0   ;;  %s7809_s0 = inlined_call_operand.vmem [shape: f32[2,16,16,4], index: 0, kind: input, shape index: {}]   ;;  %s7810_s1 = inlined_call_operand.vmem [shape: f32[2,16,16,4], index: 1, kind: input, shape index: {}]   ;;  %s7811_s2 = inlined_call_operand.vmem [shape: f32[2,81,16,16], index: 2, kind: output, shape index: {}]  }
   0x1   :  { %s5333_s11 = smov 0   ;;  %s5335_s12 = smov 0  }
   0x2   :  { %s5337_s13 = smov 0  }
   0x3 LB: > { %s21_s14 = sadd.s32 1, %s5303_s11  ;;  %s24_s15 = sadd.s32 1, %s5307_s12  ;;  %s5311_s13 = sphi %s5337_s13, %s12_s13   ;;  %s5307_s12 = sphi %s5335_s12, %s7963_s12   ;;  %s5303_s11 = sphi %s5333_s11, %s7962_s11   ;;  %s5299_s10 = sphi %s5331_s10, %s7961_s10   ;;  %s5295_s9 = sphi %s5329_s9, %s7960_s9  }
   0x4   : > { %p22_p0 = scmp.ge.s32.totalorder %s21_s14, 9  ;;  %p4866_p1 = scmp.ge.s32.totalorder %s5311_s13, 1 }
   0x5   : > { %p136_p2 = scmp.lt.s32.totalorder %s5311_s13, 19 }
   0x6   : > { %s7965_s14 = smov (%p22_p0, %s21_s14), 0  ;;  %s7967_s15 = smov (!%p22_p0, %s24_s15), %s5307_s12 }
   0x7   : > { %p137_p3 = pnand %p4866_p1, %p136_p2  ;;  %p26_p4 = scmp.ge.s32.totalorder %s7967_s15, 2 }
   0x9   : > { %s7969_s15 = smov (%p26_p4, %s7967_s15), 0  ;;  %140 = sbr.rel (%p137_p3) target bundleno = 996 (0x3e4), region = 28 }
  0x10   : > { %p168_p5 = scmp.lt.s32.totalorder %s5299_s10, 1  ;;  %s178_s16 = smul.u32 9, %s5295_s9 }
  0x11   : > { %p4873_p7 = scmp.ne.s32.totalorder %s5295_s9, 0 }
  0x12   : > { %s7971_s10 = smov (!%p168_p5, %s5299_s10), 1  ;;  %p181_p6 = scmp.lt.s32.totalorder %s178_s16, 80  ;;  %vm193_vm0 = vcmask (!%p4873_p7), 31744   ;;  %v5313_v3 = vmov (!%p4873_p7), 0.0  }
  0x13   : > { %s4957_s17 = sshll.u32 %s7971_s10, 8  ;;  %s5231_s18 = smul.u32 162, %s7971_s10  ;;  %194 = vst.msk [vmem:[#allocation2] sm:$0xff] (!%p4873_p7), %vm193_vm0, %v5313_v3  ;;  %195 = vst.msk [vmem:[#allocation2 + $0x8] sm:$0xff] (!%p4873_p7), %vm193_vm0, %v5313_v3 }
  0x14   : > { %s5365_s21 = scalar_lea.vmem %s7809_s0, %s4957_s17  ;;  %s5370_s24 = scalar_lea.vmem %s7810_s1, %s4957_s17  ;;  %196 = vst.msk [vmem:[#allocation2 + $0x10] sm:$0xff] (!%p4873_p7), %vm193_vm0, %v5313_v3  ;;  %197 = vst.msk [vmem:[#allocation2 + $0x18] sm:$0xff] (!%p4873_p7), %vm193_vm0, %v5313_v3 }
  0x15   : > { %s7973_s16 = smov (!%p181_p6, %s178_s16), 80  ;;  %192 = sbr.rel (%p4873_p7) target bundleno = 45 (0x2d), region = 32 }
  0x16   : > { %s4871_s25 = sshll.u32 %s7973_s16, 1  ;;  %v211_v0 = vld [vmem:[%s5370_s24] sm:$0xff] (!%p4873_p7)  ;;  %v212_v1 = vld [vmem:[%s5370_s24 + $0x8] sm:$0xff] (!%p4873_p7)  ;;  %v213_v2 = vld [vmem:[%s5370_s24 + $0x10] sm:$0xff] (!%p4873_p7)  ;;  %198 = vst.msk [vmem:[#allocation2 + $0x20] sm:$0xff] (!%p4873_p7), %vm193_vm0, %v5313_v3 }
  0x17   : > { %s185_s26 = sadd.s32 %s5231_s18, %s4871_s25  ;;  %199 = vst.msk [vmem:[#allocation2 + $0x28] sm:$0xff] (!%p4873_p7), %vm193_vm0, %v5313_v3  ;;  %200 = vst.msk [vmem:[#allocation2 + $0x30] sm:$0xff] (!%p4873_p7), %vm193_vm0, %v5313_v3  ;;  %v214_v4 = vld [vmem:[%s5370_s24 + $0x18] sm:$0xff] (!%p4873_p7)  ;;  %v215_v5 = vld [vmem:[%s5370_s24 + $0x20] sm:$0xff] (!%p4873_p7) }
  0x18   : > { %s4872_s27 = sshll.u32 %s185_s26, 3  ;;  %201 = vst.msk [vmem:[#allocation2 + $0x38] sm:$0xff] (!%p4873_p7), %vm193_vm0, %v5313_v3  ;;  %203 = vst.msk [vmem:[#allocation2 + $0x140] sm:$0xff] (!%p4873_p7), %vm193_vm0, %v5313_v3  ;;  %v216_v6 = vld [vmem:[%s5370_s24 + $0x28] sm:$0xff] (!%p4873_p7)  ;;  %v217_v7 = vld [vmem:[%s5370_s24 + $0x30] sm:$0xff] (!%p4873_p7) }
  0x19   : > { %s5375_s30 = scalar_lea.vmem %s7811_s2, %s4872_s27  ;;  %204 = vst.msk [vmem:[#allocation2 + $0x148] sm:$0xff] (!%p4873_p7), %vm193_vm0, %v5313_v3  ;;  %205 = vst.msk [vmem:[#allocation2 + $0x150] sm:$0xff] (!%p4873_p7), %vm193_vm0, %v5313_v3  ;;  %v218_v8 = vld [vmem:[%s5370_s24 + $0x38] sm:$0xff] (!%p4873_p7)  ;;  %v219_v9 = vld [vmem:[%s5370_s24 + $0x40] sm:$0xff] (!%p4873_p7) }
  0x1a   : > { %206 = vst.msk [vmem:[#allocation2 + $0x158] sm:$0xff] (!%p4873_p7), %vm193_vm0, %v5313_v3  ;;  %207 = vst.msk [vmem:[#allocation2 + $0x160] sm:$0xff] (!%p4873_p7), %vm193_vm0, %v5313_v3  ;;  %v220_v10 = vld [vmem:[%s5370_s24 + $0x48] sm:$0xff] (!%p4873_p7)  ;;  %v221_v11 = vld [vmem:[%s5370_s24 + $0x50] sm:$0xff] (!%p4873_p7) }
  0x1b   : > { %208 = vst.msk [vmem:[#allocation2 + $0x168] sm:$0xff] (!%p4873_p7), %vm193_vm0, %v5313_v3  ;;  %209 = vst.msk [vmem:[#allocation2 + $0x170] sm:$0xff] (!%p4873_p7), %vm193_vm0, %v5313_v3  ;;  %v222_v12 = vld [vmem:[%s5370_s24 + $0x58] sm:$0xff] (!%p4873_p7)  ;;  %v223_v13 = vld [vmem:[%s5370_s24 + $0x60] sm:$0xff] (!%p4873_p7) }
  0x1c   : > { %210 = vst.msk [vmem:[#allocation2 + $0x178] sm:$0xff] %vm193_vm0, %v5313_v3  ;;  %244 = vst.msk [vmem:[#allocation2 + $0x40] sm:$0xff] %vm193_vm0, %v211_v0  ;;  %v224_v14 = vld [vmem:[%s5370_s24 + $0x68] sm:$0xff]  ;;  %v225_v15 = vld [vmem:[%s5370_s24 + $0x70] sm:$0xff] }
  0x1d   : > { %245 = vst.msk [vmem:[#allocation2 + $0x48] sm:$0xff] %vm193_vm0, %v212_v1  ;;  %246 = vst.msk [vmem:[#allocation2 + $0x50] sm:$0xff] %vm193_vm0, %v213_v2  ;;  %v226_v16 = vld [vmem:[%s5370_s24 + $0x78] sm:$0xff]  ;;  %v227_v17 = vld [vmem:[%s5370_s24 + $0x80] sm:$0xff] }
  0x1e   : > { %247 = vst.msk [vmem:[#allocation2 + $0x58] sm:$0xff] %vm193_vm0, %v214_v4  ;;  %248 = vst.msk [vmem:[#allocation2 + $0x60] sm:$0xff] %vm193_vm0, %v215_v5  ;;  %v228_v18 = vld [vmem:[%s5370_s24 + $0x88] sm:$0xff]  ;;  %v229_v19 = vld [vmem:[%s5370_s24 + $0x90] sm:$0xff] }
  0x1f   : > { %249 = vst.msk [vmem:[#allocation2 + $0x68] sm:$0xff] %vm193_vm0, %v216_v6  ;;  %250 = vst.msk [vmem:[#allocation2 + $0x70] sm:$0xff] %vm193_vm0, %v217_v7  ;;  %v230_v20 = vld [vmem:[%s5370_s24 + $0x98] sm:$0xff]  ;;  %v231_v21 = vld [vmem:[%s5370_s24 + $0xa0] sm:$0xff] }
  0x20   : > { %251 = vst.msk [vmem:[#allocation2 + $0x78] sm:$0xff] %vm193_vm0, %v218_v8  ;;  %252 = vst.msk [vmem:[#allocation2 + $0x80] sm:$0xff] %vm193_vm0, %v219_v9  ;;  %v232_v22 = vld [vmem:[%s5370_s24 + $0xa8] sm:$0xff]  ;;  %v233_v23 = vld [vmem:[%s5370_s24 + $0xb0] sm:$0xff] }
  0x21   : > { %253 = vst.msk [vmem:[#allocation2 + $0x88] sm:$0xff] %vm193_vm0, %v220_v10  ;;  %254 = vst.msk [vmem:[#allocation2 + $0x90] sm:$0xff] %vm193_vm0, %v221_v11  ;;  %v234_v24 = vld [vmem:[%s5370_s24 + $0xb8] sm:$0xff]  ;;  %v235_v25 = vld [vmem:[%s5370_s24 + $0xc0] sm:$0xff] }
  0x22   : > { %255 = vst.msk [vmem:[#allocation2 + $0x98] sm:$0xff] %vm193_vm0, %v222_v12  ;;  %256 = vst.msk [vmem:[#allocation2 + $0xa0] sm:$0xff] %vm193_vm0, %v223_v13  ;;  %v236_v26 = vld [vmem:[%s5370_s24 + $0xc8] sm:$0xff]  ;;  %v237_v27 = vld [vmem:[%s5370_s24 + $0xd0] sm:$0xff] }
  0x23   : > { %257 = vst.msk [vmem:[#allocation2 + $0xa8] sm:$0xff] %vm193_vm0, %v224_v14  ;;  %258 = vst.msk [vmem:[#allocation2 + $0xb0] sm:$0xff] %vm193_vm0, %v225_v15  ;;  %v238_v28 = vld [vmem:[%s5370_s24 + $0xd8] sm:$0xff]  ;;  %v239_v29 = vld [vmem:[%s5370_s24 + $0xe0] sm:$0xff] }
  0x24   : > { %259 = vst.msk [vmem:[#allocation2 + $0xb8] sm:$0xff] %vm193_vm0, %v226_v16  ;;  %260 = vst.msk [vmem:[#allocation2 + $0xc0] sm:$0xff] %vm193_vm0, %v227_v17  ;;  %v240_v30 = vld [vmem:[%s5370_s24 + $0xe8] sm:$0xff]  ;;  %v241_v31 = vld [vmem:[%s5370_s24 + $0xf0] sm:$0xff] }
  0x25   : > { %261 = vst.msk [vmem:[#allocation2 + $0xc8] sm:$0xff] %vm193_vm0, %v228_v18  ;;  %262 = vst.msk [vmem:[#allocation2 + $0xd0] sm:$0xff] %vm193_vm0, %v229_v19  ;;  %v242_v32 = vld [vmem:[%s5370_s24 + $0xf8] sm:$0xff] }
  0x26   : > { %263 = vst.msk [vmem:[#allocation2 + $0xd8] sm:$0xff] %vm193_vm0, %v230_v20  ;;  %264 = vst.msk [vmem:[#allocation2 + $0xe0] sm:$0xff] %vm193_vm0, %v231_v21 }
  0x27   : > { %265 = vst.msk [vmem:[#allocation2 + $0xe8] sm:$0xff] %vm193_vm0, %v232_v22  ;;  %266 = vst.msk [vmem:[#allocation2 + $0xf0] sm:$0xff] %vm193_vm0, %v233_v23 }
  0x28   : > { %267 = vst.msk [vmem:[#allocation2 + $0xf8] sm:$0xff] %vm193_vm0, %v234_v24  ;;  %268 = vst.msk [vmem:[#allocation2 + $0x100] sm:$0xff] %vm193_vm0, %v235_v25 }
  0x29   : > { %269 = vst.msk [vmem:[#allocation2 + $0x108] sm:$0xff] %vm193_vm0, %v236_v26  ;;  %270 = vst.msk [vmem:[#allocation2 + $0x110] sm:$0xff] %vm193_vm0, %v237_v27 }
  0x2a   : > { %271 = vst.msk [vmem:[#allocation2 + $0x118] sm:$0xff] %vm193_vm0, %v238_v28  ;;  %272 = vst.msk [vmem:[#allocation2 + $0x120] sm:$0xff] %vm193_vm0, %v239_v29 }
  0x2b   : > { %273 = vst.msk [vmem:[#allocation2 + $0x128] sm:$0xff] %vm193_vm0, %v240_v30  ;;  %274 = vst.msk [vmem:[#allocation2 + $0x130] sm:$0xff] %vm193_vm0, %v241_v31 }
  0x2c   : > { %275 = vst.msk [vmem:[#allocation2 + $0x138] sm:$0xff] %vm193_vm0, %v242_v32 }
  0x2d PF: > { %s4874_s3 = sshll.u32 %s5295_s9, 4  ;;  %vm374_vm1 = vcmask 31744   ;;  %v276_v33 = vld [vmem:[%s5365_s21] sm:$0xff]  ;;  %v278_v34 = vld [vmem:[%s5365_s21 + $0x10] sm:$0xff]  ;;  %v277_v50 = vld [vmem:[%s5365_s21 + $0x8] sm:$0xff]  ;;  %vm1812_vm4 = vcmask 130048  }
  0x2e   : > { %vm5463_vm2 = vmpackc.low %vm374_vm1, %vm374_vm1  ;;  %v308_v36 = vmul.f32 0.25, %v276_v33  ;;  %v310_v37 = vmul.f32 0.25, %v278_v34  ;;  %s5467_s4 = scalar_lea.vmem [#allocation2], %s4874_s3  ;;  %v279_v51 = vld [vmem:[%s5365_s21 + $0x18] sm:$0xff]  ;;  %v280_v52 = vld [vmem:[%s5365_s21 + $0x20] sm:$0xff]  ;;  %v309_v53 = vmul.f32 0.25, %v277_v50 }
  0x2f   : > { %v282_v54 = vld [vmem:[%s5365_s21 + $0x30] sm:$0xff]  ;;  %v311_v57 = vmul.f32 0.25, %v279_v51  ;;  %v312_v60 = vmul.f32 0.25, %v280_v52  ;;  %v281_v0 = vld [vmem:[%s5365_s21 + $0x28] sm:$0xff]  ;;  %v283_v1 = vld [vmem:[%s5365_s21 + $0x38] sm:$0xff]  ;;  %vm1950_vm14 = vcmask 130112  }
  0x30   : > { %5027 = vmatprep.mubr.msk.f32.mxu0 %vm374_vm1, %v308_v36  ;;  %5034 = vmatprep.mubr.msk.f32.mxu1 %vm374_vm1, %v310_v37  ;;  %v314_v61 = vmul.f32 0.25, %v282_v54  ;;  %v284_v2 = vld [vmem:[%s5365_s21 + $0x40] sm:$0xff]  ;;  %v313_v3 = vmul.f32 0.25, %v281_v0  ;;  %v286_v4 = vld [vmem:[%s5365_s21 + $0x50] sm:$0xff]  ;;  %v315_v7 = vmul.f32 0.25, %v283_v1  ;;  %v285_v14 = vld [vmem:[%s5365_s21 + $0x48] sm:$0xff] }
  0x31   : > { %v316_v10 = vmul.f32 0.25, %v284_v2  ;;  %v318_v11 = vmul.f32 0.25, %v286_v4  ;;  %v287_v15 = vld [vmem:[%s5365_s21 + $0x58] sm:$0xff]  ;;  %v288_v16 = vld [vmem:[%s5365_s21 + $0x60] sm:$0xff]  ;;  %v317_v17 = vmul.f32 0.25, %v285_v14  ;;  %v290_v18 = vld [vmem:[%s5365_s21 + $0x70] sm:$0xff] }
  0x32   : > { %v319_v21 = vmul.f32 0.25, %v287_v15  ;;  %v320_v24 = vmul.f32 0.25, %v288_v16  ;;  %v322_v25 = vmul.f32 0.25, %v290_v18  ;;  %v289_v28 = vld [vmem:[%s5365_s21 + $0x68] sm:$0xff]  ;;  %v291_v29 = vld [vmem:[%s5365_s21 + $0x78] sm:$0xff]  ;;  %v292_v30 = vld [vmem:[%s5365_s21 + $0x80] sm:$0xff] }
  0x33   : > { %v342_v38 = vld [vmem:[%s5467_s4] sm:$0xff]  ;;  %v343_v39 = vld [vmem:[%s5467_s4 + $0x8] sm:$0xff]  ;;  %v344_v40 = vld [vmem:[%s5467_s4 + $0x10] sm:$0xff]  ;;  %v321_v31 = vmul.f32 0.25, %v289_v28  ;;  %v323_v36 = vmul.f32 0.25, %v291_v29  ;;  %vm2087_vm15 = vcmask 1041409  }
  0x34   : > { %v5135_v41 = vpack.c.bf16 %v343_v39, %v342_v38  ;;  %v345_v42 = vld [vmem:[%s5467_s4 + $0x18] sm:$0xff]  ;;  %v346_v43 = vld [vmem:[%s5467_s4 + $0x20] sm:$0xff]  ;;  %v347_v44 = vld [vmem:[%s5467_s4 + $0x28] sm:$0xff]  ;;  %v324_v39 = vmul.f32 0.25, %v292_v30  ;;  %vm2089_vm0 = vcmask 1042434  }
  0x35   : > { %v5141_v45 = vpack.c.bf16 %v345_v42, %v344_v40  ;;  %v5147_v46 = vpack.c.bf16 %v347_v44, %v346_v43  ;;  %v348_v47 = vld [vmem:[%s5467_s4 + $0x30] sm:$0xff]  ;;  %v349_v48 = vld [vmem:[%s5467_s4 + $0x38] sm:$0xff]  ;;  %v350_v55 = vld [vmem:[%s5467_s4 + $0x40] sm:$0xff] }
  0x36   : > { %5137 = vmatprep.subr.msk.bf16.mxu0 %vm5463_vm2, %v5135_v41  ;;  %v5153_v49 = vpack.c.bf16 %v349_v48, %v348_v47  ;;  %v351_v56 = vld [vmem:[%s5467_s4 + $0x48] sm:$0xff]  ;;  %v352_v58 = vld [vmem:[%s5467_s4 + $0x50] sm:$0xff]  ;;  %v353_v59 = vld [vmem:[%s5467_s4 + $0x58] sm:$0xff] }
  0x37   : > { %5143 = vmatprep.subr.msk.bf16.mxu1 %vm5463_vm2, %v5141_v45  ;;  %5140 = vmatpush3.bf16.xpose.msk.msra.mxu0 %vm5463_vm2, %v5135_v41  ;;  %v5159_v62 = vpack.c.bf16 %v351_v56, %v350_v55  ;;  %v5165_v63 = vpack.c.bf16 %v353_v59, %v352_v58  ;;  %v354_v5 = vld [vmem:[%s5467_s4 + $0x60] sm:$0xff]  ;;  %v355_v6 = vld [vmem:[%s5467_s4 + $0x68] sm:$0xff]  ;;  %v356_v8 = vld [vmem:[%s5467_s4 + $0x70] sm:$0xff] }
  0x38   : > { %5146 = vmatpush3.bf16.xpose.msk.msra.mxu1 %vm5463_vm2, %v5141_v45  ;;  %5149 = vmatprep.subr.msk.bf16.mxu0 %vm5463_vm2, %v5147_v46  ;;  %v357_v9 = vld [vmem:[%s5467_s4 + $0x78] sm:$0xff]  ;;  %v5171_v12 = vpack.c.bf16 %v355_v6, %v354_v5  ;;  %v358_v19 = vld [vmem:[%s5467_s4 + $0x80] sm:$0xff]  ;;  %v359_v20 = vld [vmem:[%s5467_s4 + $0x88] sm:$0xff] }
  0x39   : > { %5155 = vmatprep.subr.msk.bf16.mxu1 %vm5463_vm2, %v5153_v49  ;;  %v5177_v13 = vpack.c.bf16 %v357_v9, %v356_v8  ;;  %v360_v22 = vld [vmem:[%s5467_s4 + $0x90] sm:$0xff]  ;;  %v361_v23 = vld [vmem:[%s5467_s4 + $0x98] sm:$0xff]  ;;  %v5183_v26 = vpack.c.bf16 %v359_v20, %v358_v19  ;;  %v362_v33 = vld [vmem:[%s5467_s4 + $0xa0] sm:$0xff]  ;;  %v1767_v19 = vlaneseq }
  0x3a   : > { %v5189_v27 = vpack.c.bf16 %v361_v23, %v360_v22  ;;  %v294_v32 = vld [vmem:[%s5365_s21 + $0x90] sm:$0xff]  ;;  %v363_v34 = vld [vmem:[%s5467_s4 + $0xa8] sm:$0xff]  ;;  %v365_v38 = vld [vmem:[%s5467_s4 + $0xb8] sm:$0xff] }
  0x3b   : > { %v364_v37 = vld [vmem:[%s5467_s4 + $0xb0] sm:$0xff]  ;;  %v326_v40 = vmul.f32 0.25, %v294_v32  ;;  %v5195_v41 = vpack.c.bf16 %v363_v34, %v362_v33  ;;  %v293_v43 = vld [vmem:[%s5365_s21 + $0x88] sm:$0xff]  ;;  %v295_v44 = vld [vmem:[%s5365_s21 + $0x98] sm:$0xff]  ;;  %v5627_v20 = vshrl.u32 %v1767_v19, 7  ;;  %v5632_v35 = vand.u32 127, %v1767_v19 }
  0x3c   : > { %v5201_v42 = vpack.c.bf16 %v365_v38, %v364_v37  ;;  %v296_v45 = vld [vmem:[%s5365_s21 + $0xa0] sm:$0xff]  ;;  %v298_v47 = vld [vmem:[%s5365_s21 + $0xb0] sm:$0xff]  ;;  %v327_v48 = vmul.f32 0.25, %v295_v44  ;;  %v297_v51 = vld [vmem:[%s5365_s21 + $0xa8] sm:$0xff] }
  0x3d   : > { %v330_v50 = vmul.f32 0.25, %v298_v47  ;;  %v299_v52 = vld [vmem:[%s5365_s21 + $0xb8] sm:$0xff]  ;;  %v366_v55 = vld [vmem:[%s5467_s4 + $0xc0] sm:$0xff]  ;;  %v367_v56 = vld [vmem:[%s5467_s4 + $0xc8] sm:$0xff]  ;;  %7868 = vst [vmem:[#allocation3_spill] sm:$0xff] %v5627_v20  ;;  %v1772_v23 = vadd.s32 4294967292, %v5627_v20  ;;  %vm5784_vm13 = vcmp.eq.s32.totalorder %v5632_v35, %v5627_v20 }
  0x3e   : > { %5028 = vmatmul.mubr.msk.f32.vlgmr.msra.gmra.mrb[0].mxu0 %vm374_vm1, %v309_v53  ;;  %v329_v53 = vmul.f32 0.25, %v297_v51  ;;  %v331_v54 = vmul.f32 0.25, %v299_v52  ;;  %v368_v58 = vld [vmem:[%s5467_s4 + $0xd0] sm:$0xff]  ;;  %v369_v59 = vld [vmem:[%s5467_s4 + $0xd8] sm:$0xff]  ;;  %v370_v5 = vld [vmem:[%s5467_s4 + $0xe0] sm:$0xff]  ;;  %7869 = vst [vmem:[#allocation4_spill] sm:$0xff] %v5632_v35 }
  0x3f   : > { %5035 = vmatmul.mubr.msk.f32.vlgmr.msra.gmra.mrb[0].mxu1 %vm374_vm1, %v311_v57  ;;  %5152 = vmatpush3.bf16.xpose.msk.msra.mxu0 %vm5463_vm2, %v5147_v46  ;;  %v325_v46 = vmul.f32 0.25, %v293_v43  ;;  %v5207_v57 = vpack.c.bf16 %v367_v56, %v366_v55  ;;  %v302_v1 = vld [vmem:[%s5365_s21 + $0xd0] sm:$0xff]  ;;  %v371_v6 = vld [vmem:[%s5467_s4 + $0xe8] sm:$0xff]  ;;  %v373_v9 = vld [vmem:[%s5467_s4 + $0xf8] sm:$0xff]  ;;  %vm5645_vm5 = vcmp.eq.s32.totalorder %v5632_v35, %v1772_v23  ;;  %v2112_v28 = vadd.s32 4294967293, %v5627_v20 }
  0x40   : > { %5158 = vmatpush3.bf16.xpose.msk.msra.mxu1 %vm5463_vm2, %v5153_v49  ;;  %5041 = vmatprep.mubr.msk.f32.mxu0 %vm374_vm1, %v312_v60  ;;  %v328_v49 = vmul.f32 0.25, %v296_v45  ;;  %v5213_v60 = vpack.c.bf16 %v369_v59, %v368_v58  ;;  %v334_v2 = vmul.f32 0.25, %v302_v1  ;;  %v372_v8 = vld [vmem:[%s5467_s4 + $0xf0] sm:$0xff] }
  0x41   : > { %5048 = vmatprep.mubr.msk.f32.mxu1 %vm374_vm1, %v314_v61  ;;  %5161 = vmatprep.subr.msk.bf16.mxu0 %vm5463_vm2, %v5159_v62  ;;  %v300_v61 = vld [vmem:[%s5365_s21 + $0xc0] sm:$0xff]  ;;  %v306_v14 = vld [vmem:[%s5365_s21 + $0xf0] sm:$0xff]  ;;  %vm5676_vm7 = vcmp.eq.s32.totalorder %v5632_v35, %v2112_v28 }
  0x42   : > { %5167 = vmatprep.subr.msk.bf16.mxu1 %vm5463_vm2, %v5165_v63  ;;  %v338_v16 = vmul.f32 0.25, %v306_v14 }
  0x46   : > { %5042 = vmatmul.mubr.msk.f32.vlgmr.msra.gmra.mrb[2].mxu0 %vm374_vm1, %v313_v3  ;;  %v303_v3 = vld [vmem:[%s5365_s21 + $0xd8] sm:$0xff] }
  0x47   : > { %5049 = vmatmul.mubr.msk.f32.vlgmr.msra.gmra.mrb[2].mxu1 %vm374_vm1, %v315_v7  ;;  %5164 = vmatpush3.bf16.xpose.msk.msra.mxu0 %vm5463_vm2, %v5159_v62  ;;  %v332_v62 = vmul.f32 0.25, %v300_v61  ;;  %v335_v4 = vmul.f32 0.25, %v303_v3  ;;  %v5219_v7 = vpack.c.bf16 %v371_v6, %v370_v5 }
  0x48   : > { %5170 = vmatpush3.bf16.xpose.msk.msra.mxu1 %vm5463_vm2, %v5165_v63  ;;  %5055 = vmatprep.mubr.msk.f32.mxu0 %vm374_vm1, %v316_v10  ;;  %v301_v63 = vld [vmem:[%s5365_s21 + $0xc8] sm:$0xff]  ;;  %v304_v10 = vld [vmem:[%s5365_s21 + $0xe0] sm:$0xff] }
  0x49   : > { %5062 = vmatprep.mubr.msk.f32.mxu1 %vm374_vm1, %v318_v11  ;;  %5173 = vmatprep.subr.msk.bf16.mxu0 %vm5463_vm2, %v5171_v12  ;;  %v333_v0 = vmul.f32 0.25, %v301_v63  ;;  %v5225_v11 = vpack.c.bf16 %v373_v9, %v372_v8 }
  0x4a   : > { %5179 = vmatprep.subr.msk.bf16.mxu1 %vm5463_vm2, %v5177_v13 }
  0x4e   : > { %5056 = vmatmul.mubr.msk.f32.vlgmr.msra.gmra.mrb[4].mxu0 %vm374_vm1, %v317_v17  ;;  %v307_v17 = vld [vmem:[%s5365_s21 + $0xf8] sm:$0xff] }
  0x4f   : > { %5063 = vmatmul.mubr.msk.f32.vlgmr.msra.gmra.mrb[4].mxu1 %vm374_vm1, %v319_v21  ;;  %5176 = vmatpush3.bf16.xpose.msk.msra.mxu0 %vm5463_vm2, %v5171_v12  ;;  %v336_v12 = vmul.f32 0.25, %v304_v10  ;;  %v339_v18 = vmul.f32 0.25, %v307_v17  ;;  %v5630_v21 = vadd.s32 8, %v5627_v20 }
  0x50   : > { %5182 = vmatpush3.bf16.xpose.msk.msra.mxu1 %vm5463_vm2, %v5177_v13  ;;  %5069 = vmatprep.mubr.msk.f32.mxu0 %vm374_vm1, %v320_v24  ;;  %v305_v13 = vld [vmem:[%s5365_s21 + $0xe8] sm:$0xff] }
  0x51   : > { %5076 = vmatprep.mubr.msk.f32.mxu1 %vm374_vm1, %v322_v25  ;;  %5185 = vmatprep.subr.msk.bf16.mxu0 %vm5463_vm2, %v5183_v26  ;;  %v337_v15 = vmul.f32 0.25, %v305_v13  ;;  %v1773_v22 = vadd.s32 4294967292, %v5630_v21  ;;  %v2113_v24 = vadd.s32 4294967293, %v5630_v21  ;;  %vm5764_vm12 = vcmp.eq.s32.totalorder %v5632_v35, %v5630_v21 }
  0x52   : > { %5191 = vmatprep.subr.msk.bf16.mxu1 %vm5463_vm2, %v5189_v27 }
  0x53   : > { %vm5638_vm3 = vcmp.eq.s32.totalorder %v5632_v35, %v1773_v22  ;;  %vm5658_vm6 = vcmp.eq.s32.totalorder %v5632_v35, %v2113_v24 }
  0x56   : > { %5070 = vmatmul.mubr.msk.f32.vlgmr.msra.gmra.mrb[6].mxu0 %vm374_vm1, %v321_v31 }
  0x57   : > { %5077 = vmatmul.mubr.msk.f32.vlgmr.msra.gmra.mrb[6].mxu1 %vm374_vm1, %v323_v36  ;;  %5188 = vmatpush3.bf16.xpose.msk.msra.mxu0 %vm5463_vm2, %v5183_v26 }
  0x58   : > { %5194 = vmatpush3.bf16.xpose.msk.msra.mxu1 %vm5463_vm2, %v5189_v27  ;;  %5083 = vmatprep.mubr.msk.f32.mxu0 %vm374_vm1, %v324_v39 }
  0x59   : > { %5090 = vmatprep.mubr.msk.f32.mxu1 %vm374_vm1, %v326_v40  ;;  %5197 = vmatprep.subr.msk.bf16.mxu0 %vm5463_vm2, %v5195_v41 }
  0x5a   : > { %5203 = vmatprep.subr.msk.bf16.mxu1 %vm5463_vm2, %v5201_v42 }
  0x5e   : > { %5084 = vmatmul.mubr.msk.f32.vlgmr.msra.gmra.mrb[8].mxu0 %vm374_vm1, %v325_v46  ;;  %v2443_v46 = vadd.s32 4294967294, %v5627_v20 }
  0x5f   : > { %5091 = vmatmul.mubr.msk.f32.vlgmr.msra.gmra.mrb[8].mxu1 %vm374_vm1, %v327_v48  ;;  %5200 = vmatpush3.bf16.xpose.msk.msra.mxu0 %vm5463_vm2, %v5195_v41  ;;  %v2444_v41 = vadd.s32 4294967294, %v5630_v21 }
  0x60   : > { %5206 = vmatpush3.bf16.xpose.msk.msra.mxu1 %vm5463_vm2, %v5201_v42  ;;  %5097 = vmatprep.mubr.msk.f32.mxu0 %vm374_vm1, %v328_v49  ;;  %vm5712_vm9 = vcmp.eq.s32.totalorder %v5632_v35, %v2443_v46 }
  0x61   : > { %5104 = vmatprep.mubr.msk.f32.mxu1 %vm374_vm1, %v330_v50  ;;  %5209 = vmatprep.subr.msk.bf16.mxu0 %vm5463_vm2, %v5207_v57  ;;  %vm5693_vm8 = vcmp.eq.s32.totalorder %v5632_v35, %v2444_v41 }
  0x62   : > { %5215 = vmatprep.subr.msk.bf16.mxu1 %vm5463_vm2, %v5213_v60 }
  0x66   : > { %5098 = vmatmul.mubr.msk.f32.vlgmr.msra.gmra.mrb[10].mxu0 %vm374_vm1, %v329_v53 }
  0x67   : > { %5105 = vmatmul.mubr.msk.f32.vlgmr.msra.gmra.mrb[10].mxu1 %vm374_vm1, %v331_v54  ;;  %5212 = vmatpush3.bf16.xpose.msk.msra.mxu0 %vm5463_vm2, %v5207_v57  ;;  %v2775_v57 = vadd.s32 4294967295, %v5630_v21 }
  0x68   : > { %5218 = vmatpush3.bf16.xpose.msk.msra.mxu1 %vm5463_vm2, %v5213_v60  ;;  %5111 = vmatprep.mubr.msk.f32.mxu0 %vm374_vm1, %v332_v62  ;;  %v2774_v62 = vadd.s32 4294967295, %v5627_v20 }
  0x69   : > { %5118 = vmatprep.mubr.msk.f32.mxu1 %vm374_vm1, %v334_v2  ;;  %5221 = vmatprep.subr.msk.bf16.mxu0 %vm5463_vm2, %v5219_v7  ;;  %vm5729_vm10 = vcmp.eq.s32.totalorder %v5632_v35, %v2775_v57 }
  0x6a   : > { %5227 = vmatprep.subr.msk.bf16.mxu1 %vm5463_vm2, %v5225_v11  ;;  %vm5748_vm11 = vcmp.eq.s32.totalorder %v5632_v35, %v2774_v62 }
  0x6e   : > { %5112 = vmatmul.mubr.msk.f32.vlgmr.msra.gmra.mrb[12].mxu0 %vm374_vm1, %v333_v0 }
  0x6f   : > { %5119 = vmatmul.mubr.msk.f32.vlgmr.msra.gmra.mrb[12].mxu1 %vm374_vm1, %v335_v4  ;;  %5224 = vmatpush3.bf16.xpose.msk.msra.mxu0 %vm5463_vm2, %v5219_v7 }
  0x70   : > { %5125 = vmatprep.mubr.msk.f32.mxu0 %vm374_vm1, %v336_v12  ;;  %5230 = vmatpush3.bf16.xpose.msk.msra.mxu1 %vm5463_vm2, %v5225_v11  ;;  %vm2093_vm2 = vcmask 1044484  }
  0x71   : > { %5132 = vmatprep.mubr.msk.f32.mxu1 %vm374_vm1, %v338_v16 }
  0x76   : > { %5126 = vmatmul.mubr.msk.f32.vlgmr.msra.gmra.mrb[14].mxu0 %vm374_vm1, %v337_v15 }
  0x77   : > { %5133 = vmatmul.mubr.msk.f32.vlgmr.msra.gmra.mrb[14].mxu1 %vm374_vm1, %v339_v18  ;;  %vm2091_vm1 = vcmask 1043459  }
 0x111   : > { %v5642_v26 = vpop.f32.mrb[0].mxu0 }
 0x112   : > { %7872 = vst [vmem:[#allocation5_spill] sm:$0xff] %v5642_v26  ;;  %v5650_v29 = vpop.f32.mrb[0].mxu1  ;;  %v5652_v30 = vpop.f32.mrb[1].mxu0  ;;  %v1781_v31 = vsel %vm5638_vm3, %v5642_v26, 0.0  ;;  %v2121_v39 = vsel %vm5658_vm6, %v5642_v26, 0.0  ;;  %v2452_v55 = vsel %vm5693_vm8, %v5642_v26, 0.0 }
 0x113   : > { %7875 = vst [vmem:[#allocation6_spill] sm:$0xff] %v5650_v29  ;;  %7876 = vst [vmem:[#allocation7_spill] sm:$0xff] %v5652_v30  ;;  %v5662_v33 = vpop.f32.mrb[1].mxu1  ;;  %v1783_v34 = vsel %vm5638_vm3, %v5650_v29, 0.0  ;;  %v1816_v36 = vsel %vm1812_vm4, %v1781_v31, 0.0  ;;  %v1780_v38 = vsel %vm5645_vm5, %v5652_v30, 0.0 }
 0x114   : > { %7879 = vst [vmem:[#allocation8_spill] sm:$0xff] %v5662_v33  ;;  %v1822_v37 = vsel %vm1812_vm4, %v1783_v34, 0.0  ;;  %1817 = vadd.xlane.f32.xlu0 %v1816_v36  ;;  %v1813_v42 = vsel %vm1812_vm4, %v1780_v38, 0.0  ;;  %v2155_v43 = vsel %vm1812_vm4, %v2121_v39, 0.0  ;;  %v2120_v44 = vsel %vm5676_vm7, %v5652_v30, 0.0 }
 0x115   : > { %1823 = vadd.xlane.f32.xlu1 %v1822_v37  ;;  %v2123_v45 = vsel %vm5658_vm6, %v5650_v29, 0.0  ;;  %v2152_v51 = vsel %vm1812_vm4, %v2120_v44, 0.0  ;;  %v2122_v54 = vsel %vm5676_vm7, %v5662_v33, 0.0  ;;  %v2486_v59 = vsel %vm1812_vm4, %v2452_v55, 0.0 }
 0x116   : > { %v2161_v53 = vsel %vm1812_vm4, %v2123_v45, 0.0  ;;  %v2158_v58 = vsel %vm1812_vm4, %v2122_v54, 0.0  ;;  %v2451_v60 = vsel %vm5712_vm9, %v5652_v30, 0.0  ;;  %v2454_v61 = vsel %vm5693_vm8, %v5650_v29, 0.0 }
 0x117   : > { %v2483_v3 = vsel %vm1812_vm4, %v2451_v60, 0.0  ;;  %v2492_v5 = vsel %vm1812_vm4, %v2454_v61, 0.0  ;;  %v2453_v6 = vsel %vm5712_vm9, %v5662_v33, 0.0  ;;  %v2783_v7 = vsel %vm5729_vm10, %v5642_v26, 0.0 }
 0x118   : > { %1814 = vadd.xlane.f32.xlu0 %v1813_v42  ;;  %v2489_v9 = vsel %vm1812_vm4, %v2453_v6, 0.0  ;;  %v2817_v10 = vsel %vm1812_vm4, %v2783_v7, 0.0  ;;  %v2782_v11 = vsel %vm5748_vm11, %v5652_v30, 0.0  ;;  %v2785_v12 = vsel %vm5729_vm10, %v5650_v29, 0.0 }
 0x119   : > { %2156 = vadd.xlane.f32.xlu1 %v2155_v43  ;;  %v5690_v47 = vpop.f32.mrb[2].mxu0  ;;  %v2814_v17 = vsel %vm1812_vm4, %v2782_v11, 0.0  ;;  %v2823_v19 = vsel %vm1812_vm4, %v2785_v12, 0.0  ;;  %v2784_v22 = vsel %vm5748_vm11, %v5662_v33, 0.0  ;;  %v3112_v23 = vsel %vm5764_vm12, %v5642_v26, 0.0 }
 0x11a   : > { %7882 = vst [vmem:[#allocation9_spill] sm:$0xff] %v5690_v47  ;;  %v5697_v49 = vpop.f32.mrb[3].mxu0  ;;  %v5699_v50 = vpop.f32.mrb[2].mxu1  ;;  %v2820_v28 = vsel %vm1812_vm4, %v2784_v22, 0.0  ;;  %v3146_v31 = vsel %vm1812_vm4, %v3112_v23, 0.0  ;;  %v3111_v34 = vsel %vm5784_vm13, %v5652_v30, 0.0 }
 0x11b   : > { %7885 = vst [vmem:[#allocation10_spill] sm:$0xff] %v5697_v49  ;;  %7886 = vst [vmem:[#allocation11_spill] sm:$0xff] %v5699_v50  ;;  %v5702_v52 = vpop.f32.mrb[3].mxu1  ;;  %v3114_v36 = vsel %vm5764_vm12, %v5650_v29, 0.0  ;;  %v3143_v41 = vsel %vm1812_vm4, %v3111_v34, 0.0  ;;  %v3113_v44 = vsel %vm5784_vm13, %v5662_v33, 0.0 }
 0x11c   : > { %7887 = vst [vmem:[#allocation12_spill] sm:$0xff] %v5702_v52  ;;  %2153 = vadd.xlane.f32.xlu0 %v2152_v51  ;;  %v3152_v43 = vsel %vm1812_vm4, %v3114_v36, 0.0  ;;  %v1782_v45 = vsel %vm5645_vm5, %v5662_v33, 0.0  ;;  %v1784_v46 = vsel %vm5645_vm5, %v5697_v49, 0.0  ;;  %v3149_v51 = vsel %vm1812_vm4, %v3113_v44, 0.0 }
 0x11d   : > { %2162 = vadd.xlane.f32.xlu1 %v2161_v53  ;;  %v1785_v53 = vsel %vm5638_vm3, %v5690_v47, 0.0  ;;  %v1819_v54 = vsel %vm1812_vm4, %v1782_v45, 0.0  ;;  %v1825_v55 = vsel %vm1812_vm4, %v1784_v46, 0.0  ;;  %v2124_v62 = vsel %vm5676_vm7, %v5697_v49, 0.0 }
 0x11e   : > { %v1828_v57 = vsel %vm1812_vm4, %v1785_v53, 0.0  ;;  %v2126_v7 = vsel %vm5676_vm7, %v5702_v52, 0.0  ;;  %v2455_v12 = vsel %vm5712_vm9, %v5697_v49, 0.0  ;;  %v2457_v23 = vsel %vm5712_vm9, %v5702_v52, 0.0 }
 0x11f   : > { %v2501_v34 = vsel %vm1812_vm4, %v2457_v23, 0.0 }
 0x120   : > { %2159 = vadd.xlane.f32.xlu0 %v2158_v58  ;;  %v1786_v58 = vsel %vm5645_vm5, %v5702_v52, 0.0 }
 0x121   : > { %2487 = vadd.xlane.f32.xlu1 %v2486_v59  ;;  %v5726_v63 = vpop.f32.mrb[4].mxu0  ;;  %v1787_v59 = vsel %vm5638_vm3, %v5699_v50, 0.0  ;;  %v1831_v60 = vsel %vm1812_vm4, %v1786_v58, 0.0 }
 0x122   : > { %7890 = vst [vmem:[#allocation13_spill] sm:$0xff] %v5726_v63  ;;  %v5733_v1 = vpop.f32.mrb[5].mxu0  ;;  %v5735_v2 = vpop.f32.mrb[4].mxu1  ;;  %v1834_v61 = vsel %vm1812_vm4, %v1787_v59, 0.0  ;;  %v3115_v59 = vsel %vm5784_vm13, %v5697_v49, 0.0 }
 0x123   : > { %7893 = vst [vmem:[#allocation14_spill] sm:$0xff] %v5733_v1  ;;  %7894 = vst [vmem:[#allocation15_spill] sm:$0xff] %v5735_v2  ;;  %v5738_v4 = vpop.f32.mrb[5].mxu1 }
 0x124   : > { %7895 = vst [vmem:[#allocation16_spill] sm:$0xff] %v5738_v4  ;;  %2484 = vadd.xlane.f32.xlu0 %v2483_v3  ;;  %v2125_v3 = vsel %vm5658_vm6, %v5690_v47, 0.0 }
 0x125   : > { %2493 = vadd.xlane.f32.xlu1 %v2492_v5  ;;  %v2164_v5 = vsel %vm1812_vm4, %v2124_v62, 0.0  ;;  %v2167_v6 = vsel %vm1812_vm4, %v2125_v3, 0.0  ;;  %v3117_v3 = vsel %vm5784_vm13, %v5702_v52, 0.0 }
 0x128   : > { %2490 = vadd.xlane.f32.xlu0 %v2489_v9  ;;  %v2127_v9 = vsel %vm5658_vm6, %v5699_v50, 0.0 }
 0x129   : > { %2818 = vadd.xlane.f32.xlu1 %v2817_v10  ;;  %v5760_v13 = vpop.f32.mrb[6].mxu0  ;;  %v2170_v10 = vsel %vm1812_vm4, %v2126_v7, 0.0  ;;  %v2173_v11 = vsel %vm1812_vm4, %v2127_v9, 0.0  ;;  %v3161_v7 = vsel %vm1812_vm4, %v3117_v3, 0.0  ;;  %v1789_v9 = vsel %vm5638_vm3, %v5726_v63, 0.0 }
 0x12a   : > { %7898 = vst [vmem:[#allocation17_spill] sm:$0xff] %v5760_v13  ;;  %v5768_v15 = vpop.f32.mrb[7].mxu0  ;;  %v5770_v16 = vpop.f32.mrb[6].mxu1 }
 0x12b   : > { %7901 = vst [vmem:[#allocation18_spill] sm:$0xff] %v5768_v15  ;;  %v5773_v18 = vpop.f32.mrb[7].mxu1 }
 0x12c   : > { %7902 = vst [vmem:[#allocation19_spill] sm:$0xff] %v5773_v18  ;;  %2815 = vadd.xlane.f32.xlu0 %v2814_v17  ;;  %v2456_v17 = vsel %vm5693_vm8, %v5690_v47, 0.0 }
 0x12d   : > { %2824 = vadd.xlane.f32.xlu1 %v2823_v19  ;;  %v2495_v19 = vsel %vm1812_vm4, %v2455_v12, 0.0  ;;  %v2498_v22 = vsel %vm1812_vm4, %v2456_v17, 0.0  ;;  %v1840_v12 = vsel %vm1812_vm4, %v1789_v9, 0.0  ;;  %v1790_v17 = vsel %vm5645_vm5, %v5738_v4, 0.0 }
 0x130   : > { %2821 = vadd.xlane.f32.xlu0 %v2820_v28  ;;  %v2458_v28 = vsel %vm5693_vm8, %v5699_v50, 0.0 }
 0x131   : > { %3147 = vadd.xlane.f32.xlu1 %v3146_v31  ;;  %v5796_v37 = vpop.f32.mrb[8].mxu0  ;;  %v2504_v36 = vsel %vm1812_vm4, %v2458_v28, 0.0  ;;  %v2128_v28 = vsel %vm5676_vm7, %v5733_v1, 0.0 }
 0x132   : > { %v5798_v38 = vpop.f32.mrb[9].mxu0  ;;  %v5800_v39 = vpop.f32.mrb[8].mxu1 }
 0x133   : > { %v5803_v42 = vpop.f32.mrb[9].mxu1 }
 0x134   : > { %3144 = vadd.xlane.f32.xlu0 %v3143_v41  ;;  %v2786_v41 = vsel %vm5748_vm11, %v5697_v49, 0.0 }
 0x135   : > { %3153 = vadd.xlane.f32.xlu1 %v3152_v43  ;;  %v2787_v43 = vsel %vm5729_vm10, %v5690_v47, 0.0  ;;  %v2826_v46 = vsel %vm1812_vm4, %v2786_v41, 0.0 }
 0x136   : > { %v2829_v53 = vsel %vm1812_vm4, %v2787_v43, 0.0  ;;  %v2130_v43 = vsel %vm5676_vm7, %v5738_v4, 0.0 }
 0x138   : > { %3150 = vadd.xlane.f32.xlu0 %v3149_v51 }
 0x139   : > { %1820 = vadd.xlane.f32.xlu1 %v1819_v54  ;;  %v5860_v31 = vpop.f32.mrb[10].mxu0  ;;  %v2788_v54 = vsel %vm5748_vm11, %v5702_v52, 0.0 }
 0x13a   : > { %v5870_v44 = vpop.f32.mrb[11].mxu0  ;;  %v5872_v45 = vpop.f32.mrb[10].mxu1 }
 0x13b   : > { %v5875_v51 = vpop.f32.mrb[11].mxu1 }
 0x13c   : > { %1826 = vadd.xlane.f32.xlu0 %v1825_v55  ;;  %v2789_v55 = vsel %vm5729_vm10, %v5699_v50, 0.0 }
 0x13d   : > { %1829 = vadd.xlane.f32.xlu1 %v1828_v57  ;;  %v2832_v57 = vsel %vm1812_vm4, %v2788_v54, 0.0  ;;  %v2835_v58 = vsel %vm1812_vm4, %v2789_v55, 0.0  ;;  %v2182_v54 = vsel %vm1812_vm4, %v2130_v43, 0.0 }
 0x140   : > { %1832 = vadd.xlane.f32.xlu0 %v1831_v60  ;;  %v3116_v60 = vsel %vm5764_vm12, %v5690_v47, 0.0 }
 0x141   : > { %1835 = vadd.xlane.f32.xlu1 %v1834_v61  ;;  %v3155_v61 = vsel %vm1812_vm4, %v3115_v59, 0.0  ;;  %v3158_v62 = vsel %vm1812_vm4, %v3116_v60, 0.0 }
 0x142   : > { %v5944_v60 = vpop.f32.mrb[12].mxu1 }
 0x143   : > { %7905 = vst [vmem:[#allocation20_spill] sm:$0xff] %v5944_v60 }
 0x144   : > { %2165 = vadd.xlane.f32.xlu0 %v2164_v5  ;;  %v3118_v5 = vsel %vm5764_vm12, %v5699_v50, 0.0 }
 0x145   : > { %2168 = vadd.xlane.f32.xlu1 %v2167_v6  ;;  %v1788_v6 = vsel %vm5645_vm5, %v5733_v1, 0.0 }
 0x148   : > { %2171 = vadd.xlane.f32.xlu0 %v2170_v10  ;;  %v3164_v10 = vsel %vm1812_vm4, %v3118_v5, 0.0  ;;  %v2461_v5 = vsel %vm5712_vm9, %v5738_v4, 0.0 }
 0x149   : > { %2174 = vadd.xlane.f32.xlu1 %v2173_v11  ;;  %v1837_v11 = vsel %vm1812_vm4, %v1788_v6, 0.0  ;;  %v2462_v6 = vsel %vm5693_vm8, %v5735_v2, 0.0 }
 0x14a   : > { %v2516_v9 = vsel %vm1812_vm4, %v2462_v6, 0.0  ;;  %v1794_v6 = vsel %vm5645_vm5, %v5773_v18, 0.0 }
 0x14c   : > { %2496 = vadd.xlane.f32.xlu0 %v2495_v19  ;;  %v1791_v19 = vsel %vm5638_vm3, %v5735_v2, 0.0 }
 0x14d   : > { %2499 = vadd.xlane.f32.xlu1 %v2498_v22  ;;  %v1843_v22 = vsel %vm1812_vm4, %v1790_v17, 0.0  ;;  %v1846_v23 = vsel %vm1812_vm4, %v1791_v19, 0.0  ;;  %v2792_v19 = vsel %vm5748_vm11, %v5738_v4, 0.0 }
 0x150   : > { %2502 = vadd.xlane.f32.xlu0 %v2501_v34  ;;  %v2129_v34 = vsel %vm5658_vm6, %v5726_v63, 0.0 }
 0x151   : > { %2505 = vadd.xlane.f32.xlu1 %v2504_v36  ;;  %v2176_v36 = vsel %vm1812_vm4, %v2128_v28, 0.0  ;;  %v2179_v41 = vsel %vm1812_vm4, %v2129_v34, 0.0  ;;  %v3119_v34 = vsel %vm5784_vm13, %v5733_v1, 0.0 }
 0x154   : > { %2827 = vadd.xlane.f32.xlu0 %v2826_v46  ;;  %v2131_v46 = vsel %vm5658_vm6, %v5735_v2, 0.0 }
 0x155   : > { %2830 = vadd.xlane.f32.xlu1 %v2829_v53  ;;  %v5932_v53 = vpop.f32.mrb[12].mxu0  ;;  %v2185_v55 = vsel %vm1812_vm4, %v2131_v46, 0.0  ;;  %v3121_v46 = vsel %vm5784_vm13, %v5738_v4, 0.0 }
 0x156   : > { %v5942_v59 = vpop.f32.mrb[13].mxu0 }
 0x158   : > { %2833 = vadd.xlane.f32.xlu0 %v2832_v57  ;;  %v2459_v57 = vsel %vm5712_vm9, %v5733_v1, 0.0 }
 0x159   : > { %2836 = vadd.xlane.f32.xlu1 %v2835_v58  ;;  %v2460_v58 = vsel %vm5693_vm8, %v5726_v63, 0.0 }
 0x15a   : > { %v2510_v3 = vsel %vm1812_vm4, %v2460_v58, 0.0  ;;  %v1793_v58 = vsel %vm5638_vm3, %v5760_v13, 0.0 }
 0x15c   : > { %3156 = vadd.xlane.f32.xlu0 %v3155_v61  ;;  %v2507_v61 = vsel %vm1812_vm4, %v2459_v57, 0.0  ;;  %v3173_v57 = vsel %vm1812_vm4, %v3121_v46, 0.0 }
 0x15d   : > { %3159 = vadd.xlane.f32.xlu1 %v3158_v62  ;;  %v5947_v62 = vpop.f32.mrb[13].mxu1 }
 0x15e   : > { %7906 = vst [vmem:[#allocation21_spill] sm:$0xff] %v5947_v62 }
 0x160   : > { %3162 = vadd.xlane.f32.xlu0 %v3161_v7  ;;  %v2513_v7 = vsel %vm1812_vm4, %v2461_v5, 0.0  ;;  %v1852_v5 = vsel %vm1812_vm4, %v1793_v58, 0.0 }
 0x161   : > { %3165 = vadd.xlane.f32.xlu1 %v3164_v10  ;;  %v2790_v10 = vsel %vm5748_vm11, %v5733_v1, 0.0 }
 0x164   : > { %1838 = vadd.xlane.f32.xlu0 %v1837_v11  ;;  %v2791_v11 = vsel %vm5729_vm10, %v5726_v63, 0.0 }
 0x165   : > { %1841 = vadd.xlane.f32.xlu1 %v1840_v12  ;;  %v2838_v12 = vsel %vm1812_vm4, %v2790_v10, 0.0  ;;  %v2841_v17 = vsel %vm1812_vm4, %v2791_v11, 0.0  ;;  %v6006_v11 = vpop.f32.mrb[14].mxu0 }
 0x166   : > { %7907 = vst [vmem:[#allocation22_spill] sm:$0xff] %v6006_v11 }
 0x168   : > { %1844 = vadd.xlane.f32.xlu0 %v1843_v22  ;;  %v2793_v22 = vsel %vm5729_vm10, %v5735_v2, 0.0 }
 0x169   : > { %1847 = vadd.xlane.f32.xlu1 %v1846_v23  ;;  %v2844_v23 = vsel %vm1812_vm4, %v2792_v19, 0.0  ;;  %v2847_v28 = vsel %vm1812_vm4, %v2793_v22, 0.0  ;;  %v6014_v19 = vpop.f32.mrb[15].mxu0 }
 0x16a   : > { %7908 = vst [vmem:[#allocation23_spill] sm:$0xff] %v6014_v19 }
 0x16c   : > { %2177 = vadd.xlane.f32.xlu0 %v2176_v36  ;;  %v3120_v36 = vsel %vm5764_vm12, %v5726_v63, 0.0 }
 0x16d   : > { %2180 = vadd.xlane.f32.xlu1 %v2179_v41  ;;  %v3167_v41 = vsel %vm1812_vm4, %v3119_v34, 0.0  ;;  %v3170_v43 = vsel %vm1812_vm4, %v3120_v36, 0.0  ;;  %v2134_v34 = vsel %vm5676_vm7, %v5773_v18, 0.0 }
 0x170   : > { %2183 = vadd.xlane.f32.xlu0 %v2182_v54  ;;  %v3122_v54 = vsel %vm5764_vm12, %v5735_v2, 0.0 }
 0x171   : > { %2186 = vadd.xlane.f32.xlu1 %v2185_v55  ;;  %v1792_v55 = vsel %vm5645_vm5, %v5768_v15, 0.0 }
 0x174   : > { %2508 = vadd.xlane.f32.xlu0 %v2507_v61  ;;  %v3176_v61 = vsel %vm1812_vm4, %v3122_v54, 0.0  ;;  %v2463_v54 = vsel %vm5712_vm9, %v5768_v15, 0.0 }
 0x175   : > { %2511 = vadd.xlane.f32.xlu1 %v2510_v3  ;;  %v1849_v3 = vsel %vm1812_vm4, %v1792_v55, 0.0  ;;  %v2464_v55 = vsel %vm5693_vm8, %v5760_v13, 0.0 }
 0x176   : > { %v2522_v58 = vsel %vm1812_vm4, %v2464_v55, 0.0 }
 0x178   : > { %2514 = vadd.xlane.f32.xlu0 %v2513_v7  ;;  %v1795_v7 = vsel %vm5638_vm3, %v5770_v16, 0.0 }
 0x179   : > { %2517 = vadd.xlane.f32.xlu1 %v2516_v9  ;;  %v1855_v9 = vsel %vm1812_vm4, %v1794_v6, 0.0  ;;  %v1858_v10 = vsel %vm1812_vm4, %v1795_v7, 0.0 }
 0x17c   : > { %2839 = vadd.xlane.f32.xlu0 %v2838_v12  ;;  %v2132_v12 = vsel %vm5676_vm7, %v5768_v15, 0.0 }
 0x17d   : > { %2842 = vadd.xlane.f32.xlu1 %v2841_v17  ;;  %v2133_v17 = vsel %vm5658_vm6, %v5760_v13, 0.0  ;;  %v2188_v22 = vsel %vm1812_vm4, %v2132_v12, 0.0  ;;  %v2795_v12 = vsel %vm5729_vm10, %v5760_v13, 0.0 }
 0x180   : > { %2845 = vadd.xlane.f32.xlu0 %v2844_v23  ;;  %v6017_v23 = vpop.f32.mrb[14].mxu1 }
 0x181   : > { %2848 = vadd.xlane.f32.xlu1 %v2847_v28  ;;  %7909 = vst [vmem:[#allocation24_spill] sm:$0xff] %v6017_v23  ;;  %v2191_v28 = vsel %vm1812_vm4, %v2133_v17, 0.0  ;;  %v6023_v36 = vpop.f32.mrb[15].mxu1  ;;  %v1811_v29 = vsel %vm5638_vm3, %v6017_v23, 0.0 }
 0x182   : > { %v1906_v26 = vsel %vm1812_vm4, %v1811_v29, 0.0  ;;  %v1810_v25 = vsel %vm5645_vm5, %v6023_v36, 0.0  ;;  %v2150_v32 = vsel %vm5676_vm7, %v6023_v36, 0.0 }
 0x183   : > { %v1903_v27 = vsel %vm1812_vm4, %v1810_v25, 0.0 }
 0x184   : > { %3168 = vadd.xlane.f32.xlu0 %v3167_v41  ;;  %v2135_v41 = vsel %vm5658_vm6, %v5770_v16, 0.0 }
 0x185   : > { %3171 = vadd.xlane.f32.xlu1 %v3170_v43  ;;  %v2194_v43 = vsel %vm1812_vm4, %v2134_v34, 0.0  ;;  %v2197_v46 = vsel %vm1812_vm4, %v2135_v41, 0.0  ;;  %v2853_v41 = vsel %vm1812_vm4, %v2795_v12, 0.0 }
 0x188   : > { %3174 = vadd.xlane.f32.xlu0 %v3173_v57  ;;  %v2519_v57 = vsel %vm1812_vm4, %v2463_v54, 0.0  ;;  %v2797_v54 = vsel %vm5729_vm10, %v5770_v16, 0.0 }
 0x189   : > { %3177 = vadd.xlane.f32.xlu1 %v3176_v61  ;;  %v2465_v61 = vsel %vm5712_vm9, %v5773_v18, 0.0 }
 0x18a   : > { %v2525_v6 = vsel %vm1812_vm4, %v2465_v61, 0.0 }
 0x18c   : > { %1850 = vadd.xlane.f32.xlu0 %v1849_v3  ;;  %v2466_v3 = vsel %vm5693_vm8, %v5770_v16, 0.0 }
 0x18d   : > { %1853 = vadd.xlane.f32.xlu1 %v1852_v5  ;;  %v1945_v5 = vadd.s32 4294967288, %v5632_v35  ;;  %v2528_v7 = vsel %vm1812_vm4, %v2466_v3, 0.0 }
 0x18f   : > { %v6054_v17 = vsub.s32 %v1945_v5, %v5627_v20  ;;  %v2859_v5 = vsel %vm1812_vm4, %v2797_v54, 0.0 }
 0x190   : > { %1856 = vadd.xlane.f32.xlu0 %v1855_v9  ;;  %v2794_v9 = vsel %vm5748_vm11, %v5768_v15, 0.0 }
 0x191   : > { %1859 = vadd.xlane.f32.xlu1 %v1858_v10  ;;  %v2850_v34 = vsel %vm1812_vm4, %v2794_v9, 0.0  ;;  %v3124_v9 = vsel %vm5764_vm12, %v5760_v13, 0.0  ;;  %v2798_v13 = vsel %vm5748_vm11, %v5798_v38, 0.0 }
 0x192   : > { %v3182_v54 = vsel %vm1812_vm4, %v3124_v9, 0.0  ;;  %v1799_v9 = vsel %vm5638_vm3, %v5800_v39, 0.0 }
 0x194   : > { %2189 = vadd.xlane.f32.xlu0 %v2188_v22 }
 0x195   : > { %2192 = vadd.xlane.f32.xlu1 %v2191_v28  ;;  %v6060_v28 = vsub.s32 %v5632_v35, %v5627_v20 }
 0x198   : > { %2195 = vadd.xlane.f32.xlu0 %v2194_v43  ;;  %v2796_v43 = vsel %vm5748_vm11, %v5773_v18, 0.0 }
 0x199   : > { %2198 = vadd.xlane.f32.xlu1 %v2197_v46  ;;  %v2856_v61 = vsel %vm1812_vm4, %v2796_v43, 0.0  ;;  %v1797_v43 = vsel %vm5638_vm3, %v5796_v37, 0.0 }
 0x19c   : > { %2520 = vadd.xlane.f32.xlu0 %v2519_v57 }
 0x19d   : > { %2523 = vadd.xlane.f32.xlu1 %v2522_v58 }
 0x1a0   : > { %2526 = vadd.xlane.f32.xlu0 %v2525_v6  ;;  %v3123_v6 = vsel %vm5784_vm13, %v5768_v15, 0.0 }
 0x1a1   : > { %2529 = vadd.xlane.f32.xlu1 %v2528_v7  ;;  %v1818_v10 = vpop.xlane.xlu0 %1817 }
 0x1a2   : > { %v6056_v22 = vpop.xlane.xlu1 %1823  ;;  %v1949_v55 = vrot.slane %v1818_v10, %v6054_v17 }
 0x1a4   : > { %2851 = vadd.xlane.f32.xlu0 %v2850_v34 }
 0x1a5   : > { %2854 = vadd.xlane.f32.xlu1 %v2853_v41  ;;  %v1815_v46 = vpop.xlane.xlu0 %1814  ;;  %v3179_v41 = vsel %vm1812_vm4, %v3123_v6, 0.0  ;;  %v1864_v6 = vsel %vm1812_vm4, %v1797_v43, 0.0 }
 0x1a6   : > { %v2157_v57 = vpop.xlane.xlu1 %2156  ;;  %v1944_v58 = vrot.slane %v1815_v46, %v6060_v28 }
 0x1a7   : > { %v2287_v10 = vrot.slane %v2157_v57, %v6054_v17 }
 0x1a8   : > { %v6074_v3 = vsel %vm1950_vm14, %v1949_v55, %v1944_v58  ;;  %2857 = vadd.xlane.f32.xlu0 %v2856_v61  ;;  %v3125_v55 = vsel %vm5784_vm13, %v5773_v18, 0.0 }
 0x1a9   : > { %2860 = vadd.xlane.f32.xlu1 %v2859_v5  ;;  %v2154_v7 = vpop.xlane.xlu0 %2153 }
 0x1aa   : > { %v2163_v12 = vpop.xlane.xlu1 %2162  ;;  %v2283_v34 = vrot.slane %v2154_v7, %v6060_v28  ;;  %v3185_v7 = vsel %vm1812_vm4, %v3125_v55, 0.0 }
 0x1ab   : > { %v2296_v58 = vrot.slane %v2163_v12, %v6054_v17 }
 0x1ac   : > { %v2288_v46 = vsel %vm1950_vm14, %v2287_v10, %v2283_v34  ;;  %3180 = vadd.xlane.f32.xlu0 %v3179_v41  ;;  %v1796_v34 = vsel %vm5645_vm5, %v5798_v38, 0.0 }
 0x1ad   : > { %3183 = vadd.xlane.f32.xlu1 %v3182_v54  ;;  %v2160_v57 = vpop.xlane.xlu0 %2159  ;;  %v1861_v18 = vsel %vm1812_vm4, %v1796_v34, 0.0 }
 0x1ae   : > { %v2488_v61 = vpop.xlane.xlu1 %2487  ;;  %v2292_v5 = vrot.slane %v2160_v57, %v6060_v28  ;;  %v1870_v57 = vsel %vm1812_vm4, %v1799_v9, 0.0 }
 0x1af   : > { %v2618_v43 = vrot.slane %v2488_v61, %v6054_v17  ;;  %v2137_v61 = vsel %vm5658_vm6, %v5796_v37, 0.0 }
 0x1b0   : > { %v2297_v10 = vsel %vm1950_vm14, %v2296_v58, %v2292_v5  ;;  %3186 = vadd.xlane.f32.xlu0 %v3185_v7  ;;  %v1798_v5 = vsel %vm5645_vm5, %v5803_v42, 0.0 }
 0x1b1   : > { %v6106_v12 = vsel %vm2087_vm15, %v2297_v10, %v2288_v46  ;;  %1865 = vadd.xlane.f32.xlu1 %v1864_v6  ;;  %v2485_v41 = vpop.xlane.xlu0 %2484  ;;  %v1867_v10 = vsel %vm1812_vm4, %v1798_v5, 0.0 }
 0x1b2   : > { %v2494_v54 = vpop.xlane.xlu1 %2493  ;;  %v2614_v55 = vrot.slane %v2485_v41, %v6060_v28  ;;  %v2136_v41 = vsel %vm5676_vm7, %v5798_v38, 0.0 }
 0x1b3   : > { %v2627_v6 = vrot.slane %v2494_v54, %v6054_v17  ;;  %v2139_v54 = vsel %vm5658_vm6, %v5800_v39, 0.0 }
 0x1b4   : > { %v2619_v58 = vsel %vm1950_vm14, %v2618_v43, %v2614_v55  ;;  %1862 = vadd.xlane.f32.xlu0 %v1861_v18  ;;  %v2203_v18 = vsel %vm1812_vm4, %v2137_v61, 0.0  ;;  %v2200_v61 = vsel %vm1812_vm4, %v2136_v41, 0.0 }
 0x1b5   : > { %1871 = vadd.xlane.f32.xlu1 %v1870_v57  ;;  %v2491_v46 = vpop.xlane.xlu0 %2490 }
 0x1b6   : > { %v2819_v7 = vpop.xlane.xlu1 %2818  ;;  %v2623_v9 = vrot.slane %v2491_v46, %v6060_v28 }
 0x1b7   : > { %v2949_v57 = vrot.slane %v2819_v7, %v6054_v17  ;;  %v2468_v7 = vsel %vm5693_vm8, %v5796_v37, 0.0 }
 0x1b8   : > { %v2628_v34 = vsel %vm1950_vm14, %v2627_v6, %v2623_v9  ;;  %1868 = vadd.xlane.f32.xlu0 %v1867_v10  ;;  %v2209_v9 = vsel %vm1812_vm4, %v2139_v54, 0.0 }
 0x1b9   : > { %v6128_v43 = vsel %vm2087_vm15, %v2628_v34, %v2619_v58  ;;  %2204 = vadd.xlane.f32.xlu1 %v2203_v18  ;;  %v2816_v55 = vpop.xlane.xlu0 %2815  ;;  %v2138_v58 = vsel %vm5676_vm7, %v5803_v42, 0.0 }
 0x1ba   : > { %v2825_v5 = vpop.xlane.xlu1 %2824  ;;  %v2945_v46 = vrot.slane %v2816_v55, %v6060_v28  ;;  %v2206_v55 = vsel %vm1812_vm4, %v2138_v58, 0.0 }
 0x1bb   : > { %v2958_v34 = vrot.slane %v2825_v5, %v6054_v17  ;;  %v2470_v5 = vsel %vm5693_vm8, %v5800_v39, 0.0 }
 0x1bc   : > { %v2950_v6 = vsel %vm1950_vm14, %v2949_v57, %v2945_v46  ;;  %2201 = vadd.xlane.f32.xlu0 %v2200_v61  ;;  %v2534_v57 = vsel %vm1812_vm4, %v2468_v7, 0.0  ;;  %v2467_v46 = vsel %vm5712_vm9, %v5798_v38, 0.0 }
 0x1bd   : > { %2210 = vadd.xlane.f32.xlu1 %v2209_v9  ;;  %v2822_v10 = vpop.xlane.xlu0 %2821  ;;  %v2531_v7 = vsel %vm1812_vm4, %v2467_v46, 0.0 }
 0x1be   : > { %v3148_v18 = vpop.xlane.xlu1 %3147  ;;  %v2954_v41 = vrot.slane %v2822_v10, %v6060_v28 }
 0x1bf   : > { %v3278_v58 = vrot.slane %v3148_v18, %v6054_v17  ;;  %v2799_v18 = vsel %vm5729_vm10, %v5796_v37, 0.0 }
 0x1c0   : > { %v2959_v54 = vsel %vm1950_vm14, %v2958_v34, %v2954_v41  ;;  %2207 = vadd.xlane.f32.xlu0 %v2206_v55  ;;  %v2540_v55 = vsel %vm1812_vm4, %v2470_v5, 0.0 }
 0x1c1   : > { %v6153_v61 = vsel %vm2087_vm15, %v2959_v54, %v2950_v6  ;;  %2535 = vadd.xlane.f32.xlu1 %v2534_v57  ;;  %v3145_v9 = vpop.xlane.xlu0 %3144  ;;  %v2469_v6 = vsel %vm5712_vm9, %v5803_v42, 0.0 }
 0x1c2   : > { %v3154_v10 = vpop.xlane.xlu1 %3153  ;;  %v3274_v34 = vrot.slane %v3145_v9, %v6060_v28 }
 0x1c3   : > { %v3287_v57 = vrot.slane %v3154_v10, %v6054_v17 }
 0x1c4   : > { %v3279_v41 = vsel %vm1950_vm14, %v3278_v58, %v3274_v34  ;;  %2532 = vadd.xlane.f32.xlu0 %v2531_v7  ;;  %v1959_v58 = vrot.slane %v6056_v22, %v6054_v17  ;;  %v2537_v34 = vsel %vm1812_vm4, %v2469_v6, 0.0  ;;  %v2801_v6 = vsel %vm5729_vm10, %v5800_v39, 0.0 }
 0x1c5   : > { %2541 = vadd.xlane.f32.xlu1 %v2540_v55  ;;  %v3151_v54 = vpop.xlane.xlu0 %3150  ;;  %v2865_v55 = vsel %vm1812_vm4, %v2799_v18, 0.0 }
 0x1c6   : > { %v1821_v9 = vpop.xlane.xlu1 %1820  ;;  %v3283_v46 = vrot.slane %v3151_v54, %v6060_v28 }
 0x1c7   : > { %v1955_v5 = vrot.slane %v1821_v9, %v6060_v28 }
 0x1c8   : > { %v3288_v7 = vsel %vm1950_vm14, %v3287_v57, %v3283_v46  ;;  %2538 = vadd.xlane.f32.xlu0 %v2537_v34  ;;  %v2800_v34 = vsel %vm5748_vm11, %v5803_v42, 0.0 }
 0x1c9   : > { %v1960_v10 = vsel %vm1950_vm14, %v1959_v58, %v1955_v5  ;;  %v6182_v54 = vsel %vm2087_vm15, %v3288_v7, %v3279_v41  ;;  %2866 = vadd.xlane.f32.xlu1 %v2865_v55  ;;  %v1827_v22 = vpop.xlane.xlu0 %1826  ;;  %v2862_v58 = vsel %vm1812_vm4, %v2798_v13, 0.0  ;;  %v1801_v41 = vsel %vm5638_vm3, %v5860_v31, 0.0 }
 0x1ca   : > { %v2088_v57 = vsel %vm2087_vm15, %v1960_v10, %v6074_v3  ;;  %v1830_v18 = vpop.xlane.xlu1 %1829  ;;  %v1964_v9 = vrot.slane %v1827_v22, %v6060_v28  ;;  %v2871_v5 = vsel %vm1812_vm4, %v2801_v6, 0.0  ;;  %v1876_v22 = vsel %vm1812_vm4, %v1801_v41, 0.0 }
 0x1cb   : > { %v1968_v46 = vrot.slane %v1830_v18, %v6054_v17  ;;  %v2868_v6 = vsel %vm1812_vm4, %v2800_v34, 0.0 }
 0x1cc   : > { %2863 = vadd.xlane.f32.xlu0 %v2862_v58  ;;  %v1803_v58 = vsel %vm5638_vm3, %v5872_v45, 0.0 }
 0x1cd   : > { %v1969_v3 = vsel %vm1950_vm14, %v1968_v46, %v1964_v9  ;;  %2872 = vadd.xlane.f32.xlu1 %v2871_v5  ;;  %v1833_v7 = vpop.xlane.xlu0 %1832  ;;  %v1800_v9 = vsel %vm5645_vm5, %v5870_v44, 0.0  ;;  %v1882_v34 = vsel %vm1812_vm4, %v1803_v58, 0.0 }
 0x1ce   : > { %v2090_v55 = vsel %vm2089_vm0, %v1969_v3, %v2088_v57  ;;  %v1836_v10 = vpop.xlane.xlu1 %1835  ;;  %v1973_v13 = vrot.slane %v1833_v7, %v6060_v28 }
 0x1cf   : > { %v1977_v18 = vrot.slane %v1836_v10, %v6054_v17  ;;  %v1873_v10 = vsel %vm1812_vm4, %v1800_v9, 0.0 }
 0x1d0   : > { %2869 = vadd.xlane.f32.xlu0 %v2868_v6  ;;  %v1802_v6 = vsel %vm5645_vm5, %v5875_v51, 0.0 }
 0x1d1   : > { %v1978_v57 = vsel %vm1950_vm14, %v1977_v18, %v1973_v13  ;;  %1877 = vadd.xlane.f32.xlu1 %v1876_v22  ;;  %v2166_v46 = vpop.xlane.xlu0 %2165 }
 0x1d2   : > { %v6213_v41 = vsel %vm2091_vm1, %v1978_v57, %v2090_v55  ;;  %v2169_v5 = vpop.xlane.xlu1 %2168  ;;  %v2301_v3 = vrot.slane %v2166_v46, %v6060_v28  ;;  %v2141_v55 = vsel %vm5658_vm6, %v5860_v31, 0.0  ;;  %v1879_v46 = vsel %vm1812_vm4, %v1802_v6, 0.0 }
 0x1d3   : > { %v2305_v7 = vrot.slane %v2169_v5, %v6054_v17  ;;  %v2215_v5 = vsel %vm1812_vm4, %v2141_v55, 0.0 }
 0x1d4   : > { %1874 = vadd.xlane.f32.xlu0 %v1873_v10 }
 0x1d5   : > { %v2306_v13 = vsel %vm1950_vm14, %v2305_v7, %v2301_v3  ;;  %1883 = vadd.xlane.f32.xlu1 %v1882_v34  ;;  %v2172_v22 = vpop.xlane.xlu0 %2171  ;;  %v2140_v3 = vsel %vm5676_vm7, %v5870_v44, 0.0 }
 0x1d6   : > { %v2425_v18 = vsel %vm2089_vm0, %v2306_v13, %v6106_v12  ;;  %v2175_v58 = vpop.xlane.xlu1 %2174  ;;  %v2310_v57 = vrot.slane %v2172_v22, %v6060_v28  ;;  %v2143_v12 = vsel %vm5658_vm6, %v5872_v45, 0.0  ;;  %v2212_v55 = vsel %vm1812_vm4, %v2140_v3, 0.0 }
 0x1d7   : > { %v2314_v9 = vrot.slane %v2175_v58, %v6054_v17  ;;  %v2221_v58 = vsel %vm1812_vm4, %v2143_v12, 0.0 }
 0x1d8   : > { %1880 = vadd.xlane.f32.xlu0 %v1879_v46 }
 0x1d9   : > { %v2315_v34 = vsel %vm1950_vm14, %v2314_v9, %v2310_v57  ;;  %2216 = vadd.xlane.f32.xlu1 %v2215_v5  ;;  %v2497_v7 = vpop.xlane.xlu0 %2496  ;;  %v2142_v57 = vsel %vm5676_vm7, %v5875_v51, 0.0 }
 0x1da   : > { %v6240_v10 = vsel %vm2091_vm1, %v2315_v34, %v2425_v18  ;;  %v2500_v13 = vpop.xlane.xlu1 %2499  ;;  %v2632_v6 = vrot.slane %v2497_v7, %v6060_v28  ;;  %v2472_v18 = vsel %vm5693_vm8, %v5860_v31, 0.0  ;;  %v2218_v12 = vsel %vm1812_vm4, %v2142_v57, 0.0 }
 0x1db   : > { %v2636_v22 = vrot.slane %v2500_v13, %v6054_v17  ;;  %v2546_v13 = vsel %vm1812_vm4, %v2472_v18, 0.0 }
 0x1dc   : > { %2213 = vadd.xlane.f32.xlu0 %v2212_v55 }
 0x1dd   : > { %v2637_v9 = vsel %vm1950_vm14, %v2636_v22, %v2632_v6  ;;  %2222 = vadd.xlane.f32.xlu1 %v2221_v58  ;;  %v2503_v46 = vpop.xlane.xlu0 %2502  ;;  %v2471_v6 = vsel %vm5712_vm9, %v5870_v44, 0.0 }
 0x1de   : > { %v2756_v5 = vsel %vm2089_vm0, %v2637_v9, %v6128_v43  ;;  %v2506_v34 = vpop.xlane.xlu1 %2505  ;;  %v2641_v3 = vrot.slane %v2503_v46, %v6060_v28  ;;  %v2474_v43 = vsel %vm5693_vm8, %v5872_v45, 0.0  ;;  %v2543_v18 = vsel %vm1812_vm4, %v2471_v6, 0.0 }
 0x1df   : > { %v2645_v7 = vrot.slane %v2506_v34, %v6054_v17  ;;  %v2552_v34 = vsel %vm1812_vm4, %v2474_v43, 0.0 }
 0x1e0   : > { %2219 = vadd.xlane.f32.xlu0 %v2218_v12 }
 0x1e1   : > { %v2646_v22 = vsel %vm1950_vm14, %v2645_v7, %v2641_v3  ;;  %2547 = vadd.xlane.f32.xlu1 %v2546_v13  ;;  %v2828_v55 = vpop.xlane.xlu0 %2827  ;;  %v2473_v3 = vsel %vm5712_vm9, %v5875_v51, 0.0 }
 0x1e2   : > { %v6267_v58 = vsel %vm2091_vm1, %v2646_v22, %v2756_v5  ;;  %v2831_v9 = vpop.xlane.xlu1 %2830  ;;  %v2963_v57 = vrot.slane %v2828_v55, %v6060_v28  ;;  %v2803_v5 = vsel %vm5729_vm10, %v5860_v31, 0.0  ;;  %v2549_v43 = vsel %vm1812_vm4, %v2473_v3, 0.0 }
 0x1e3   : > { %v2967_v46 = vrot.slane %v2831_v9, %v6054_v17  ;;  %v2877_v9 = vsel %vm1812_vm4, %v2803_v5, 0.0 }
 0x1e4   : > { %2544 = vadd.xlane.f32.xlu0 %v2543_v18 }
 0x1e5   : > { %v2968_v7 = vsel %vm1950_vm14, %v2967_v46, %v2963_v57  ;;  %2553 = vadd.xlane.f32.xlu1 %v2552_v34  ;;  %v2834_v12 = vpop.xlane.xlu0 %2833  ;;  %v2802_v57 = vsel %vm5748_vm11, %v5870_v44, 0.0 }
 0x1e6   : > { %v3087_v13 = vsel %vm2089_vm0, %v2968_v7, %v6153_v61  ;;  %v2837_v22 = vpop.xlane.xlu1 %2836  ;;  %v2972_v6 = vrot.slane %v2834_v12, %v6060_v28  ;;  %v2805_v61 = vsel %vm5729_vm10, %v5872_v45, 0.0  ;;  %v2874_v5 = vsel %vm1812_vm4, %v2802_v57, 0.0 }
 0x1e7   : > { %v2976_v55 = vrot.slane %v2837_v22, %v6054_v17  ;;  %v1805_v22 = vsel %vm5638_vm3, %v5932_v53, 0.0 }
 0x1e8   : > { %2550 = vadd.xlane.f32.xlu0 %v2549_v43 }
 0x1e9   : > { %v2977_v46 = vsel %vm1950_vm14, %v2976_v55, %v2972_v6  ;;  %2878 = vadd.xlane.f32.xlu1 %v2877_v9  ;;  %v3157_v18 = vpop.xlane.xlu0 %3156  ;;  %v2883_v6 = vsel %vm1812_vm4, %v2805_v61, 0.0  ;;  %v2804_v55 = vsel %vm5748_vm11, %v5875_v51, 0.0 }
 0x1ea   : > { %v6294_v34 = vsel %vm2091_vm1, %v2977_v46, %v3087_v13  ;;  %v3160_v7 = vpop.xlane.xlu1 %3159  ;;  %v3292_v3 = vrot.slane %v3157_v18, %v6060_v28  ;;  %v1888_v18 = vsel %vm1812_vm4, %v1805_v22, 0.0  ;;  %v2880_v61 = vsel %vm1812_vm4, %v2804_v55, 0.0 }
 0x1eb   : > { %v3296_v12 = vrot.slane %v3160_v7, %v6054_v17 }
 0x1ec   : > { %2875 = vadd.xlane.f32.xlu0 %v2874_v5  ;;  %v1807_v5 = vsel %vm5638_vm3, %v5944_v60, 0.0 }
 0x1ed   : > { %v3297_v13 = vsel %vm1950_vm14, %v3296_v12, %v3292_v3  ;;  %2884 = vadd.xlane.f32.xlu1 %v2883_v6  ;;  %v3163_v43 = vpop.xlane.xlu0 %3162  ;;  %v1804_v3 = vsel %vm5645_vm5, %v5942_v59, 0.0  ;;  %v1894_v55 = vsel %vm1812_vm4, %v1807_v5, 0.0 }
 0x1ee   : > { %v3416_v9 = vsel %vm2089_vm0, %v3297_v13, %v6182_v54  ;;  %v3166_v46 = vpop.xlane.xlu1 %3165  ;;  %v3301_v57 = vrot.slane %v3163_v43, %v6060_v28  ;;  %v1885_v13 = vsel %vm1812_vm4, %v1804_v3, 0.0  ;;  %v1806_v43 = vsel %vm5645_vm5, %v5947_v62, 0.0 }
 0x1ef   : > { %v3305_v7 = vrot.slane %v3166_v46, %v6054_v17  ;;  %v2147_v3 = vsel %vm5658_vm6, %v5944_v60, 0.0 }
 0x1f0   : > { %2881 = vadd.xlane.f32.xlu0 %v2880_v61  ;;  %v2144_v61 = vsel %vm5676_vm7, %v5942_v59, 0.0 }
 0x1f1   : > { %v3306_v54 = vsel %vm1950_vm14, %v3305_v7, %v3301_v57  ;;  %1889 = vadd.xlane.f32.xlu1 %v1888_v18  ;;  %v6320_v12 = vpop.xlane.xlu0 %1838  ;;  %v2145_v57 = vsel %vm5658_vm6, %v5932_v53, 0.0  ;;  %v1891_v18 = vsel %vm1812_vm4, %v1806_v43, 0.0  ;;  %v2146_v43 = vsel %vm5676_vm7, %v5947_v62, 0.0 }
 0x1f2   : > { %v6323_v22 = vsel %vm2091_vm1, %v3306_v54, %v3416_v9  ;;  %v6325_v6 = vpop.xlane.xlu1 %1841  ;;  %v2227_v7 = vsel %vm1812_vm4, %v2145_v57, 0.0  ;;  %v2230_v15 = vsel %vm1812_vm4, %v2146_v43, 0.0 }
 0x1f4   : > { %1886 = vadd.xlane.f32.xlu0 %v1885_v13  ;;  %v2233_v13 = vsel %vm1812_vm4, %v2147_v3, 0.0  ;;  %v2475_v3 = vsel %vm5712_vm9, %v5942_v59, 0.0 }
 0x1f5   : > { %1895 = vadd.xlane.f32.xlu1 %v1894_v55  ;;  %v6332_v46 = vpop.xlane.xlu0 %1844  ;;  %v2224_v55 = vsel %vm1812_vm4, %v2144_v61, 0.0  ;;  %v2555_v4 = vsel %vm1812_vm4, %v2475_v3, 0.0 }
 0x1f6   : > { %v6337_v9 = vpop.xlane.xlu1 %1847 }
 0x1f8   : > { %1892 = vadd.xlane.f32.xlu0 %v1891_v18  ;;  %v2476_v18 = vsel %vm5693_vm8, %v5932_v53, 0.0 }
 0x1f9   : > { %2228 = vadd.xlane.f32.xlu1 %v2227_v7  ;;  %v6344_v5 = vpop.xlane.xlu0 %2177  ;;  %v2558_v61 = vsel %vm1812_vm4, %v2476_v18, 0.0 }
 0x1fa   : > { %v6349_v54 = vpop.xlane.xlu1 %2180 }
 0x1fc   : > { %2225 = vadd.xlane.f32.xlu0 %v2224_v55 }
 0x1fd   : > { %2234 = vadd.xlane.f32.xlu1 %v2233_v13  ;;  %v6356_v57 = vpop.xlane.xlu0 %2183  ;;  %v2478_v13 = vsel %vm5693_vm8, %v5944_v60, 0.0 }
 0x1fe   : > { %v6361_v7 = vpop.xlane.xlu1 %2186  ;;  %v2564_v43 = vsel %vm1812_vm4, %v2478_v13, 0.0 }
 0x200   : > { %2231 = vadd.xlane.f32.xlu0 %v2230_v15  ;;  %v2477_v15 = vsel %vm5712_vm9, %v5947_v62, 0.0 }
 0x201   : > { %2559 = vadd.xlane.f32.xlu1 %v2558_v61  ;;  %v6368_v55 = vpop.xlane.xlu0 %2508  ;;  %v2807_v61 = vsel %vm5729_vm10, %v5932_v53, 0.0  ;;  %v2561_v1 = vsel %vm1812_vm4, %v2477_v15, 0.0  ;;  %v1809_v15 = vsel %vm5638_vm3, %v6006_v11, 0.0  ;;  %vm2095_vm3 = vcmask 1045509  }
 0x202   : > { %v6373_v2 = vpop.xlane.xlu1 %2511  ;;  %v2889_v3 = vsel %vm1812_vm4, %v2807_v61, 0.0  ;;  %v2808_v61 = vsel %vm5748_vm11, %v5947_v62, 0.0  ;;  %v1900_v49 = vsel %vm1812_vm4, %v1809_v15, 0.0 }
 0x204   : > { %2556 = vadd.xlane.f32.xlu0 %v2555_v4  ;;  %v2806_v4 = vsel %vm5748_vm11, %v5942_v59, 0.0 }
 0x205   : > { %2565 = vadd.xlane.f32.xlu1 %v2564_v43  ;;  %v6380_v18 = vpop.xlane.xlu0 %2514  ;;  %v2809_v43 = vsel %vm5729_vm10, %v5944_v60, 0.0  ;;  %v2886_v52 = vsel %vm1812_vm4, %v2806_v4, 0.0  ;;  %v2892_v4 = vsel %vm1812_vm4, %v2808_v61, 0.0 }
 0x206   : > { %v6385_v63 = vpop.xlane.xlu1 %2517 }
 0x208   : > { %2562 = vadd.xlane.f32.xlu0 %v2561_v1  ;;  %v2895_v1 = vsel %vm1812_vm4, %v2809_v43, 0.0 }
 0x209   : > { %2890 = vadd.xlane.f32.xlu1 %v2889_v3  ;;  %v6392_v13 = vpop.xlane.xlu0 %2839 }
 0x20a   : > { %v6397_v50 = vpop.xlane.xlu1 %2842 }
 0x20c   : > { %2887 = vadd.xlane.f32.xlu0 %v2886_v52  ;;  %v1808_v52 = vsel %vm5645_vm5, %v6014_v19, 0.0  ;;  %vm2097_vm5 = vcmask 1046534  }
 0x20d   : > { %2896 = vadd.xlane.f32.xlu1 %v2895_v1  ;;  %v6407_v3 = vpop.xlane.xlu0 %2845  ;;  %v1897_v61 = vsel %vm1812_vm4, %v1808_v52, 0.0 }
 0x20e   : > { %v6409_v47 = vpop.xlane.xlu1 %2848 }
 0x210   : > { %2893 = vadd.xlane.f32.xlu0 %v2892_v4 }
 0x211   : > { %1901 = vadd.xlane.f32.xlu1 %v1900_v49  ;;  %v3169_v43 = vpop.xlane.xlu0 %3168 }
 0x212   : > { %v3172_v1 = vpop.xlane.xlu1 %3171  ;;  %v3310_v33 = vrot.slane %v3169_v43, %v6060_v28  ;;  %v2149_v43 = vsel %vm5658_vm6, %v6006_v11, 0.0 }
 0x213   : > { %v3314_v15 = vrot.slane %v3172_v1, %v6054_v17 }
 0x214   : > { %1898 = vadd.xlane.f32.xlu0 %v1897_v61 }
 0x215   : > { %v3315_v4 = vsel %vm1950_vm14, %v3314_v15, %v3310_v33  ;;  %1907 = vadd.xlane.f32.xlu1 %v1906_v26  ;;  %v3175_v49 = vpop.xlane.xlu0 %3174  ;;  %v1986_v33 = vrot.slane %v6325_v6, %v6054_v17  ;;  %v1982_v26 = vrot.slane %v6320_v12, %v6060_v28  ;;  %v2239_v15 = vsel %vm1812_vm4, %v2149_v43, 0.0 }
 0x216   : > { %v3418_v29 = vsel %vm2093_vm2, %v3315_v4, %v6323_v22  ;;  %v3178_v1 = vpop.xlane.xlu1 %3177  ;;  %v3319_v52 = vrot.slane %v3175_v49, %v6060_v28  ;;  %v2148_v22 = vsel %vm5676_vm7, %v6014_v19, 0.0  ;;  %v1995_v4 = vrot.slane %v6337_v9, %v6054_v17 }
 0x217   : > { %v3323_v61 = vrot.slane %v3178_v1, %v6054_v17  ;;  %v1991_v49 = vrot.slane %v6332_v46, %v6060_v28  ;;  %v2151_v12 = vsel %vm5658_vm6, %v6017_v23, 0.0  ;;  %v2236_v9 = vsel %vm1812_vm4, %v2148_v22, 0.0 }
 0x218   : > { %1904 = vadd.xlane.f32.xlu0 %v1903_v27  ;;  %v2480_v46 = vsel %vm5693_vm8, %v6006_v11, 0.0  ;;  %v2479_v22 = vsel %vm5712_vm9, %v6014_v19, 0.0  ;;  %vm2099_vm6 = vcmask 1047559  }
 0x219   : > { %v3324_v25 = vsel %vm1950_vm14, %v3323_v61, %v3319_v52  ;;  %2240 = vadd.xlane.f32.xlu1 %v2239_v15  ;;  %v1851_v6 = vpop.xlane.xlu0 %1850  ;;  %v1987_v52 = vsel %vm1950_vm14, %v1986_v33, %v1982_v26  ;;  %v2245_v61 = vsel %vm1812_vm4, %v2151_v12, 0.0  ;;  %v2570_v26 = vsel %vm1812_vm4, %v2480_v46, 0.0 }
 0x21a   : > { %v6452_v43 = vsel %vm2095_vm3, %v3324_v25, %v3418_v29  ;;  %v1854_v1 = vpop.xlane.xlu1 %1853  ;;  %v2000_v27 = vrot.slane %v1851_v6, %v6060_v28  ;;  %v1996_v29 = vsel %vm1950_vm14, %v1995_v4, %v1991_v49  ;;  %v2094_v40 = vsel %vm2093_vm2, %v1987_v52, %v6213_v41 }
 0x21b   : > { %v2004_v30 = vrot.slane %v1854_v1, %v6054_v17  ;;  %v2242_v4 = vsel %vm1812_vm4, %v2150_v32, 0.0  ;;  %v2096_v49 = vsel %vm2095_vm3, %v1996_v29, %v2094_v40  ;;  %v2323_v1 = vrot.slane %v6349_v54, %v6054_v17 }
 0x21c   : > { %2237 = vadd.xlane.f32.xlu0 %v2236_v9  ;;  %v2332_v41 = vrot.slane %v6361_v7, %v6054_v17  ;;  %v2328_v9 = vrot.slane %v6356_v57, %v6060_v28  ;;  %v2567_v7 = vsel %vm1812_vm4, %v2479_v22, 0.0 }
 0x21d   : > { %2246 = vadd.xlane.f32.xlu1 %v2245_v61  ;;  %v1857_v15 = vpop.xlane.xlu0 %1856  ;;  %v2005_v25 = vsel %vm1950_vm14, %v2004_v30, %v2000_v27  ;;  %v2319_v30 = vrot.slane %v6344_v5, %v6060_v28  ;;  %v2482_v27 = vsel %vm5693_vm8, %v6017_v23, 0.0 }
 0x21e   : > { %v1860_v6 = vpop.xlane.xlu1 %1859  ;;  %v2009_v33 = vrot.slane %v1857_v15, %v6060_v28  ;;  %v2098_v46 = vsel %vm2097_vm5, %v2005_v25, %v2096_v49  ;;  %v2576_v57 = vsel %vm1812_vm4, %v2482_v27, 0.0  ;;  %v2811_v15 = vsel %vm5729_vm10, %v6006_v11, 0.0 }
 0x21f   : > { %v2013_v12 = vrot.slane %v1860_v6, %v6054_v17  ;;  %v2324_v29 = vsel %vm1950_vm14, %v2323_v1, %v2319_v30  ;;  %v2481_v25 = vsel %vm5712_vm9, %v6023_v36, 0.0  ;;  %v2333_v6 = vsel %vm1950_vm14, %v2332_v41, %v2328_v9 }
 0x220   : > { %2243 = vadd.xlane.f32.xlu0 %v2242_v4  ;;  %v2427_v4 = vsel %vm2093_vm2, %v2324_v29, %v6240_v10  ;;  %v2901_v56 = vsel %vm1812_vm4, %v2811_v15, 0.0  ;;  %v2573_v1 = vsel %vm1812_vm4, %v2481_v25, 0.0  ;;  %v2654_v27 = vrot.slane %v6373_v2, %v6054_v17 }
 0x221   : > { %v2014_v52 = vsel %vm1950_vm14, %v2013_v12, %v2009_v33  ;;  %2571 = vadd.xlane.f32.xlu1 %v2570_v26  ;;  %v2190_v54 = vpop.xlane.xlu0 %2189  ;;  %v2810_v12 = vsel %vm5748_vm11, %v6014_v19, 0.0  ;;  %v2428_v30 = vsel %vm2095_vm3, %v2333_v6, %v2427_v4  ;;  %v2650_v41 = vrot.slane %v6368_v55, %v6060_v28 }
 0x222   : > { %v2100_v61 = vsel %vm2099_vm6, %v2014_v52, %v2098_v46  ;;  %v2193_v5 = vpop.xlane.xlu1 %2192  ;;  %v2337_v32 = vrot.slane %v2190_v54, %v6060_v28  ;;  %v2813_v10 = vsel %vm5729_vm10, %v6017_v23, 0.0  ;;  %v2663_v9 = vrot.slane %v6385_v63, %v6054_v17 }
 0x223   : > { %2110 = vst.msk [vmem:[%s5375_s30] sm:$0xff] %vm1812_vm4, %v2100_v61  ;;  %v2341_v48 = vrot.slane %v2193_v5, %v6054_v17  ;;  %v2659_v46 = vrot.slane %v6380_v18, %v6060_v28  ;;  %v2898_v63 = vsel %vm1812_vm4, %v2810_v12, 0.0  ;;  %v2907_v18 = vsel %vm1812_vm4, %v2813_v10, 0.0 }
 0x224   : > { %2568 = vadd.xlane.f32.xlu0 %v2567_v7  ;;  %v2812_v7 = vsel %vm5748_vm11, %v6023_v36, 0.0  ;;  %v2985_v4 = vrot.slane %v6397_v50, %v6054_v17 }
 0x225   : > { %2577 = vadd.xlane.f32.xlu1 %v2576_v57  ;;  %v2196_v33 = vpop.xlane.xlu0 %2195  ;;  %v2342_v26 = vsel %vm1950_vm14, %v2341_v48, %v2337_v32  ;;  %v2655_v32 = vsel %vm1950_vm14, %v2654_v27, %v2650_v41  ;;  %v3126_v48 = vsel %vm5764_vm12, %v5770_v16, 0.0  ;;  %v2664_v29 = vsel %vm1950_vm14, %v2663_v9, %v2659_v46 }
 0x226   : > { %v2199_v22 = vpop.xlane.xlu1 %2198  ;;  %v2346_v40 = vrot.slane %v2196_v33, %v6060_v28  ;;  %v2429_v52 = vsel %vm2097_vm5, %v2342_v26, %v2428_v30  ;;  %v3128_v33 = vsel %vm5764_vm12, %v5796_v37, 0.0  ;;  %v2758_v26 = vsel %vm2093_vm2, %v2655_v32, %v6267_v58 }
 0x227   : > { %v2350_v49 = vrot.slane %v2199_v22, %v6054_v17  ;;  %v3188_v8 = vsel %vm1812_vm4, %v3126_v48, 0.0  ;;  %v2759_v12 = vsel %vm2095_vm3, %v2664_v29, %v2758_v26  ;;  %v3127_v58 = vsel %vm5784_vm13, %v5798_v38, 0.0 }
 0x228   : > { %2574 = vadd.xlane.f32.xlu0 %v2573_v1  ;;  %v2990_v1 = vrot.slane %v6407_v3, %v6060_v28  ;;  %v3194_v3 = vsel %vm1812_vm4, %v3128_v33, 0.0  ;;  %v3131_v29 = vsel %vm5784_vm13, %v5870_v44, 0.0 }
 0x229   : > { %v2351_v54 = vsel %vm1950_vm14, %v2350_v49, %v2346_v40  ;;  %2902 = vadd.xlane.f32.xlu1 %v2901_v56  ;;  %v2521_v2 = vpop.xlane.xlu0 %2520  ;;  %v2904_v40 = vsel %vm1812_vm4, %v2812_v7, 0.0  ;;  %v2981_v49 = vrot.slane %v6392_v13, %v6060_v28  ;;  %v2994_v56 = vrot.slane %v6409_v47, %v6054_v17 }
 0x22a   : > { %v2430_v61 = vsel %vm2099_vm6, %v2351_v54, %v2429_v52  ;;  %v2524_v55 = vpop.xlane.xlu1 %2523  ;;  %v2668_v5 = vrot.slane %v2521_v2, %v6060_v28  ;;  %v3191_v47 = vsel %vm1812_vm4, %v3127_v58, 0.0  ;;  %v3129_v52 = vsel %vm5784_vm13, %v5803_v42, 0.0 }
 0x22b   : > { %4939 = vst.msk [vmem:[%s5375_s30 + $0x10] sm:$0xff] %vm1812_vm4, %v2430_v61  ;;  %v2672_v0 = vrot.slane %v2524_v55, %v6054_v17  ;;  %v2986_v46 = vsel %vm1950_vm14, %v2985_v4, %v2981_v49  ;;  %v2995_v54 = vsel %vm1950_vm14, %v2994_v56, %v2990_v1  ;;  %v3130_v61 = vsel %vm5764_vm12, %v5800_v39, 0.0 }
 0x22c   : > { %2899 = vadd.xlane.f32.xlu0 %v2898_v63  ;;  %v3089_v63 = vsel %vm2093_vm2, %v2986_v46, %v6294_v34  ;;  %v3200_v7 = vsel %vm1812_vm4, %v3130_v61, 0.0  ;;  %v3132_v34 = vsel %vm5764_vm12, %v5860_v31, 0.0  ;;  %v3134_v58 = vsel %vm5764_vm12, %v5872_v45, 0.0 }
 0x22d   : > { %2908 = vadd.xlane.f32.xlu1 %v2907_v18  ;;  %v2527_v57 = vpop.xlane.xlu0 %2526  ;;  %v2673_v15 = vsel %vm1950_vm14, %v2672_v0, %v2668_v5  ;;  %v3197_v18 = vsel %vm1812_vm4, %v3129_v52, 0.0  ;;  %v3090_v48 = vsel %vm2095_vm3, %v2995_v54, %v3089_v63  ;;  %v3137_v52 = vsel %vm5784_vm13, %v5947_v62, 0.0 }
 0x22e   : > { %v2530_v25 = vpop.xlane.xlu1 %2529  ;;  %v2677_v6 = vrot.slane %v2527_v57, %v6060_v28  ;;  %v2760_v30 = vsel %vm2097_vm5, %v2673_v15, %v2759_v12  ;;  %v3133_v12 = vsel %vm5784_vm13, %v5875_v51, 0.0 }
 0x22f   : > { %v2681_v22 = vrot.slane %v2530_v25, %v6054_v17 }
 0x230   : > { %2905 = vadd.xlane.f32.xlu0 %v2904_v40  ;;  %v3206_v40 = vsel %vm1812_vm4, %v3132_v34, 0.0 }
 0x231   : > { %v2682_v27 = vsel %vm1950_vm14, %v2681_v22, %v2677_v6  ;;  %3189 = vadd.xlane.f32.xlu1 %v3188_v8  ;;  %v2852_v50 = vpop.xlane.xlu0 %2851  ;;  %v3203_v8 = vsel %vm1812_vm4, %v3131_v29, 0.0  ;;  %v3140_v29 = vsel %vm5764_vm12, %v6006_v11, 0.0 }
 0x232   : > { %v2761_v41 = vsel %vm2099_vm6, %v2682_v27, %v2760_v30  ;;  %v2855_v13 = vpop.xlane.xlu1 %2854  ;;  %v2999_v10 = vrot.slane %v2852_v50, %v6060_v28  ;;  %v3209_v30 = vsel %vm1812_vm4, %v3133_v12, 0.0  ;;  %v3212_v27 = vsel %vm1812_vm4, %v3134_v58, 0.0 }
 0x233   : > { %4941 = vst.msk [vmem:[%s5375_s30 + $0x20] sm:$0xff] %vm1812_vm4, %v2761_v41  ;;  %v3003_v9 = vrot.slane %v2855_v13, %v6054_v17  ;;  %v3135_v50 = vsel %vm5784_vm13, %v5942_v59, 0.0  ;;  %v3136_v13 = vsel %vm5764_vm12, %v5932_v53, 0.0  ;;  %v3142_v12 = vsel %vm5764_vm12, %v6017_v23, 0.0 }
 0x234   : > { %3192 = vadd.xlane.f32.xlu0 %v3191_v47  ;;  %v3215_v47 = vsel %vm1812_vm4, %v3135_v50, 0.0  ;;  %v3236_v50 = vsel %vm1812_vm4, %v3142_v12, 0.0 }
 0x235   : > { %3195 = vadd.xlane.f32.xlu1 %v3194_v3  ;;  %v2858_v2 = vpop.xlane.xlu0 %2857  ;;  %v3004_v55 = vsel %vm1950_vm14, %v3003_v9, %v2999_v10  ;;  %v3218_v3 = vsel %vm1812_vm4, %v3136_v13, 0.0 }
 0x236   : > { %v2861_v5 = vpop.xlane.xlu1 %2860  ;;  %v3008_v0 = vrot.slane %v2858_v2, %v6060_v28  ;;  %v3091_v57 = vsel %vm2097_vm5, %v3004_v55, %v3090_v48  ;;  %v3138_v2 = vsel %vm5764_vm12, %v5944_v60, 0.0 }
 0x237   : > { %v3012_v32 = vrot.slane %v2861_v5, %v6054_v17 }
 0x238   : > { %3198 = vadd.xlane.f32.xlu0 %v3197_v18  ;;  %v3139_v18 = vsel %vm5784_vm13, %v6014_v19, 0.0 }
 0x239   : > { %v3013_v15 = vsel %vm1950_vm14, %v3012_v32, %v3008_v0  ;;  %3201 = vadd.xlane.f32.xlu1 %v3200_v7  ;;  %v3181_v25 = vpop.xlane.xlu0 %3180  ;;  %v3221_v0 = vsel %vm1812_vm4, %v3137_v52, 0.0  ;;  %v3224_v32 = vsel %vm1812_vm4, %v3138_v2, 0.0 }
 0x23a   : > { %v3092_v6 = vsel %vm2099_vm6, %v3013_v15, %v3091_v57  ;;  %v3184_v33 = vpop.xlane.xlu1 %3183  ;;  %v3328_v26 = vrot.slane %v3181_v25, %v6060_v28  ;;  %v3434_v57 = vadd.s32 1, %v5627_v20 }
 0x23b   : > { %4943 = vst.msk [vmem:[%s5375_s30 + $0x30] sm:$0xff] %vm1812_vm4, %v3092_v6  ;;  %v3332_v22 = vrot.slane %v3184_v33, %v6054_v17  ;;  %v3435_v6 = vadd.s32 1, %v5630_v21  ;;  %v3227_v33 = vsel %vm1812_vm4, %v3139_v18, 0.0 }
 0x23c   : > { %3204 = vadd.xlane.f32.xlu0 %v3203_v8  ;;  %v3141_v8 = vsel %vm5784_vm13, %v6023_v36, 0.0  ;;  %vm6666_vm7 = vcmp.eq.s32.totalorder %v5632_v35, %v3434_v57 }
 0x23d   : > { %v3333_v4 = vsel %vm1950_vm14, %v3332_v22, %v3328_v26  ;;  %3207 = vadd.xlane.f32.xlu1 %v3206_v40  ;;  %v6610_v49 = vpop.xlane.xlu0 %3186  ;;  %v3230_v22 = vsel %vm1812_vm4, %v3140_v29, 0.0  ;;  %vm6673_vm8 = vcmp.eq.s32.totalorder %v5632_v35, %v3435_v6 }
 0x23e   : > { %v6617_v56 = vsel %vm2097_vm5, %v3333_v4, %v6452_v43  ;;  %v1866_v1 = vpop.xlane.xlu1 %1865 }
 0x23f   : > { %7910 = vst [vmem:[#allocation25_spill] sm:$0xff] %v6617_v56  ;;  %v2022_v10 = vrot.slane %v1866_v1, %v6054_v17 }
 0x240   : > { %3210 = vadd.xlane.f32.xlu0 %v3209_v30 }
 0x241   : > { %3213 = vadd.xlane.f32.xlu1 %v3212_v27  ;;  %v1863_v41 = vpop.xlane.xlu0 %1862  ;;  %v3233_v27 = vsel %vm1812_vm4, %v3141_v8, 0.0 }
 0x242   : > { %v1872_v43 = vpop.xlane.xlu1 %1871  ;;  %v2018_v9 = vrot.slane %v1863_v41, %v6060_v28  ;;  %v7915_v41 = vld [vmem:[#allocation7_spill] sm:$0xff] }
 0x243   : > { %v2031_v61 = vrot.slane %v1872_v43, %v6054_v17  ;;  %v3442_v13 = vsel %vm6666_vm7, %v7915_v41, 0.0 }
 0x244   : > { %v2023_v46 = vsel %vm1950_vm14, %v2022_v10, %v2018_v9  ;;  %3216 = vadd.xlane.f32.xlu0 %v3215_v47  ;;  %v7916_v9 = vld [vmem:[#allocation5_spill] sm:$0xff] }
 0x245   : > { %3219 = vadd.xlane.f32.xlu1 %v3218_v3  ;;  %v1869_v54 = vpop.xlane.xlu0 %1868  ;;  %v3443_v47 = vsel %vm6673_vm8, %v7916_v9, 0.0 }
 0x246   : > { %v2205_v55 = vpop.xlane.xlu1 %2204  ;;  %v2027_v5 = vrot.slane %v1869_v54, %v6060_v28  ;;  %v3474_v54 = vsel %vm1812_vm4, %v3442_v13, 0.0 }
 0x247   : > { %v2359_v15 = vrot.slane %v2205_v55, %v6054_v17  ;;  %v7917_v55 = vld [vmem:[#allocation8_spill] sm:$0xff] }
 0x248   : > { %v2032_v63 = vsel %vm1950_vm14, %v2031_v61, %v2027_v5  ;;  %3222 = vadd.xlane.f32.xlu0 %v3221_v0  ;;  %v3477_v61 = vsel %vm1812_vm4, %v3443_v47, 0.0  ;;  %v3444_v5 = vsel %vm6666_vm7, %v7917_v55, 0.0 }
 0x249   : > { %v6647_v48 = vsel %vm2087_vm15, %v2032_v63, %v2023_v46  ;;  %3225 = vadd.xlane.f32.xlu1 %v3224_v32  ;;  %v2202_v7 = vpop.xlane.xlu0 %2201  ;;  %v7918_v63 = vld [vmem:[#allocation6_spill] sm:$0xff]  ;;  %v3480_v57 = vsel %vm1812_vm4, %v3444_v5, 0.0 }
 0x24a   : > { %v2211_v25 = vpop.xlane.xlu1 %2210  ;;  %v2355_v34 = vrot.slane %v2202_v7, %v6060_v28  ;;  %v3445_v32 = vsel %vm6673_vm8, %v7918_v63, 0.0  ;;  %v7923_v5 = vld [vmem:[#allocation14_spill] sm:$0xff] }
 0x24b   : > { %v2368_v58 = vrot.slane %v2211_v25, %v6054_v17  ;;  %v3483_v25 = vsel %vm1812_vm4, %v3445_v32, 0.0 }
 0x24c   : > { %v2360_v26 = vsel %vm1950_vm14, %v2359_v15, %v2355_v34  ;;  %3228 = vadd.xlane.f32.xlu0 %v3227_v33  ;;  %v7919_v34 = vld [vmem:[#allocation10_spill] sm:$0xff] }
 0x24d   : > { %3231 = vadd.xlane.f32.xlu1 %v3230_v22  ;;  %v2208_v40 = vpop.xlane.xlu0 %2207  ;;  %v3446_v6 = vsel %vm6666_vm7, %v7919_v34, 0.0  ;;  %v7920_v22 = vld [vmem:[#allocation9_spill] sm:$0xff] }
 0x24e   : > { %v2536_v1 = vpop.xlane.xlu1 %2535  ;;  %v2364_v30 = vrot.slane %v2208_v40, %v6060_v28  ;;  %v3447_v8 = vsel %vm6673_vm8, %v7920_v22, 0.0 }
 0x24f   : > { %v2690_v46 = vrot.slane %v2536_v1, %v6054_v17  ;;  %v3486_v1 = vsel %vm1812_vm4, %v3446_v6, 0.0 }
 0x250   : > { %v2369_v14 = vsel %vm1950_vm14, %v2368_v58, %v2364_v30  ;;  %3234 = vadd.xlane.f32.xlu0 %v3233_v27  ;;  %v3489_v27 = vsel %vm1812_vm4, %v3447_v8, 0.0 }
 0x251   : > { %v6684_v10 = vsel %vm2087_vm15, %v2369_v14, %v2360_v26  ;;  %3237 = vadd.xlane.f32.xlu1 %v3236_v50  ;;  %v2533_v43 = vpop.xlane.xlu0 %2532  ;;  %v7921_v14 = vld [vmem:[#allocation12_spill] sm:$0xff] }
 0x252   : > { %v2542_v3 = vpop.xlane.xlu1 %2541  ;;  %v2686_v52 = vrot.slane %v2533_v43, %v6060_v28  ;;  %v3448_v50 = vsel %vm6666_vm7, %v7921_v14, 0.0  ;;  %v7922_v43 = vld [vmem:[#allocation11_spill] sm:$0xff] }
 0x253   : > { %v2699_v18 = vrot.slane %v2542_v3, %v6054_v17  ;;  %v3449_v47 = vsel %vm6673_vm8, %v7922_v43, 0.0 }
 0x254   : > { %v2691_v2 = vsel %vm1950_vm14, %v2690_v46, %v2686_v52  ;;  %3475 = vadd.xlane.f32.xlu0 %v3474_v54  ;;  %v3492_v54 = vsel %vm1812_vm4, %v3448_v50, 0.0 }
 0x255   : > { %3478 = vadd.xlane.f32.xlu1 %v3477_v61  ;;  %v2539_v0 = vpop.xlane.xlu0 %2538  ;;  %v3495_v61 = vsel %vm1812_vm4, %v3449_v47, 0.0 }
 0x256   : > { %v2867_v7 = vpop.xlane.xlu1 %2866  ;;  %v2695_v29 = vrot.slane %v2539_v0, %v6060_v28  ;;  %v3450_v0 = vsel %vm6666_vm7, %v7923_v5, 0.0 }
 0x257   : > { %v3021_v40 = vrot.slane %v2867_v7, %v6054_v17  ;;  %v7924_v7 = vld [vmem:[#allocation13_spill] sm:$0xff]  ;;  %v3498_v6 = vsel %vm1812_vm4, %v3450_v0, 0.0 }
 0x258   : > { %v2700_v15 = vsel %vm1950_vm14, %v2699_v18, %v2695_v29  ;;  %3481 = vadd.xlane.f32.xlu0 %v3480_v57  ;;  %v3451_v29 = vsel %vm6673_vm8, %v7924_v7, 0.0 }
 0x259   : > { %v6709_v33 = vsel %vm2087_vm15, %v2700_v15, %v2691_v2  ;;  %3484 = vadd.xlane.f32.xlu1 %v3483_v25  ;;  %v2864_v26 = vpop.xlane.xlu0 %2863  ;;  %v3501_v8 = vsel %vm1812_vm4, %v3451_v29, 0.0 }
 0x25a   : > { %v2873_v12 = vpop.xlane.xlu1 %2872  ;;  %v3017_v58 = vrot.slane %v2864_v26, %v6060_v28 }
 0x25b   : > { %v3030_v46 = vrot.slane %v2873_v12, %v6054_v17 }
 0x25c   : > { %v3022_v30 = vsel %vm1950_vm14, %v3021_v40, %v3017_v58  ;;  %3487 = vadd.xlane.f32.xlu0 %v3486_v1  ;;  %v7925_v40 = vld [vmem:[#allocation16_spill] sm:$0xff] }
 0x25d   : > { %3490 = vadd.xlane.f32.xlu1 %v3489_v27  ;;  %v2870_v13 = vpop.xlane.xlu0 %2869  ;;  %v3452_v12 = vsel %vm6666_vm7, %v7925_v40, 0.0 }
 0x25e   : > { %v3026_v3 = vrot.slane %v2870_v13, %v6060_v28  ;;  %v1878_v52 = vpop.xlane.xlu1 %1877  ;;  %v3504_v13 = vsel %vm1812_vm4, %v3452_v12, 0.0  ;;  %v3457_v12 = vsel %vm6673_vm8, %v5770_v16, 0.0 }
 0x25f   : > { %v2040_v57 = vrot.slane %v1878_v52, %v6054_v17  ;;  %v7928_v52 = vld [vmem:[#allocation17_spill] sm:$0xff] }
 0x260   : > { %v3031_v2 = vsel %vm1950_vm14, %v3030_v46, %v3026_v3  ;;  %3493 = vadd.xlane.f32.xlu0 %v3492_v54  ;;  %v7927_v46 = vld [vmem:[#allocation18_spill] sm:$0xff]  ;;  %v3455_v54 = vsel %vm6673_vm8, %v7928_v52, 0.0 }
 0x261   : > { %v6734_v32 = vsel %vm2087_vm15, %v3031_v2, %v3022_v30  ;;  %3496 = vadd.xlane.f32.xlu1 %v3495_v61  ;;  %v1875_v18 = vpop.xlane.xlu0 %1874  ;;  %v7926_v30 = vld [vmem:[#allocation15_spill] sm:$0xff]  ;;  %v3454_v3 = vsel %vm6666_vm7, %v7927_v46, 0.0 }
 0x262   : > { %v6740_v15 = vpop.xlane.xlu1 %1883  ;;  %v2036_v25 = vrot.slane %v1875_v18, %v6060_v28  ;;  %v3453_v27 = vsel %vm6673_vm8, %v7926_v30, 0.0  ;;  %v3510_v18 = vsel %vm1812_vm4, %v3454_v3, 0.0  ;;  %v3459_v3 = vsel %vm6673_vm8, %v5796_v37, 0.0 }
 0x263   : > { %v3507_v47 = vsel %vm1812_vm4, %v3453_v27, 0.0 }
 0x264   : > { %v2041_v26 = vsel %vm1950_vm14, %v2040_v57, %v2036_v25  ;;  %3499 = vadd.xlane.f32.xlu0 %v3498_v6  ;;  %v3513_v57 = vsel %vm1812_vm4, %v3455_v54, 0.0  ;;  %v7929_v25 = vld [vmem:[#allocation19_spill] sm:$0xff] }
 0x265   : > { %v6751_v58 = vsel %vm2089_vm0, %v2041_v26, %v6647_v48  ;;  %3502 = vadd.xlane.f32.xlu1 %v3501_v8  ;;  %v6753_v1 = vpop.xlane.xlu0 %1880  ;;  %v3456_v6 = vsel %vm6666_vm7, %v7929_v25, 0.0 }
 0x266   : > { %v2217_v50 = vpop.xlane.xlu1 %2216 }
 0x267   : > { %v2377_v2 = vrot.slane %v2217_v50, %v6054_v17  ;;  %v3516_v50 = vsel %vm1812_vm4, %v3456_v6, 0.0 }
 0x268   : > { %3505 = vadd.xlane.f32.xlu0 %v3504_v13  ;;  %v3519_v13 = vsel %vm1812_vm4, %v3457_v12, 0.0 }
 0x269   : > { %3508 = vadd.xlane.f32.xlu1 %v3507_v47  ;;  %v2214_v48 = vpop.xlane.xlu0 %2213  ;;  %v3458_v47 = vsel %vm6666_vm7, %v5798_v38, 0.0 }
 0x26a   : > { %v6767_v61 = vpop.xlane.xlu1 %2222  ;;  %v2373_v0 = vrot.slane %v2214_v48, %v6060_v28 }
 0x26c   : > { %v2378_v29 = vsel %vm1950_vm14, %v2377_v2, %v2373_v0  ;;  %3511 = vadd.xlane.f32.xlu0 %v3510_v18  ;;  %v3522_v0 = vsel %vm1812_vm4, %v3458_v47, 0.0 }
 0x26d   : > { %v6778_v26 = vsel %vm2089_vm0, %v2378_v29, %v6684_v10  ;;  %3514 = vadd.xlane.f32.xlu1 %v3513_v57  ;;  %v6780_v8 = vpop.xlane.xlu0 %2219  ;;  %v3525_v29 = vsel %vm1812_vm4, %v3459_v3, 0.0  ;;  %v3460_v57 = vsel %vm6666_vm7, %v5803_v42, 0.0  ;;  %v3463_v3 = vsel %vm6673_vm8, %v5860_v31, 0.0 }
 0x26e   : > { %v2548_v27 = vpop.xlane.xlu1 %2547 }
 0x26f   : > { %v2708_v48 = vrot.slane %v2548_v27, %v6054_v17  ;;  %v3461_v27 = vsel %vm6673_vm8, %v5800_v39, 0.0 }
 0x270   : > { %3517 = vadd.xlane.f32.xlu0 %v3516_v50  ;;  %v3531_v47 = vsel %vm1812_vm4, %v3461_v27, 0.0  ;;  %v3464_v27 = vsel %vm6666_vm7, %v5875_v51, 0.0 }
 0x271   : > { %3520 = vadd.xlane.f32.xlu1 %v3519_v13  ;;  %v2545_v10 = vpop.xlane.xlu0 %2544  ;;  %v3528_v13 = vsel %vm1812_vm4, %v3460_v57, 0.0  ;;  %v3537_v57 = vsel %vm1812_vm4, %v3463_v3, 0.0 }
 0x272   : > { %v6794_v54 = vpop.xlane.xlu1 %2553  ;;  %v2704_v2 = vrot.slane %v2545_v10, %v6060_v28  ;;  %v3462_v10 = vsel %vm6666_vm7, %v5870_v44, 0.0 }
 0x274   : > { %v2709_v18 = vsel %vm1950_vm14, %v2708_v48, %v2704_v2  ;;  %3523 = vadd.xlane.f32.xlu0 %v3522_v0 }
 0x275   : > { %v6805_v6 = vsel %vm2089_vm0, %v2709_v18, %v6709_v33  ;;  %3526 = vadd.xlane.f32.xlu1 %v3525_v29  ;;  %v6807_v12 = vpop.xlane.xlu0 %2550  ;;  %v3534_v18 = vsel %vm1812_vm4, %v3462_v10, 0.0 }
 0x276   : > { %v2879_v50 = vpop.xlane.xlu1 %2878 }
 0x277   : > { %v3039_v48 = vrot.slane %v2879_v50, %v6054_v17 }
 0x278   : > { %3529 = vadd.xlane.f32.xlu0 %v3528_v13 }
 0x279   : > { %3532 = vadd.xlane.f32.xlu1 %v3531_v47  ;;  %v2876_v33 = vpop.xlane.xlu0 %2875  ;;  %v3465_v47 = vsel %vm6673_vm8, %v5872_v45, 0.0 }
 0x27a   : > { %v6821_v2 = vpop.xlane.xlu1 %2884  ;;  %v3035_v0 = vrot.slane %v2876_v33, %v6060_v28  ;;  %v3540_v33 = vsel %vm1812_vm4, %v3464_v27, 0.0  ;;  %v3543_v3 = vsel %vm1812_vm4, %v3465_v47, 0.0  ;;  %v3468_v27 = vsel %vm6666_vm7, %v5947_v62, 0.0 }
 0x27b   : > { %v3552_v56 = vsel %vm1812_vm4, %v3468_v27, 0.0  ;;  %v3766_v27 = vadd.s32 2, %v5630_v21 }
 0x27c   : > { %v3040_v29 = vsel %vm1950_vm14, %v3039_v48, %v3035_v0  ;;  %3535 = vadd.xlane.f32.xlu0 %v3534_v18  ;;  %v3466_v48 = vsel %vm6666_vm7, %v5942_v59, 0.0  ;;  %v3467_v0 = vsel %vm6673_vm8, %v5932_v53, 0.0 }
 0x27d   : > { %v6832_v13 = vsel %vm2089_vm0, %v3040_v29, %v6734_v32  ;;  %3538 = vadd.xlane.f32.xlu1 %v3537_v57  ;;  %v6834_v50 = vpop.xlane.xlu0 %2881  ;;  %v3546_v29 = vsel %vm1812_vm4, %v3466_v48, 0.0  ;;  %v3549_v57 = vsel %vm1812_vm4, %v3467_v0, 0.0  ;;  %v3470_v0 = vsel %vm6666_vm7, %v6014_v19, 0.0 }
 0x27e   : > { %v6839_v10 = vpop.xlane.xlu1 %1889  ;;  %vm6897_vm10 = vcmp.eq.s32.totalorder %v5632_v35, %v3766_v27 }
 0x280   : > { %3541 = vadd.xlane.f32.xlu0 %v3540_v33  ;;  %v3469_v33 = vsel %vm6673_vm8, %v5944_v60, 0.0  ;;  %v3765_v60 = vadd.s32 2, %v5627_v20  ;;  %v3473_v20 = vsel %vm6673_vm8, %v6017_v23, 0.0 }
 0x281   : > { %3544 = vadd.xlane.f32.xlu1 %v3543_v3  ;;  %v6846_v32 = vpop.xlane.xlu0 %1886  ;;  %v3555_v48 = vsel %vm1812_vm4, %v3469_v33, 0.0  ;;  %v3558_v33 = vsel %vm1812_vm4, %v3470_v0, 0.0 }
 0x282   : > { %v6851_v18 = vpop.xlane.xlu1 %1895  ;;  %vm6890_vm9 = vcmp.eq.s32.totalorder %v5632_v35, %v3765_v60 }
 0x283   : > { %v3773_v24 = vsel %vm6890_vm9, %v7915_v41, 0.0 }
 0x284   : > { %3547 = vadd.xlane.f32.xlu0 %v3546_v29  ;;  %v3805_v35 = vsel %vm1812_vm4, %v3773_v24, 0.0 }
 0x285   : > { %3550 = vadd.xlane.f32.xlu1 %v3549_v57  ;;  %v6858_v47 = vpop.xlane.xlu0 %1892  ;;  %v3471_v57 = vsel %vm6673_vm8, %v6006_v11, 0.0 }
 0x286   : > { %v6863_v3 = vpop.xlane.xlu1 %2228 }
 0x288   : > { %3553 = vadd.xlane.f32.xlu0 %v3552_v56  ;;  %v3561_v56 = vsel %vm1812_vm4, %v3471_v57, 0.0 }
 0x289   : > { %3556 = vadd.xlane.f32.xlu1 %v3555_v48  ;;  %v6870_v29 = vpop.xlane.xlu0 %2225  ;;  %v3472_v48 = vsel %vm6666_vm7, %v6023_v36, 0.0 }
 0x28a   : > { %v6876_v62 = vpop.xlane.xlu1 %2234  ;;  %v3564_v4 = vsel %vm1812_vm4, %v3472_v48, 0.0 }
 0x28c   : > { %3559 = vadd.xlane.f32.xlu0 %v3558_v33  ;;  %v3567_v33 = vsel %vm1812_vm4, %v3473_v20, 0.0  ;;  %v3775_v20 = vsel %vm6890_vm9, %v7917_v55, 0.0 }
 0x28d   : > { %3562 = vadd.xlane.f32.xlu1 %v3561_v56  ;;  %v6884_v19 = vpop.xlane.xlu0 %2231  ;;  %v3774_v56 = vsel %vm6897_vm10, %v7916_v9, 0.0  ;;  %v3811_v9 = vsel %vm1812_vm4, %v3775_v20, 0.0 }
 0x28e   : > { %v6894_v0 = vpop.xlane.xlu1 %2559  ;;  %v3808_v48 = vsel %vm1812_vm4, %v3774_v56, 0.0 }
 0x290   : > { %3565 = vadd.xlane.f32.xlu0 %v3564_v4 }
 0x291   : > { %3568 = vadd.xlane.f32.xlu1 %v3567_v33  ;;  %v6906_v60 = vpop.xlane.xlu0 %2556  ;;  %v3776_v33 = vsel %vm6897_vm10, %v7918_v63, 0.0 }
 0x292   : > { %v6911_v27 = vpop.xlane.xlu1 %2565  ;;  %v3814_v24 = vsel %vm1812_vm4, %v3776_v33, 0.0 }
 0x294   : > { %3806 = vadd.xlane.f32.xlu0 %v3805_v35  ;;  %v3777_v35 = vsel %vm6890_vm9, %v7919_v34, 0.0 }
 0x295   : > { %3809 = vadd.xlane.f32.xlu1 %v3808_v48  ;;  %v6918_v4 = vpop.xlane.xlu0 %2562  ;;  %v3778_v48 = vsel %vm6897_vm10, %v7920_v22, 0.0  ;;  %v3817_v63 = vsel %vm1812_vm4, %v3777_v35, 0.0  ;;  %v2045_v22 = vrot.slane %v6753_v1, %v6060_v28  ;;  %v2054_v35 = vrot.slane %v6846_v32, %v6060_v28 }
 0x296   : > { %v6923_v41 = vpop.xlane.xlu1 %2890  ;;  %v3820_v20 = vsel %vm1812_vm4, %v3778_v48, 0.0  ;;  %v2049_v48 = vrot.slane %v6740_v15, %v6054_v17  ;;  %v2058_v1 = vrot.slane %v6839_v10, %v6054_v17 }
 0x298   : > { %3812 = vadd.xlane.f32.xlu0 %v3811_v9  ;;  %v3779_v9 = vsel %vm6890_vm9, %v7921_v14, 0.0  ;;  %v2050_v15 = vsel %vm1950_vm14, %v2049_v48, %v2045_v22  ;;  %v2059_v10 = vsel %vm1950_vm14, %v2058_v1, %v2054_v35 }
 0x299   : > { %3815 = vadd.xlane.f32.xlu1 %v3814_v24  ;;  %v6930_v56 = vpop.xlane.xlu0 %2887  ;;  %v3780_v24 = vsel %vm6897_vm10, %v7922_v43, 0.0  ;;  %v3781_v43 = vsel %vm6890_vm9, %v7923_v5, 0.0  ;;  %v3784_v5 = vsel %vm6897_vm10, %v7926_v30, 0.0  ;;  %v2103_v48 = vsel %vm2091_vm1, %v2050_v15, %v6751_v58 }
 0x29a   : > { %v6935_v55 = vpop.xlane.xlu1 %2896  ;;  %v3826_v14 = vsel %vm1812_vm4, %v3780_v24, 0.0  ;;  %v3829_v23 = vsel %vm1812_vm4, %v3781_v43, 0.0  ;;  %v2382_v43 = vrot.slane %v6780_v8, %v6060_v28  ;;  %v2391_v58 = vrot.slane %v6870_v29, %v6060_v28 }
 0x29b   : > { %v2386_v8 = vrot.slane %v6767_v61, %v6054_v17  ;;  %v2395_v29 = vrot.slane %v6863_v3, %v6054_v17  ;;  %v3788_v3 = vsel %vm6897_vm10, %v5770_v16, 0.0 }
 0x29c   : > { %3818 = vadd.xlane.f32.xlu0 %v3817_v63  ;;  %v3823_v63 = vsel %vm1812_vm4, %v3779_v9, 0.0  ;;  %v3782_v9 = vsel %vm6897_vm10, %v7924_v7, 0.0 }
 0x29d   : > { %3821 = vadd.xlane.f32.xlu1 %v3820_v20  ;;  %v6942_v33 = vpop.xlane.xlu0 %2893  ;;  %v2063_v20 = vrot.slane %v6858_v47, %v6060_v28  ;;  %v2067_v47 = vrot.slane %v6851_v18, %v6054_v17  ;;  %v3832_v22 = vsel %vm1812_vm4, %v3782_v9, 0.0  ;;  %v3783_v18 = vsel %vm6890_vm9, %v7925_v40, 0.0 }
 0x29e   : > { %v1902_v34 = vpop.xlane.xlu1 %1901  ;;  %v3835_v15 = vsel %vm1812_vm4, %v3783_v18, 0.0  ;;  %v2387_v61 = vsel %vm1950_vm14, %v2386_v8, %v2382_v43 }
 0x29f   : > { %v2068_v7 = vsel %vm1950_vm14, %v2067_v47, %v2063_v20  ;;  %v2104_v20 = vsel %vm2093_vm2, %v2059_v10, %v2103_v48 }
 0x2a0   : > { %3824 = vadd.xlane.f32.xlu0 %v3823_v63  ;;  %v2105_v47 = vsel %vm2095_vm3, %v2068_v7, %v2104_v20 }
 0x2a1   : > { %3827 = vadd.xlane.f32.xlu1 %v3826_v14  ;;  %v1899_v32 = vpop.xlane.xlu0 %1898  ;;  %v2076_v14 = vrot.slane %v1902_v34, %v6054_v17  ;;  %v3838_v34 = vsel %vm1812_vm4, %v3784_v5, 0.0  ;;  %v3785_v5 = vsel %vm6890_vm9, %v7927_v46, 0.0 }
 0x2a2   : > { %v1908_v24 = vpop.xlane.xlu1 %1907  ;;  %v2072_v63 = vrot.slane %v1899_v32, %v6060_v28 }
 0x2a4   : > { %3830 = vadd.xlane.f32.xlu0 %v3829_v23  ;;  %v2077_v32 = vsel %vm1950_vm14, %v2076_v14, %v2072_v63  ;;  %v2085_v23 = vrot.slane %v1908_v24, %v6054_v17  ;;  %v2400_v24 = vrot.slane %v6884_v19, %v6060_v28  ;;  %v2404_v19 = vrot.slane %v6876_v62, %v6054_v17 }
 0x2a5   : > { %3833 = vadd.xlane.f32.xlu1 %v3832_v22  ;;  %v1905_v35 = vpop.xlane.xlu0 %1904  ;;  %v2106_v63 = vsel %vm2097_vm5, %v2077_v32, %v2105_v47  ;;  %v3786_v22 = vsel %vm6897_vm10, %v7928_v52, 0.0  ;;  %v2396_v32 = vsel %vm1950_vm14, %v2395_v29, %v2391_v58  ;;  %v3787_v62 = vsel %vm6890_vm9, %v7929_v25, 0.0 }
 0x2a6   : > { %v2241_v1 = vpop.xlane.xlu1 %2240  ;;  %v2081_v9 = vrot.slane %v1905_v35, %v6060_v28  ;;  %v2405_v43 = vsel %vm1950_vm14, %v2404_v19, %v2400_v24  ;;  %v3844_v20 = vsel %vm1812_vm4, %v3786_v22, 0.0  ;;  %v2713_v58 = vrot.slane %v6807_v12, %v6060_v28 }
 0x2a7   : > { %v2413_v35 = vrot.slane %v2241_v1, %v6054_v17  ;;  %v3850_v1 = vsel %vm1812_vm4, %v3788_v3, 0.0  ;;  %v3789_v29 = vsel %vm6890_vm9, %v5798_v38, 0.0  ;;  %v2717_v12 = vrot.slane %v6794_v54, %v6054_v17 }
 0x2a8   : > { %v2086_v7 = vsel %vm1950_vm14, %v2085_v23, %v2081_v9  ;;  %3836 = vadd.xlane.f32.xlu0 %v3835_v15  ;;  %v2433_v23 = vsel %vm2091_vm1, %v2387_v61, %v6778_v26  ;;  %v2722_v26 = vrot.slane %v6906_v60, %v6060_v28  ;;  %v2726_v60 = vrot.slane %v6894_v0, %v6054_v17 }
 0x2a9   : > { %v2107_v10 = vsel %vm2099_vm6, %v2086_v7, %v2106_v63  ;;  %3839 = vadd.xlane.f32.xlu1 %v3838_v34  ;;  %v2238_v14 = vpop.xlane.xlu0 %2237  ;;  %v3841_v34 = vsel %vm1812_vm4, %v3785_v5, 0.0  ;;  %v2434_v15 = vsel %vm2093_vm2, %v2396_v32, %v2433_v23  ;;  %v3847_v7 = vsel %vm1812_vm4, %v3787_v62, 0.0 }
 0x2aa   : > { %2111 = vst.msk [vmem:[%s5375_s30 + $0x8] sm:$0xff] %vm1812_vm4, %v2107_v10  ;;  %v2247_v18 = vpop.xlane.xlu1 %2246  ;;  %v2409_v48 = vrot.slane %v2238_v14, %v6060_v28  ;;  %v2435_v63 = vsel %vm2095_vm3, %v2405_v43, %v2434_v15  ;;  %v2731_v10 = vrot.slane %v6918_v4, %v6060_v28  ;;  %v2718_v54 = vsel %vm1950_vm14, %v2717_v12, %v2713_v58 }
 0x2ab   : > { %v2422_v5 = vrot.slane %v2247_v18, %v6054_v17  ;;  %v3790_v18 = vsel %vm6897_vm10, %v5796_v37, 0.0  ;;  %v2735_v4 = vrot.slane %v6911_v27, %v6054_v17  ;;  %v3792_v0 = vsel %vm6897_vm10, %v5800_v39, 0.0 }
 0x2ac   : > { %3842 = vadd.xlane.f32.xlu0 %v3841_v34  ;;  %v2414_v9 = vsel %vm1950_vm14, %v2413_v35, %v2409_v48  ;;  %v2727_v32 = vsel %vm1950_vm14, %v2726_v60, %v2722_v26  ;;  %v3853_v34 = vsel %vm1812_vm4, %v3789_v29, 0.0  ;;  %v3791_v27 = vsel %vm6890_vm9, %v5803_v42, 0.0 }
 0x2ad   : > { %3845 = vadd.xlane.f32.xlu1 %v3844_v20  ;;  %v2244_v47 = vpop.xlane.xlu0 %2243  ;;  %v2436_v14 = vsel %vm2097_vm5, %v2414_v9, %v2435_v63  ;;  %v2736_v43 = vsel %vm1950_vm14, %v2735_v4, %v2731_v10  ;;  %v3856_v20 = vsel %vm1812_vm4, %v3790_v18, 0.0  ;;  %v2764_v62 = vsel %vm2091_vm1, %v2718_v54, %v6805_v6 }
 0x2ae   : > { %v2572_v8 = vpop.xlane.xlu1 %2571  ;;  %v2418_v24 = vrot.slane %v2244_v47, %v6060_v28  ;;  %v3862_v47 = vsel %vm1812_vm4, %v3792_v0, 0.0  ;;  %v2765_v58 = vsel %vm2093_vm2, %v2727_v32, %v2764_v62  ;;  %v3053_v6 = vrot.slane %v6930_v56, %v6060_v28 }
 0x2af   : > { %v2744_v35 = vrot.slane %v2572_v8, %v6054_v17  ;;  %v3859_v63 = vsel %vm1812_vm4, %v3791_v27, 0.0  ;;  %v3793_v26 = vsel %vm6890_vm9, %v5870_v44, 0.0  ;;  %v3057_v56 = vrot.slane %v6923_v41, %v6054_v17 }
 0x2b0   : > { %v2423_v22 = vsel %vm1950_vm14, %v2422_v5, %v2418_v24  ;;  %3848 = vadd.xlane.f32.xlu0 %v3847_v7  ;;  %v2766_v24 = vsel %vm2095_vm3, %v2736_v43, %v2765_v58  ;;  %v3062_v7 = vrot.slane %v6942_v33, %v6060_v28  ;;  %v3066_v33 = vrot.slane %v6935_v55, %v6054_v17 }
 0x2b1   : > { %v2437_v61 = vsel %vm2099_vm6, %v2423_v22, %v2436_v14  ;;  %3851 = vadd.xlane.f32.xlu1 %v3850_v1  ;;  %v2569_v19 = vpop.xlane.xlu0 %2568  ;;  %v3044_v1 = vrot.slane %v6834_v50, %v6060_v28  ;;  %v3048_v50 = vrot.slane %v6821_v2, %v6054_v17  ;;  %v3794_v22 = vsel %vm6897_vm10, %v5860_v31, 0.0 }
 0x2b2   : > { %4940 = vst.msk [vmem:[%s5375_s30 + $0x18] sm:$0xff] %vm1812_vm4, %v2437_v61  ;;  %v2578_v48 = vpop.xlane.xlu1 %2577  ;;  %v2740_v3 = vrot.slane %v2569_v19, %v6060_v28  ;;  %v3058_v41 = vsel %vm1950_vm14, %v3057_v56, %v3053_v6  ;;  %v3865_v18 = vsel %vm1812_vm4, %v3793_v26, 0.0  ;;  %v3067_v54 = vsel %vm1950_vm14, %v3066_v33, %v3062_v7  ;;  %v7935_v7 = vld [vmem:[#allocation21_spill] sm:$0xff]  ;;  %v7936_v56 = vld [vmem:[#allocation20_spill] sm:$0xff]  ;;  %v7937_v33 = vld [vmem:[#allocation23_spill] sm:$0xff] }
 0x2b3   : > { %v2753_v15 = vrot.slane %v2578_v48, %v6054_v17  ;;  %v3049_v2 = vsel %vm1950_vm14, %v3048_v50, %v3044_v1  ;;  %v3868_v4 = vsel %vm1812_vm4, %v3794_v22, 0.0  ;;  %v3795_v55 = vsel %vm6890_vm9, %v5875_v51, 0.0 }
 0x2b4   : > { %3854 = vadd.xlane.f32.xlu0 %v3853_v34  ;;  %v2745_v23 = vsel %vm1950_vm14, %v2744_v35, %v2740_v3  ;;  %v3095_v48 = vsel %vm2091_vm1, %v3049_v2, %v6832_v13  ;;  %v3796_v32 = vsel %vm6897_vm10, %v5872_v45, 0.0  ;;  %v3337_v27 = vrot.slane %v6610_v49, %v6060_v28 }
 0x2b5   : > { %3857 = vadd.xlane.f32.xlu1 %v3856_v20  ;;  %v2575_v9 = vpop.xlane.xlu0 %2574  ;;  %v2767_v29 = vsel %vm2097_vm5, %v2745_v23, %v2766_v24  ;;  %v3096_v35 = vsel %vm2093_vm2, %v3058_v41, %v3095_v48  ;;  %v3871_v23 = vsel %vm1812_vm4, %v3795_v55, 0.0  ;;  %v3874_v1 = vsel %vm1812_vm4, %v3796_v32, 0.0  ;;  %v7934_v24 = vld [vmem:[#allocation25_spill] sm:$0xff]  ;;  %v7938_v41 = vld [vmem:[#allocation22_spill] sm:$0xff] }
 0x2b6   : > { %v2903_v5 = vpop.xlane.xlu1 %2902  ;;  %v2749_v8 = vrot.slane %v2575_v9, %v6060_v28  ;;  %v3097_v13 = vsel %vm2095_vm3, %v3067_v54, %v3096_v35  ;;  %v3797_v58 = vsel %vm6890_vm9, %v5942_v59, 0.0  ;;  %v4097_v55 = vadd.s32 3, %v5630_v21  ;;  %v7940_v35 = vld [vmem:[#allocation24_spill] sm:$0xff] }
 0x2b7   : > { %v3075_v19 = vrot.slane %v2903_v5, %v6054_v17  ;;  %v3877_v26 = vsel %vm1812_vm4, %v3797_v58, 0.0 }
 0x2b8   : > { %v2754_v12 = vsel %vm1950_vm14, %v2753_v15, %v2749_v8  ;;  %3860 = vadd.xlane.f32.xlu0 %v3859_v63  ;;  %v3798_v8 = vsel %vm6897_vm10, %v5932_v53, 0.0 }
 0x2b9   : > { %v2768_v10 = vsel %vm2099_vm6, %v2754_v12, %v2767_v29  ;;  %3863 = vadd.xlane.f32.xlu1 %v3862_v47  ;;  %v2900_v14 = vpop.xlane.xlu0 %2899  ;;  %v3880_v50 = vsel %vm1812_vm4, %v3798_v8, 0.0  ;;  %v3799_v29 = vsel %vm6890_vm9, %v7935_v7, 0.0 }
 0x2ba   : > { %4942 = vst.msk [vmem:[%s5375_s30 + $0x28] sm:$0xff] %vm1812_vm4, %v2768_v10  ;;  %v2909_v60 = vpop.xlane.xlu1 %2908  ;;  %v3071_v61 = vrot.slane %v2900_v14, %v6060_v28  ;;  %v3800_v10 = vsel %vm6897_vm10, %v7936_v56, 0.0  ;;  %v3883_v22 = vsel %vm1812_vm4, %v3799_v29, 0.0  ;;  %v7949_v29 = vld [vmem:[#allocation6_spill] sm:$0xff] }
 0x2bb   : > { %v3084_v34 = vrot.slane %v2909_v60, %v6054_v17  ;;  %v3886_v2 = vsel %vm1812_vm4, %v3800_v10, 0.0  ;;  %v3801_v60 = vsel %vm6890_vm9, %v7937_v33, 0.0 }
 0x2bc   : > { %3866 = vadd.xlane.f32.xlu0 %v3865_v18  ;;  %v3076_v3 = vsel %vm1950_vm14, %v3075_v19, %v3071_v61  ;;  %v3802_v19 = vsel %vm6897_vm10, %v7938_v41, 0.0  ;;  %v7939_v18 = vld [vmem:[#allocation3_spill] sm:$0xff]  ;;  %v3889_v48 = vsel %vm1812_vm4, %v3801_v60, 0.0 }
 0x2bd   : > { %3869 = vadd.xlane.f32.xlu1 %v3868_v4  ;;  %v2906_v0 = vpop.xlane.xlu0 %2905  ;;  %v3098_v9 = vsel %vm2097_vm5, %v3076_v3, %v3097_v13  ;;  %v4096_v54 = vadd.s32 3, %v7939_v18  ;;  %v3892_v3 = vsel %vm1812_vm4, %v3802_v19, 0.0 }
 0x2be   : > { %v3190_v43 = vpop.xlane.xlu1 %3189  ;;  %v3080_v20 = vrot.slane %v2906_v0, %v6060_v28  ;;  %v3803_v0 = vsel %vm6890_vm9, %v6023_v36, 0.0 }
 0x2bf   : > { %v3341_v62 = vrot.slane %v3190_v43, %v6054_v17  ;;  %v7941_v43 = vld [vmem:[#allocation4_spill] sm:$0xff]  ;;  %v3895_v11 = vsel %vm1812_vm4, %v3803_v0, 0.0 }
 0x2c0   : > { %v3085_v47 = vsel %vm1950_vm14, %v3084_v34, %v3080_v20  ;;  %3872 = vadd.xlane.f32.xlu0 %v3871_v23  ;;  %v3804_v34 = vsel %vm6897_vm10, %v7940_v35, 0.0  ;;  %vm7174_vm11 = vcmp.eq.s32.totalorder %v7941_v43, %v4096_v54  ;;  %vm7179_vm12 = vcmp.eq.s32.totalorder %v7941_v43, %v4097_v55  ;;  %v7946_v23 = vld [vmem:[#allocation7_spill] sm:$0xff] }
 0x2c1   : > { %v3342_v49 = vsel %vm1950_vm14, %v3341_v62, %v3337_v27  ;;  %v3099_v15 = vsel %vm2099_vm6, %v3085_v47, %v3098_v9  ;;  %3875 = vadd.xlane.f32.xlu1 %v3874_v1  ;;  %v7134_v5 = vpop.xlane.xlu0 %3192  ;;  %v3898_v62 = vsel %vm1812_vm4, %v3804_v34, 0.0  ;;  %v4104_v57 = vsel %vm7174_vm11, %v7946_v23, 0.0  ;;  %v7947_v47 = vld [vmem:[#allocation5_spill] sm:$0xff] }
 0x2c2   : > { %v3421_v6 = vsel %vm2099_vm6, %v3342_v49, %v7934_v24  ;;  %4944 = vst.msk [vmem:[%s5375_s30 + $0x38] sm:$0xff] %vm1812_vm4, %v3099_v15  ;;  %v7143_v63 = vpop.xlane.xlu1 %3195  ;;  %v4105_v1 = vsel %vm7179_vm12, %v7947_v47, 0.0  ;;  %v4136_v49 = vsel %vm1812_vm4, %v4104_v57, 0.0  ;;  %v7948_v15 = vld [vmem:[#allocation8_spill] sm:$0xff]  ;;  %v4107_v10 = vsel %vm7179_vm12, %v7949_v29, 0.0 }
 0x2c3   : > { %4945 = vst.msk [vmem:[%s5375_s30 + $0x40] sm:$0xff] %vm1812_vm4, %v3421_v6  ;;  %v4106_v8 = vsel %vm7174_vm11, %v7948_v15, 0.0  ;;  %v4139_v24 = vsel %vm1812_vm4, %v4105_v1, 0.0  ;;  %v3350_v54 = vrot.slane %v7143_v63, %v6054_v17 }
 0x2c4   : > { %3878 = vadd.xlane.f32.xlu0 %v3877_v26  ;;  %v4142_v19 = vsel %vm1812_vm4, %v4106_v8, 0.0 }
 0x2c5   : > { %3881 = vadd.xlane.f32.xlu1 %v3880_v50  ;;  %v3199_v12 = vpop.xlane.xlu0 %3198 }
 0x2c6   : > { %v3202_v14 = vpop.xlane.xlu1 %3201  ;;  %v3355_v26 = vrot.slane %v3199_v12, %v6060_v28 }
 0x2c7   : > { %v3359_v6 = vrot.slane %v3202_v14, %v6054_v17  ;;  %v3346_v14 = vrot.slane %v7134_v5, %v6060_v28 }
 0x2c8   : > { %3884 = vadd.xlane.f32.xlu0 %v3883_v22 }
 0x2c9   : > { %3887 = vadd.xlane.f32.xlu1 %v3886_v2  ;;  %v3205_v61 = vpop.xlane.xlu0 %3204  ;;  %v3360_v63 = vsel %vm1950_vm14, %v3359_v6, %v3355_v26  ;;  %v3351_v1 = vsel %vm1950_vm14, %v3350_v54, %v3346_v14 }
 0x2ca   : > { %v3208_v4 = vpop.xlane.xlu1 %3207  ;;  %v3364_v2 = vrot.slane %v3205_v61, %v6060_v28  ;;  %v7950_v61 = vld [vmem:[#allocation10_spill] sm:$0xff] }
 0x2cb   : > { %v3368_v22 = vrot.slane %v3208_v4, %v6054_v17  ;;  %v4145_v4 = vsel %vm1812_vm4, %v4107_v10, 0.0  ;;  %v4108_v0 = vsel %vm7174_vm11, %v7950_v61, 0.0 }
 0x2cc   : > { %3890 = vadd.xlane.f32.xlu0 %v3889_v48  ;;  %v4148_v8 = vsel %vm1812_vm4, %v4108_v0, 0.0 }
 0x2cd   : > { %3893 = vadd.xlane.f32.xlu1 %v3892_v3  ;;  %v3211_v32 = vpop.xlane.xlu0 %3210 }
 0x2ce   : > { %v3214_v27 = vpop.xlane.xlu1 %3213  ;;  %v3373_v55 = vrot.slane %v3211_v32, %v6060_v28  ;;  %v7951_v32 = vld [vmem:[#allocation9_spill] sm:$0xff] }
 0x2cf   : > { %v3377_v12 = vrot.slane %v3214_v27, %v6054_v17 }
 0x2d0   : > { %3896 = vadd.xlane.f32.xlu0 %v3895_v11  ;;  %v4109_v11 = vsel %vm7179_vm12, %v7951_v32, 0.0 }
 0x2d1   : > { %3899 = vadd.xlane.f32.xlu1 %v3898_v62  ;;  %v3217_v9 = vpop.xlane.xlu0 %3216  ;;  %v3369_v62 = vsel %vm1950_vm14, %v3368_v22, %v3364_v2  ;;  %v4151_v26 = vsel %vm1812_vm4, %v4109_v11, 0.0 }
 0x2d2   : > { %v3220_v58 = vpop.xlane.xlu1 %3219  ;;  %v3382_v3 = vrot.slane %v3217_v9, %v6060_v28 }
 0x2d3   : > { %v3386_v48 = vrot.slane %v3220_v58, %v6054_v17  ;;  %v3378_v58 = vsel %vm1950_vm14, %v3377_v12, %v3373_v55 }
 0x2d4   : > { %4137 = vadd.xlane.f32.xlu0 %v4136_v49 }
 0x2d5   : > { %4140 = vadd.xlane.f32.xlu1 %v4139_v24  ;;  %v3223_v50 = vpop.xlane.xlu0 %3222  ;;  %v3422_v24 = vsel %vm2087_vm15, %v3360_v63, %v3351_v1  ;;  %v3387_v6 = vsel %vm1950_vm14, %v3386_v48, %v3382_v3 }
 0x2d6   : > { %v3226_v60 = vpop.xlane.xlu1 %3225  ;;  %v3391_v5 = vrot.slane %v3223_v50, %v6060_v28  ;;  %v7952_v50 = vld [vmem:[#allocation12_spill] sm:$0xff]  ;;  %v3423_v22 = vsel %vm2089_vm0, %v3369_v62, %v3422_v24 }
 0x2d7   : > { %v3395_v34 = vrot.slane %v3226_v60, %v6054_v17  ;;  %v4110_v10 = vsel %vm7174_vm11, %v7952_v50, 0.0  ;;  %v3424_v14 = vsel %vm2091_vm1, %v3378_v58, %v3423_v22 }
 0x2d8   : > { %4143 = vadd.xlane.f32.xlu0 %v4142_v19  ;;  %v7953_v19 = vld [vmem:[#allocation11_spill] sm:$0xff]  ;;  %v3425_v3 = vsel %vm2093_vm2, %v3387_v6, %v3424_v14  ;;  %v4154_v0 = vsel %vm1812_vm4, %v4110_v10, 0.0  ;;  %v4114_v6 = vsel %vm7174_vm11, %v7925_v40, 0.0  ;;  %v4115_v10 = vsel %vm7179_vm12, %v7926_v30, 0.0 }
 0x2d9   : > { %4146 = vadd.xlane.f32.xlu1 %v4145_v4  ;;  %v3229_v27 = vpop.xlane.xlu0 %3228  ;;  %v3396_v2 = vsel %vm1950_vm14, %v3395_v34, %v3391_v5  ;;  %v4111_v54 = vsel %vm7179_vm12, %v7953_v19, 0.0  ;;  %v7954_v5 = vld [vmem:[#allocation14_spill] sm:$0xff] }
 0x2da   : > { %v3232_v57 = vpop.xlane.xlu1 %3231  ;;  %v3400_v9 = vrot.slane %v3229_v27, %v6060_v28  ;;  %v3426_v63 = vsel %vm2095_vm3, %v3396_v2, %v3425_v3  ;;  %v4157_v34 = vsel %vm1812_vm4, %v4111_v54, 0.0  ;;  %v4112_v27 = vsel %vm7174_vm11, %v7954_v5, 0.0 }
 0x2db   : > { %v3404_v49 = vrot.slane %v3232_v57, %v6054_v17  ;;  %v4166_v2 = vsel %vm1812_vm4, %v4114_v6, 0.0  ;;  %v4116_v54 = vsel %vm7174_vm11, %v7927_v46, 0.0  ;;  %v4122_v6 = vsel %vm7174_vm11, %v5803_v42, 0.0 }
 0x2dc   : > { %4149 = vadd.xlane.f32.xlu0 %v4148_v8  ;;  %v4160_v8 = vsel %vm1812_vm4, %v4112_v27, 0.0 }
 0x2dd   : > { %4152 = vadd.xlane.f32.xlu1 %v4151_v26  ;;  %v3235_v60 = vpop.xlane.xlu0 %3234  ;;  %v3405_v12 = vsel %vm1950_vm14, %v3404_v49, %v3400_v9  ;;  %v7955_v9 = vld [vmem:[#allocation13_spill] sm:$0xff] }
 0x2de   : > { %v3238_v55 = vpop.xlane.xlu1 %3237  ;;  %v3409_v48 = vrot.slane %v3235_v60, %v6060_v28  ;;  %v3427_v11 = vsel %vm2097_vm5, %v3405_v12, %v3426_v63  ;;  %v4113_v1 = vsel %vm7179_vm12, %v7955_v9, 0.0  ;;  %v4169_v60 = vsel %vm1812_vm4, %v4115_v10, 0.0 }
 0x2df   : > { %v3413_v4 = vrot.slane %v3238_v55, %v6054_v17  ;;  %v4163_v24 = vsel %vm1812_vm4, %v4113_v1, 0.0  ;;  %v4117_v12 = vsel %vm7179_vm12, %v7928_v52, 0.0  ;;  %v4119_v63 = vsel %vm7179_vm12, %v5770_v16, 0.0 }
 0x2e0   : > { %4155 = vadd.xlane.f32.xlu0 %v4154_v0  ;;  %v4175_v3 = vsel %vm1812_vm4, %v4117_v12, 0.0  ;;  %v4123_v12 = vsel %vm7179_vm12, %v5800_v39, 0.0 }
 0x2e1   : > { %v3414_v62 = vsel %vm1950_vm14, %v3413_v4, %v3409_v48  ;;  %4158 = vadd.xlane.f32.xlu1 %v4157_v34  ;;  %v7252_v57 = vpop.xlane.xlu0 %3475  ;;  %v4172_v48 = vsel %vm1812_vm4, %v4116_v54, 0.0  ;;  %v4118_v4 = vsel %vm7174_vm11, %v7929_v25, 0.0 }
 0x2e2   : > { %v3428_v58 = vsel %vm2099_vm6, %v3414_v62, %v3427_v11  ;;  %v7258_v49 = vpop.xlane.xlu1 %3478  ;;  %v4178_v27 = vsel %vm1812_vm4, %v4118_v4, 0.0  ;;  %v4181_v11 = vsel %vm1812_vm4, %v4119_v63, 0.0  ;;  %v4120_v62 = vsel %vm7174_vm11, %v5798_v38, 0.0 }
 0x2e3   : > { %4946 = vst.msk [vmem:[%s5375_s30 + $0x48] sm:$0xff] %vm1812_vm4, %v3428_v58  ;;  %v4121_v58 = vsel %vm7179_vm12, %v5796_v37, 0.0 }
 0x2e4   : > { %4161 = vadd.xlane.f32.xlu0 %v4160_v8  ;;  %v4187_v10 = vsel %vm1812_vm4, %v4121_v58, 0.0 }
 0x2e5   : > { %4164 = vadd.xlane.f32.xlu1 %v4163_v24  ;;  %v3482_v26 = vpop.xlane.xlu0 %3481  ;;  %v4184_v24 = vsel %vm1812_vm4, %v4120_v62, 0.0 }
 0x2e6   : > { %v3485_v22 = vpop.xlane.xlu1 %3484 }
 0x2e8   : > { %4167 = vadd.xlane.f32.xlu0 %v4166_v2  ;;  %v3618_v2 = vrot.slane %v3485_v22, %v6054_v17  ;;  %v3605_v22 = vrot.slane %v7252_v57, %v6060_v28 }
 0x2e9   : > { %4170 = vadd.xlane.f32.xlu1 %v4169_v60  ;;  %v3488_v14 = vpop.xlane.xlu0 %3487  ;;  %v3614_v60 = vrot.slane %v3482_v26, %v6060_v28  ;;  %v3609_v26 = vrot.slane %v7258_v49, %v6054_v17 }
 0x2ea   : > { %v3491_v55 = vpop.xlane.xlu1 %3490  ;;  %v3623_v4 = vrot.slane %v3488_v14, %v6060_v28  ;;  %v4193_v14 = vsel %vm1812_vm4, %v4123_v12, 0.0 }
 0x2eb   : > { %v3619_v49 = vsel %vm1950_vm14, %v3618_v2, %v3614_v60  ;;  %v3610_v2 = vsel %vm1950_vm14, %v3609_v26, %v3605_v22 }
 0x2ec   : > { %4173 = vadd.xlane.f32.xlu0 %v4172_v48  ;;  %v4427_v48 = vadd.s32 4, %v7939_v18 }
 0x2ed   : > { %4176 = vadd.xlane.f32.xlu1 %v4175_v3  ;;  %v3494_v0 = vpop.xlane.xlu0 %3493  ;;  %v3627_v3 = vrot.slane %v3491_v55, %v6054_v17 }
 0x2ee   : > { %v3497_v34 = vpop.xlane.xlu1 %3496  ;;  %v3632_v58 = vrot.slane %v3494_v0, %v6060_v28  ;;  %v4125_v0 = vsel %vm7179_vm12, %v5860_v31, 0.0  ;;  %vm7330_vm13 = vcmp.eq.s32.totalorder %v7941_v43, %v4427_v48  ;;  %v4126_v48 = vsel %vm7174_vm11, %v5875_v51, 0.0 }
 0x2ef   : > { %v3636_v62 = vrot.slane %v3497_v34, %v6054_v17 }
 0x2f0   : > { %4179 = vadd.xlane.f32.xlu0 %v4178_v27  ;;  %v4190_v27 = vsel %vm1812_vm4, %v4122_v6, 0.0 }
 0x2f1   : > { %4182 = vadd.xlane.f32.xlu1 %v4181_v11  ;;  %v3500_v1 = vpop.xlane.xlu0 %3499  ;;  %v4428_v11 = vadd.s32 4, %v5630_v21  ;;  %v4124_v21 = vsel %vm7174_vm11, %v5870_v44, 0.0  ;;  %v3637_v60 = vsel %vm1950_vm14, %v3636_v62, %v3632_v58  ;;  %v4435_v62 = vsel %vm7330_vm13, %v7946_v23, 0.0 }
 0x2f2   : > { %v3503_v8 = vpop.xlane.xlu1 %3502  ;;  %v3641_v55 = vrot.slane %v3500_v1, %v6060_v28  ;;  %v3628_v1 = vsel %vm1950_vm14, %v3627_v3, %v3623_v4  ;;  %v4196_v12 = vsel %vm1812_vm4, %v4124_v21, 0.0  ;;  %v4199_v4 = vsel %vm1812_vm4, %v4125_v0, 0.0 }
 0x2f3   : > { %v3645_v18 = vrot.slane %v3503_v8, %v6054_v17  ;;  %vm7350_vm7 = vcmp.eq.s32.totalorder %v7941_v43, %v4428_v11  ;;  %v4467_v43 = vsel %vm1812_vm4, %v4435_v62, 0.0 }
 0x2f4   : > { %4185 = vadd.xlane.f32.xlu0 %v4184_v24  ;;  %v4436_v11 = vsel %vm7350_vm7, %v7947_v47, 0.0  ;;  %v4454_v62 = vsel %vm7350_vm7, %v5800_v39, 0.0  ;;  %v4455_v39 = vsel %vm7330_vm13, %v5870_v44, 0.0  ;;  %v4127_v44 = vsel %vm7179_vm12, %v5872_v45, 0.0 }
 0x2f5   : > { %4188 = vadd.xlane.f32.xlu1 %v4187_v10  ;;  %v3506_v54 = vpop.xlane.xlu0 %3505  ;;  %v3646_v3 = vsel %vm1950_vm14, %v3645_v18, %v3641_v55  ;;  %v4450_v20 = vsel %vm7350_vm7, %v5770_v16, 0.0 }
 0x2f6   : > { %v3509_v63 = vpop.xlane.xlu1 %3508  ;;  %v3650_v57 = vrot.slane %v3506_v54, %v6060_v28 }
 0x2f7   : > { %v3654_v24 = vrot.slane %v3509_v63, %v6054_v17  ;;  %v3746_v63 = vsel %vm2087_vm15, %v3619_v49, %v3610_v2 }
 0x2f8   : > { %4191 = vadd.xlane.f32.xlu0 %v4190_v27  ;;  %v3747_v27 = vsel %vm2089_vm0, %v3628_v1, %v3746_v63 }
 0x2f9   : > { %4194 = vadd.xlane.f32.xlu1 %v4193_v14  ;;  %v3512_v34 = vpop.xlane.xlu0 %3511  ;;  %v3655_v26 = vsel %vm1950_vm14, %v3654_v24, %v3650_v57  ;;  %v3748_v18 = vsel %vm2091_vm1, %v3637_v60, %v3747_v27  ;;  %v4202_v57 = vsel %vm1812_vm4, %v4126_v48, 0.0  ;;  %v4470_v60 = vsel %vm1812_vm4, %v4436_v11, 0.0 }
 0x2fa   : > { %v3515_v8 = vpop.xlane.xlu1 %3514  ;;  %v3659_v6 = vrot.slane %v3512_v34, %v6060_v28  ;;  %v3749_v49 = vsel %vm2093_vm2, %v3646_v3, %v3748_v18  ;;  %v4452_v48 = vsel %vm7350_vm7, %v5796_v37, 0.0  ;;  %v4439_v37 = vsel %vm7330_vm13, %v7950_v61, 0.0 }
 0x2fb   : > { %v3663_v54 = vrot.slane %v3515_v8, %v6054_v17  ;;  %v3750_v23 = vsel %vm2095_vm3, %v3655_v26, %v3749_v49  ;;  %v4437_v8 = vsel %vm7330_vm13, %v7948_v15, 0.0  ;;  %v4451_v15 = vsel %vm7330_vm13, %v5798_v38, 0.0 }
 0x2fc   : > { %4197 = vadd.xlane.f32.xlu0 %v4196_v12  ;;  %v4473_v47 = vsel %vm1812_vm4, %v4437_v8, 0.0  ;;  %v4456_v61 = vsel %vm7350_vm7, %v5860_v31, 0.0 }
 0x2fd   : > { %4200 = vadd.xlane.f32.xlu1 %v4199_v4  ;;  %v3518_v22 = vpop.xlane.xlu0 %3517  ;;  %v3664_v55 = vsel %vm1950_vm14, %v3663_v54, %v3659_v6  ;;  %v4438_v54 = vsel %vm7350_vm7, %v7949_v29, 0.0  ;;  %v4515_v4 = vsel %vm1812_vm4, %v4451_v15, 0.0  ;;  %v4453_v29 = vsel %vm7330_vm13, %v5803_v42, 0.0 }
 0x2fe   : > { %v3521_v14 = vpop.xlane.xlu1 %3520  ;;  %v3668_v21 = vrot.slane %v3518_v22, %v6060_v28  ;;  %v3751_v34 = vsel %vm2097_vm5, %v3664_v55, %v3750_v23  ;;  %v4476_v3 = vsel %vm1812_vm4, %v4438_v54, 0.0  ;;  %v4518_v22 = vsel %vm1812_vm4, %v4452_v48, 0.0 }
 0x2ff   : > { %v3672_v24 = vrot.slane %v3521_v14, %v6054_v17  ;;  %v4521_v38 = vsel %vm1812_vm4, %v4453_v29, 0.0  ;;  %v4524_v14 = vsel %vm1812_vm4, %v4454_v62, 0.0  ;;  %v4479_v42 = vsel %vm1812_vm4, %v4439_v37, 0.0 }
 0x300   : > { %4203 = vadd.xlane.f32.xlu0 %v4202_v57  ;;  %v4527_v23 = vsel %vm1812_vm4, %v4455_v39, 0.0  ;;  %v4530_v31 = vsel %vm1812_vm4, %v4456_v61, 0.0  ;;  %v4458_v39 = vsel %vm7350_vm7, %v5872_v45, 0.0  ;;  %v4128_v45 = vsel %vm7174_vm11, %v5942_v59, 0.0 }
 0x301   : > { %v3673_v0 = vsel %vm1950_vm14, %v3672_v24, %v3668_v21  ;;  %4468 = vadd.xlane.f32.xlu1 %v4467_v43  ;;  %v7367_v1 = vpop.xlane.xlu0 %3523  ;;  %v4440_v21 = vsel %vm7350_vm7, %v7951_v32, 0.0 }
 0x302   : > { %v3752_v6 = vsel %vm2099_vm6, %v3673_v0, %v3751_v34  ;;  %v7373_v2 = vpop.xlane.xlu1 %3526  ;;  %v4482_v57 = vsel %vm1812_vm4, %v4440_v21, 0.0 }
 0x303   : > { %4947 = vst.msk [vmem:[%s5375_s30 + $0x50] sm:$0xff] %vm1812_vm4, %v3752_v6  ;;  %v3681_v6 = vrot.slane %v7373_v2, %v6054_v17 }
 0x304   : > { %4471 = vadd.xlane.f32.xlu0 %v4470_v60  ;;  %v3677_v60 = vrot.slane %v7367_v1, %v6060_v28 }
 0x305   : > { %4474 = vadd.xlane.f32.xlu1 %v4473_v47  ;;  %v3530_v12 = vpop.xlane.xlu0 %3529 }
 0x306   : > { %v3533_v63 = vpop.xlane.xlu1 %3532  ;;  %v3686_v32 = vrot.slane %v3530_v12, %v6060_v28 }
 0x307   : > { %v3690_v43 = vrot.slane %v3533_v63, %v6054_v17  ;;  %v4205_v63 = vsel %vm1812_vm4, %v4127_v44, 0.0  ;;  %v4536_v44 = vsel %vm1812_vm4, %v4458_v39, 0.0 }
 0x308   : > { %4477 = vadd.xlane.f32.xlu0 %v4476_v3  ;;  %v4441_v3 = vsel %vm7330_vm13, %v7952_v50, 0.0 }
 0x309   : > { %4516 = vadd.xlane.f32.xlu1 %v4515_v4  ;;  %v3536_v27 = vpop.xlane.xlu0 %3535  ;;  %v3691_v2 = vsel %vm1950_vm14, %v3690_v43, %v3686_v32 }
 0x30a   : > { %v3539_v26 = vpop.xlane.xlu1 %3538  ;;  %v3695_v0 = vrot.slane %v3536_v27, %v6060_v28  ;;  %v4442_v27 = vsel %vm7350_vm7, %v7953_v19, 0.0  ;;  %v4457_v19 = vsel %vm7330_vm13, %v5875_v51, 0.0 }
 0x30b   : > { %v3699_v34 = vrot.slane %v3539_v26, %v6054_v17  ;;  %v4533_v32 = vsel %vm1812_vm4, %v4457_v19, 0.0  ;;  %v4461_v19 = vsel %vm7330_vm13, %v7935_v7, 0.0 }
 0x30c   : > { %4519 = vadd.xlane.f32.xlu0 %v4518_v22 }
 0x30d   : > { %4522 = vadd.xlane.f32.xlu1 %v4521_v38  ;;  %v3542_v18 = vpop.xlane.xlu0 %3541  ;;  %v3700_v29 = vsel %vm1950_vm14, %v3699_v34, %v3695_v0  ;;  %v3682_v38 = vsel %vm1950_vm14, %v3681_v6, %v3677_v60 }
 0x30e   : > { %v3545_v55 = vpop.xlane.xlu1 %3544  ;;  %v3704_v54 = vrot.slane %v3542_v18, %v6060_v28  ;;  %v4485_v18 = vsel %vm1812_vm4, %v4441_v3, 0.0  ;;  %v3753_v37 = vsel %vm2087_vm15, %v3691_v2, %v3682_v38 }
 0x30f   : > { %v3708_v47 = vrot.slane %v3545_v55, %v6054_v17 }
 0x310   : > { %4525 = vadd.xlane.f32.xlu0 %v4524_v14  ;;  %v4488_v14 = vsel %vm1812_vm4, %v4442_v27, 0.0 }
 0x311   : > { %4480 = vadd.xlane.f32.xlu1 %v4479_v42  ;;  %v3548_v49 = vpop.xlane.xlu0 %3547  ;;  %v3709_v50 = vsel %vm1950_vm14, %v3708_v47, %v3704_v54  ;;  %v3754_v42 = vsel %vm2089_vm0, %v3700_v29, %v3753_v37  ;;  %v4208_v47 = vsel %vm1812_vm4, %v4128_v45, 0.0  ;;  %v4446_v37 = vsel %vm7350_vm7, %v7926_v30, 0.0 }
 0x312   : > { %v3551_v24 = vpop.xlane.xlu1 %3550  ;;  %v3713_v15 = vrot.slane %v3548_v49, %v6060_v28  ;;  %v4462_v30 = vsel %vm7350_vm7, %v7936_v56, 0.0 }
 0x313   : > { %v3717_v12 = vrot.slane %v3551_v24, %v6054_v17  ;;  %v3755_v24 = vsel %vm2091_vm1, %v3709_v50, %v3754_v42  ;;  %v4500_v42 = vsel %vm1812_vm4, %v4446_v37, 0.0 }
 0x314   : > { %4483 = vadd.xlane.f32.xlu0 %v4482_v57 }
 0x315   : > { %4528 = vadd.xlane.f32.xlu1 %v4527_v23  ;;  %v3554_v11 = vpop.xlane.xlu0 %3553  ;;  %v3718_v55 = vsel %vm1950_vm14, %v3717_v12, %v3713_v15  ;;  %v4443_v12 = vsel %vm7330_vm13, %v7954_v5, 0.0  ;;  %v4460_v5 = vsel %vm7350_vm7, %v5932_v53, 0.0 }
 0x316   : > { %v3557_v8 = vpop.xlane.xlu1 %3556  ;;  %v3722_v1 = vrot.slane %v3554_v11, %v6060_v28  ;;  %v3756_v51 = vsel %vm2093_vm2, %v3718_v55, %v3755_v24  ;;  %v4491_v2 = vsel %vm1812_vm4, %v4443_v12, 0.0 }
 0x317   : > { %v3726_v4 = vrot.slane %v3557_v8, %v6054_v17 }
 0x318   : > { %4531 = vadd.xlane.f32.xlu0 %v4530_v31  ;;  %v4129_v31 = vsel %vm7179_vm12, %v5932_v53, 0.0 }
 0x319   : > { %4206 = vadd.xlane.f32.xlu1 %v4205_v63  ;;  %v3560_v48 = vpop.xlane.xlu0 %3559  ;;  %v3727_v21 = vsel %vm1950_vm14, %v3726_v4, %v3722_v1  ;;  %v4211_v54 = vsel %vm1812_vm4, %v4129_v31, 0.0  ;;  %v4444_v63 = vsel %vm7350_vm7, %v7955_v9, 0.0  ;;  %v4459_v1 = vsel %vm7330_vm13, %v5942_v59, 0.0 }
 0x31a   : > { %v3563_v26 = vpop.xlane.xlu1 %3562  ;;  %v3731_v22 = vrot.slane %v3560_v48, %v6060_v28  ;;  %v3757_v11 = vsel %vm2095_vm3, %v3727_v21, %v3756_v51  ;;  %v4494_v4 = vsel %vm1812_vm4, %v4444_v63, 0.0  ;;  %v4539_v29 = vsel %vm1812_vm4, %v4459_v1, 0.0 }
 0x31b   : > { %v3735_v62 = vrot.slane %v3563_v26, %v6054_v17  ;;  %v4542_v9 = vsel %vm1812_vm4, %v4460_v5, 0.0  ;;  %v4130_v26 = vsel %vm7174_vm11, %v7935_v7, 0.0  ;;  %v4131_v59 = vsel %vm7179_vm12, %v7936_v56, 0.0 }
 0x31c   : > { %4486 = vadd.xlane.f32.xlu0 %v4485_v18  ;;  %v4214_v50 = vsel %vm1812_vm4, %v4130_v26, 0.0  ;;  %v4217_v53 = vsel %vm1812_vm4, %v4131_v59, 0.0  ;;  %v4545_v7 = vsel %vm1812_vm4, %v4461_v19, 0.0  ;;  %v4133_v31 = vsel %vm7179_vm12, %v7938_v41, 0.0 }
 0x31d   : > { %4489 = vadd.xlane.f32.xlu1 %v4488_v14  ;;  %v3566_v49 = vpop.xlane.xlu0 %3565  ;;  %v3736_v57 = vsel %vm1950_vm14, %v3735_v62, %v3731_v22  ;;  %v4445_v62 = vsel %vm7330_vm13, %v7925_v40, 0.0  ;;  %v4447_v1 = vsel %vm7330_vm13, %v7927_v46, 0.0 }
 0x31e   : > { %v3569_v61 = vpop.xlane.xlu1 %3568  ;;  %v3740_v23 = vrot.slane %v3566_v49, %v6060_v28  ;;  %v3758_v34 = vsel %vm2097_vm5, %v3736_v57, %v3757_v11  ;;  %v4497_v14 = vsel %vm1812_vm4, %v4445_v62, 0.0  ;;  %v4548_v11 = vsel %vm1812_vm4, %v4462_v30, 0.0 }
 0x31f   : > { %v3744_v43 = vrot.slane %v3569_v61, %v6054_v17 }
 0x320   : > { %4534 = vadd.xlane.f32.xlu0 %v4533_v32 }
 0x321   : > { %v3745_v0 = vsel %vm1950_vm14, %v3744_v43, %v3740_v23  ;;  %4537 = vadd.xlane.f32.xlu1 %v4536_v44  ;;  %v7470_v8 = vpop.xlane.xlu0 %3806  ;;  %v4132_v44 = vsel %vm7174_vm11, %v7937_v33, 0.0 }
 0x322   : > { %v3759_v6 = vsel %vm2099_vm6, %v3745_v0, %v3758_v34  ;;  %v7476_v60 = vpop.xlane.xlu1 %3809  ;;  %v3936_v23 = vrot.slane %v7470_v8, %v6060_v28  ;;  %v4220_v63 = vsel %vm1812_vm4, %v4132_v44, 0.0 }
 0x323   : > { %4948 = vst.msk [vmem:[%s5375_s30 + $0x58] sm:$0xff] %vm1812_vm4, %v3759_v6  ;;  %v3940_v61 = vrot.slane %v7476_v60, %v6054_v17 }
 0x324   : > { %4209 = vadd.xlane.f32.xlu0 %v4208_v47 }
 0x325   : > { %4212 = vadd.xlane.f32.xlu1 %v4211_v54  ;;  %v3813_v15 = vpop.xlane.xlu0 %3812  ;;  %v3941_v54 = vsel %vm1950_vm14, %v3940_v61, %v3936_v23  ;;  %v4512_v23 = vsel %vm1812_vm4, %v4450_v20, 0.0 }
 0x326   : > { %v3816_v3 = vpop.xlane.xlu1 %3815  ;;  %v3945_v40 = vrot.slane %v3813_v15, %v6060_v28 }
 0x327   : > { %v3949_v21 = vrot.slane %v3816_v3, %v6054_v17 }
 0x328   : > { %4492 = vadd.xlane.f32.xlu0 %v4491_v2 }
 0x329   : > { %4495 = vadd.xlane.f32.xlu1 %v4494_v4  ;;  %v3819_v48 = vpop.xlane.xlu0 %3818  ;;  %v3950_v45 = vsel %vm1950_vm14, %v3949_v21, %v3945_v40  ;;  %v4223_v4 = vsel %vm1812_vm4, %v4133_v31, 0.0 }
 0x32a   : > { %v3822_v27 = vpop.xlane.xlu1 %3821  ;;  %v3954_v24 = vrot.slane %v3819_v48, %v6060_v28  ;;  %v4077_v3 = vsel %vm2087_vm15, %v3950_v45, %v3941_v54 }
 0x32b   : > { %v3958_v39 = vrot.slane %v3822_v27, %v6054_v17 }
 0x32c   : > { %4540 = vadd.xlane.f32.xlu0 %v4539_v29  ;;  %v4448_v29 = vsel %vm7350_vm7, %v7928_v52, 0.0  ;;  %v4463_v52 = vsel %vm7330_vm13, %v7937_v33, 0.0  ;;  %v4134_v33 = vsel %vm7174_vm11, %v6023_v36, 0.0 }
 0x32d   : > { %4543 = vadd.xlane.f32.xlu1 %v4542_v9  ;;  %v3825_v22 = vpop.xlane.xlu0 %3824  ;;  %v3959_v6 = vsel %vm1950_vm14, %v3958_v39, %v3954_v24  ;;  %v4506_v62 = vsel %vm1812_vm4, %v4448_v29, 0.0  ;;  %v4551_v21 = vsel %vm1812_vm4, %v4463_v52, 0.0  ;;  %v4226_v39 = vsel %vm1812_vm4, %v4134_v33, 0.0 }
 0x32e   : > { %v3828_v38 = vpop.xlane.xlu1 %3827  ;;  %v3963_v43 = vrot.slane %v3825_v22, %v6060_v28  ;;  %v4078_v48 = vsel %vm2089_vm0, %v3959_v6, %v4077_v3 }
 0x32f   : > { %v3967_v51 = vrot.slane %v3828_v38, %v6054_v17 }
 0x330   : > { %4215 = vadd.xlane.f32.xlu0 %v4214_v50  ;;  %v4503_v50 = vsel %vm1812_vm4, %v4447_v1, 0.0 }
 0x331   : > { %4218 = vadd.xlane.f32.xlu1 %v4217_v53  ;;  %v3831_v18 = vpop.xlane.xlu0 %3830  ;;  %v3968_v12 = vsel %vm1950_vm14, %v3967_v51, %v3963_v43  ;;  %v4465_v51 = vsel %vm7330_vm13, %v6023_v36, 0.0 }
 0x332   : > { %v3834_v55 = vpop.xlane.xlu1 %3833  ;;  %v3972_v56 = vrot.slane %v3831_v18, %v6060_v28  ;;  %v4079_v9 = vsel %vm2091_vm1, %v3968_v12, %v4078_v48 }
 0x333   : > { %v3976_v32 = vrot.slane %v3834_v55, %v6054_v17 }
 0x334   : > { %4498 = vadd.xlane.f32.xlu0 %v4497_v14  ;;  %v4464_v14 = vsel %vm7350_vm7, %v7938_v41, 0.0  ;;  %v4135_v41 = vsel %vm7179_vm12, %v7940_v35, 0.0 }
 0x335   : > { %4501 = vadd.xlane.f32.xlu1 %v4500_v42  ;;  %v3837_v49 = vpop.xlane.xlu0 %3836  ;;  %v3977_v2 = vsel %vm1950_vm14, %v3976_v32, %v3972_v56  ;;  %v4554_v40 = vsel %vm1812_vm4, %v4464_v14, 0.0  ;;  %v4229_v24 = vsel %vm1812_vm4, %v4135_v41, 0.0  ;;  %v4557_v56 = vsel %vm1812_vm4, %v4465_v51, 0.0 }
 0x336   : > { %v3840_v57 = vpop.xlane.xlu1 %3839  ;;  %v3981_v0 = vrot.slane %v3837_v49, %v6060_v28  ;;  %v4080_v46 = vsel %vm2093_vm2, %v3977_v2, %v4079_v9 }
 0x337   : > { %v3985_v34 = vrot.slane %v3840_v57, %v6054_v17  ;;  %v4449_v57 = vsel %vm7330_vm13, %v7929_v25, 0.0  ;;  %v4466_v25 = vsel %vm7350_vm7, %v7940_v35, 0.0 }
 0x338   : > { %4546 = vadd.xlane.f32.xlu0 %v4545_v7  ;;  %v4509_v13 = vsel %vm1812_vm4, %v4449_v57, 0.0  ;;  %v4560_v16 = vsel %vm1812_vm4, %v4466_v25, 0.0 }
 0x339   : > { %4549 = vadd.xlane.f32.xlu1 %v4548_v11  ;;  %v3843_v8 = vpop.xlane.xlu0 %3842  ;;  %v3986_v5 = vsel %vm1950_vm14, %v3985_v34, %v3981_v0 }
 0x33a   : > { %v3846_v60 = vpop.xlane.xlu1 %3845  ;;  %v3990_v47 = vrot.slane %v3843_v8, %v6060_v28  ;;  %v4081_v53 = vsel %vm2095_vm3, %v3986_v5, %v4080_v46 }
 0x33b   : > { %v3994_v15 = vrot.slane %v3846_v60, %v6054_v17 }
 0x33c   : > { %4221 = vadd.xlane.f32.xlu0 %v4220_v63 }
 0x33d   : > { %4224 = vadd.xlane.f32.xlu1 %v4223_v4  ;;  %v3849_v27 = vpop.xlane.xlu0 %3848  ;;  %v3995_v26 = vsel %vm1950_vm14, %v3994_v15, %v3990_v47 }
 0x33e   : > { %v3852_v22 = vpop.xlane.xlu1 %3851  ;;  %v3999_v59 = vrot.slane %v3849_v27, %v6060_v28  ;;  %v4082_v18 = vsel %vm2097_vm5, %v3995_v26, %v4081_v53 }
 0x33f   : > { %v4003_v38 = vrot.slane %v3852_v22, %v6054_v17 }
 0x340   : > { %4504 = vadd.xlane.f32.xlu0 %v4503_v50 }
 0x341   : > { %v4004_v37 = vsel %vm1950_vm14, %v4003_v38, %v3999_v59  ;;  %4507 = vadd.xlane.f32.xlu1 %v4506_v62  ;;  %v3855_v55 = vpop.xlane.xlu0 %3854 }
 0x342   : > { %v4083_v19 = vsel %vm2099_vm6, %v4004_v37, %v4082_v18  ;;  %v3858_v42 = vpop.xlane.xlu1 %3857  ;;  %v4008_v8 = vrot.slane %v3855_v55, %v6060_v28 }
 0x343   : > { %4949 = vst.msk [vmem:[%s5375_s30 + $0x60] sm:$0xff] %vm1812_vm4, %v4083_v19  ;;  %v4012_v35 = vrot.slane %v3858_v42, %v6054_v17 }
 0x344   : > { %4552 = vadd.xlane.f32.xlu0 %v4551_v21 }
 0x345   : > { %4555 = vadd.xlane.f32.xlu1 %v4554_v40  ;;  %v3861_v49 = vpop.xlane.xlu0 %3860  ;;  %v4013_v1 = vsel %vm1950_vm14, %v4012_v35, %v4008_v8 }
 0x346   : > { %v3864_v30 = vpop.xlane.xlu1 %3863  ;;  %v4017_v10 = vrot.slane %v3861_v49, %v6060_v28 }
 0x347   : > { %v4021_v45 = vrot.slane %v3864_v30, %v6054_v17 }
 0x348   : > { %4227 = vadd.xlane.f32.xlu0 %v4226_v39 }
 0x349   : > { %4230 = vadd.xlane.f32.xlu1 %v4229_v24  ;;  %v3867_v7 = vpop.xlane.xlu0 %3866  ;;  %v4022_v54 = vsel %vm1950_vm14, %v4021_v45, %v4017_v10 }
 0x34a   : > { %v3870_v61 = vpop.xlane.xlu1 %3869  ;;  %v4026_v0 = vrot.slane %v3867_v7, %v6060_v28  ;;  %v4084_v27 = vsel %vm2087_vm15, %v4022_v54, %v4013_v1 }
 0x34b   : > { %v4030_v34 = vrot.slane %v3870_v61, %v6054_v17 }
 0x34c   : > { %4510 = vadd.xlane.f32.xlu0 %v4509_v13 }
 0x34d   : > { %4513 = vadd.xlane.f32.xlu1 %v4512_v23  ;;  %v3873_v43 = vpop.xlane.xlu0 %3872  ;;  %v4031_v3 = vsel %vm1950_vm14, %v4030_v34, %v4026_v0 }
 0x34e   : > { %v3876_v32 = vpop.xlane.xlu1 %3875  ;;  %v4035_v6 = vrot.slane %v3873_v43, %v6060_v28  ;;  %v4085_v9 = vsel %vm2089_vm0, %v4031_v3, %v4084_v27 }
 0x34f   : > { %v4039_v31 = vrot.slane %v3876_v32, %v6054_v17 }
 0x350   : > { %4558 = vadd.xlane.f32.xlu0 %v4557_v56 }
 0x351   : > { %4561 = vadd.xlane.f32.xlu1 %v4560_v16  ;;  %v3879_v11 = vpop.xlane.xlu0 %3878  ;;  %v4040_v48 = vsel %vm1950_vm14, %v4039_v31, %v4035_v6 }
 0x352   : > { %v3882_v44 = vpop.xlane.xlu1 %3881  ;;  %v4044_v47 = vrot.slane %v3879_v11, %v6060_v28  ;;  %v4086_v59 = vsel %vm2091_vm1, %v4040_v48, %v4085_v9 }
 0x353   : > { %v4048_v60 = vrot.slane %v3882_v44, %v6054_v17 }
 0x355   : > { %v3885_v36 = vpop.xlane.xlu0 %3884  ;;  %v4049_v29 = vsel %vm1950_vm14, %v4048_v60, %v4044_v47 }
 0x356   : > { %v3888_v58 = vpop.xlane.xlu1 %3887  ;;  %v4053_v15 = vrot.slane %v3885_v36, %v6060_v28  ;;  %v4087_v53 = vsel %vm2093_vm2, %v4049_v29, %v4086_v59 }
 0x357   : > { %v4057_v12 = vrot.slane %v3888_v58, %v6054_v17 }
 0x359   : > { %v3891_v63 = vpop.xlane.xlu0 %3890  ;;  %v4058_v26 = vsel %vm1950_vm14, %v4057_v12, %v4053_v15 }
 0x35a   : > { %v3894_v2 = vpop.xlane.xlu1 %3893  ;;  %v4062_v4 = vrot.slane %v3891_v63, %v6060_v28  ;;  %v4088_v52 = vsel %vm2095_vm3, %v4058_v26, %v4087_v53 }
 0x35b   : > { %v4066_v5 = vrot.slane %v3894_v2, %v6054_v17 }
 0x35d   : > { %v3897_v22 = vpop.xlane.xlu0 %3896  ;;  %v4067_v46 = vsel %vm1950_vm14, %v4066_v5, %v4062_v4 }
 0x35e   : > { %v3900_v38 = vpop.xlane.xlu1 %3899  ;;  %v4071_v50 = vrot.slane %v3897_v22, %v6060_v28  ;;  %v4089_v18 = vsel %vm2097_vm5, %v4067_v46, %v4088_v52 }
 0x35f   : > { %v4075_v62 = vrot.slane %v3900_v38, %v6054_v17 }
 0x361   : > { %v4076_v37 = vsel %vm1950_vm14, %v4075_v62, %v4071_v50  ;;  %v4138_v55 = vpop.xlane.xlu0 %4137 }
 0x362   : > { %v4090_v14 = vsel %vm2099_vm6, %v4076_v37, %v4089_v18  ;;  %v4141_v19 = vpop.xlane.xlu1 %4140  ;;  %v4267_v51 = vrot.slane %v4138_v55, %v6060_v28 }
 0x363   : > { %4950 = vst.msk [vmem:[%s5375_s30 + $0x68] sm:$0xff] %vm1812_vm4, %v4090_v14  ;;  %v4271_v23 = vrot.slane %v4141_v19, %v6054_v17 }
 0x365   : > { %v4144_v42 = vpop.xlane.xlu0 %4143  ;;  %v4272_v0 = vsel %vm1950_vm14, %v4271_v23, %v4267_v51 }
 0x366   : > { %v4147_v21 = vpop.xlane.xlu1 %4146  ;;  %v4276_v57 = vrot.slane %v4144_v42, %v6060_v28 }
 0x367   : > { %v4280_v24 = vrot.slane %v4147_v21, %v6054_v17 }
 0x369   : > { %v4150_v40 = vpop.xlane.xlu0 %4149  ;;  %v4281_v16 = vsel %vm1950_vm14, %v4280_v24, %v4276_v57 }
 0x36a   : > { %v4153_v33 = vpop.xlane.xlu1 %4152  ;;  %v4285_v61 = vrot.slane %v4150_v40, %v6060_v28  ;;  %v4408_v8 = vsel %vm2087_vm15, %v4281_v16, %v4272_v0 }
 0x36b   : > { %v4289_v20 = vrot.slane %v4153_v33, %v6054_v17 }
 0x36d   : > { %v4156_v49 = vpop.xlane.xlu0 %4155  ;;  %v4290_v10 = vsel %vm1950_vm14, %v4289_v20, %v4285_v61 }
 0x36e   : > { %v4159_v41 = vpop.xlane.xlu1 %4158  ;;  %v4294_v25 = vrot.slane %v4156_v49, %v6060_v28  ;;  %v4409_v6 = vsel %vm2089_vm0, %v4290_v10, %v4408_v8 }
 0x36f   : > { %v4298_v43 = vrot.slane %v4159_v41, %v6054_v17 }
 0x371   : > { %v4162_v30 = vpop.xlane.xlu0 %4161  ;;  %v4299_v58 = vsel %vm1950_vm14, %v4298_v43, %v4294_v25 }
 0x372   : > { %v4165_v39 = vpop.xlane.xlu1 %4164  ;;  %v4303_v56 = vrot.slane %v4162_v30, %v6060_v28  ;;  %v4410_v54 = vsel %vm2091_vm1, %v4299_v58, %v4409_v6 }
 0x373   : > { %v4307_v32 = vrot.slane %v4165_v39, %v6054_v17 }
 0x375   : > { %v4168_v7 = vpop.xlane.xlu0 %4167  ;;  %v4308_v31 = vsel %vm1950_vm14, %v4307_v32, %v4303_v56 }
 0x376   : > { %v4171_v13 = vpop.xlane.xlu1 %4170  ;;  %v4312_v44 = vrot.slane %v4168_v7, %v6060_v28  ;;  %v4411_v3 = vsel %vm2093_vm2, %v4308_v31, %v4410_v54 }
 0x377   : > { %v4316_v11 = vrot.slane %v4171_v13, %v6054_v17 }
 0x379   : > { %v4174_v45 = vpop.xlane.xlu0 %4173  ;;  %v4317_v60 = vsel %vm1950_vm14, %v4316_v11, %v4312_v44 }
 0x37a   : > { %v4177_v36 = vpop.xlane.xlu1 %4176  ;;  %v4321_v34 = vrot.slane %v4174_v45, %v6060_v28  ;;  %v4412_v4 = vsel %vm2095_vm3, %v4317_v60, %v4411_v3 }
 0x37b   : > { %v4325_v35 = vrot.slane %v4177_v36, %v6054_v17 }
 0x37d   : > { %v4180_v47 = vpop.xlane.xlu0 %4179  ;;  %v4326_v12 = vsel %vm1950_vm14, %v4325_v35, %v4321_v34 }
 0x37e   : > { %v4183_v15 = vpop.xlane.xlu1 %4182  ;;  %v4330_v63 = vrot.slane %v4180_v47, %v6060_v28  ;;  %v4413_v1 = vsel %vm2097_vm5, %v4326_v12, %v4412_v4 }
 0x37f   : > { %v4334_v2 = vrot.slane %v4183_v15, %v6054_v17 }
 0x381   : > { %v4335_v48 = vsel %vm1950_vm14, %v4334_v2, %v4330_v63  ;;  %v4186_v5 = vpop.xlane.xlu0 %4185 }
 0x382   : > { %v4414_v27 = vsel %vm2099_vm6, %v4335_v48, %v4413_v1  ;;  %v4189_v29 = vpop.xlane.xlu1 %4188  ;;  %v4339_v9 = vrot.slane %v4186_v5, %v6060_v28 }
 0x383   : > { %4951 = vst.msk [vmem:[%s5375_s30 + $0x70] sm:$0xff] %vm1812_vm4, %v4414_v27  ;;  %v4343_v26 = vrot.slane %v4189_v29, %v6054_v17 }
 0x385   : > { %v4344_v22 = vsel %vm1950_vm14, %v4343_v26, %v4339_v9  ;;  %v4192_v59 = vpop.xlane.xlu0 %4191 }
 0x386   : > { %v4195_v46 = vpop.xlane.xlu1 %4194  ;;  %v4348_v38 = vrot.slane %v4192_v59, %v6060_v28 }
 0x387   : > { %v4352_v50 = vrot.slane %v4195_v46, %v6054_v17 }
 0x389   : > { %v4353_v53 = vsel %vm1950_vm14, %v4352_v50, %v4348_v38  ;;  %v4198_v62 = vpop.xlane.xlu0 %4197 }
 0x38a   : > { %v4415_v52 = vsel %vm2087_vm15, %v4353_v53, %v4344_v22  ;;  %v4201_v18 = vpop.xlane.xlu1 %4200  ;;  %v4357_v37 = vrot.slane %v4198_v62, %v6060_v28 }
 0x38b   : > { %v4361_v55 = vrot.slane %v4201_v18, %v6054_v17 }
 0x38d   : > { %v4362_v14 = vsel %vm1950_vm14, %v4361_v55, %v4357_v37  ;;  %v4204_v19 = vpop.xlane.xlu0 %4203 }
 0x38e   : > { %v4416_v42 = vsel %vm2089_vm0, %v4362_v14, %v4415_v52  ;;  %v4469_v21 = vpop.xlane.xlu1 %4468  ;;  %v4366_v11 = vrot.slane %v4204_v19, %v6060_v28 }
 0x38f   : > { %v4598_v33 = vrot.slane %v4469_v21, %v6060_v28 }
 0x391   : > { %v4472_v40 = vpop.xlane.xlu0 %4471 }
 0x392   : > { %v4475_v49 = vpop.xlane.xlu1 %4474  ;;  %v4602_v41 = vrot.slane %v4472_v40, %v6054_v17 }
 0x393   : > { %v4607_v24 = vrot.slane %v4475_v49, %v6060_v28 }
 0x394   : > { %v4603_v30 = vsel %vm1950_vm14, %v4602_v41, %v4598_v33 }
 0x395   : > { %v4478_v39 = vpop.xlane.xlu0 %4477 }
 0x396   : > { %v7686_v57 = vpop.xlane.xlu1 %4516  ;;  %v4611_v7 = vrot.slane %v4478_v39, %v6054_v17 }
 0x397   : > { %v4670_v22 = vrot.slane %v7686_v57, %v6060_v28 }
 0x398   : > { %v4612_v20 = vsel %vm1950_vm14, %v4611_v7, %v4607_v24 }
 0x399   : > { %v4739_v61 = vsel %vm2087_vm15, %v4612_v20, %v4603_v30  ;;  %v7691_v13 = vpop.xlane.xlu0 %4519 }
 0x39a   : > { %v4523_v23 = vpop.xlane.xlu1 %4522  ;;  %v4674_v52 = vrot.slane %v7691_v13, %v6054_v17 }
 0x39b   : > { %v4679_v62 = vrot.slane %v4523_v23, %v6060_v28 }
 0x39d   : > { %v4526_v51 = vpop.xlane.xlu0 %4525 }
 0x39e   : > { %v4481_v43 = vpop.xlane.xlu1 %4480  ;;  %v4683_v59 = vrot.slane %v4526_v51, %v6054_v17 }
 0x39f   : > { %v4616_v27 = vrot.slane %v4481_v43, %v6060_v28 }
 0x3a0   : > { %v4684_v33 = vsel %vm1950_vm14, %v4683_v59, %v4679_v62 }
 0x3a1   : > { %v4484_v25 = vpop.xlane.xlu0 %4483 }
 0x3a2   : > { %v4529_v32 = vpop.xlane.xlu1 %4528  ;;  %v4620_v48 = vrot.slane %v4484_v25, %v6054_v17 }
 0x3a3   : > { %v4688_v14 = vrot.slane %v4529_v32, %v6060_v28 }
 0x3a4   : > { %v4621_v46 = vsel %vm1950_vm14, %v4620_v48, %v4616_v27 }
 0x3a5   : > { %v4532_v56 = vpop.xlane.xlu0 %4531  ;;  %v4740_v49 = vsel %vm2089_vm0, %v4621_v46, %v4739_v61 }
 0x3a6   : > { %v4207_v16 = vpop.xlane.xlu1 %4206  ;;  %v4692_v38 = vrot.slane %v4532_v56, %v6054_v17 }
 0x3a7   : > { %v4370_v44 = vrot.slane %v4207_v16, %v6054_v17 }
 0x3a8   : > { %v4693_v39 = vsel %vm1950_vm14, %v4692_v38, %v4688_v14 }
 0x3a9   : > { %v4371_v45 = vsel %vm1950_vm14, %v4370_v44, %v4366_v11  ;;  %v4487_v10 = vpop.xlane.xlu0 %4486 }
 0x3aa   : > { %v4417_v36 = vsel %vm2091_vm1, %v4371_v45, %v4416_v42  ;;  %v4490_v34 = vpop.xlane.xlu1 %4489  ;;  %v4625_v9 = vrot.slane %v4487_v10, %v6060_v28 }
 0x3ab   : > { %v4629_v29 = vrot.slane %v4490_v34, %v6054_v17 }
 0x3ad   : > { %v7697_v0 = vpop.xlane.xlu0 %4534  ;;  %v4630_v19 = vsel %vm1950_vm14, %v4629_v29, %v4625_v9 }
 0x3ae   : > { %v7699_v58 = vpop.xlane.xlu1 %4537  ;;  %v4741_v20 = vsel %vm2091_vm1, %v4630_v19, %v4740_v49  ;;  %v4697_v25 = vrot.slane %v7697_v0, %v6060_v28 }
 0x3af   : > { %v4701_v43 = vrot.slane %v7699_v58, %v6054_v17 }
 0x3b1   : > { %v4210_v35 = vpop.xlane.xlu0 %4209 }
 0x3b2   : > { %v4213_v8 = vpop.xlane.xlu1 %4212  ;;  %v4375_v53 = vrot.slane %v4210_v35, %v6060_v28 }
 0x3b3   : > { %v4379_v50 = vrot.slane %v4213_v8, %v6054_v17 }
 0x3b5   : > { %v4493_v31 = vpop.xlane.xlu0 %4492  ;;  %v4380_v24 = vsel %vm1950_vm14, %v4379_v50, %v4375_v53 }
 0x3b6   : > { %v4496_v6 = vpop.xlane.xlu1 %4495  ;;  %v4634_v30 = vrot.slane %v4493_v31, %v6060_v28  ;;  %v4418_v11 = vsel %vm2093_vm2, %v4380_v24, %v4417_v36 }
 0x3b7   : > { %v4638_v41 = vrot.slane %v4496_v6, %v6054_v17 }
 0x3b9   : > { %v7701_v60 = vpop.xlane.xlu0 %4540  ;;  %v4639_v44 = vsel %vm1950_vm14, %v4638_v41, %v4634_v30 }
 0x3ba   : > { %v7703_v47 = vpop.xlane.xlu1 %4543  ;;  %v4706_v45 = vrot.slane %v7701_v60, %v6060_v28 }
 0x3bb   : > { %v4710_v34 = vrot.slane %v7703_v47, %v6054_v17 }
 0x3bd   : > { %v4216_v54 = vpop.xlane.xlu0 %4215 }
 0x3be   : > { %v4219_v12 = vpop.xlane.xlu1 %4218  ;;  %v4384_v37 = vrot.slane %v4216_v54, %v6060_v28 }
 0x3bf   : > { %v4388_v18 = vrot.slane %v4219_v12, %v6054_v17 }
 0x3c1   : > { %v4499_v15 = vpop.xlane.xlu0 %4498  ;;  %v4389_v13 = vsel %vm1950_vm14, %v4388_v18, %v4384_v37 }
 0x3c2   : > { %v4502_v63 = vpop.xlane.xlu1 %4501  ;;  %v4643_v7 = vrot.slane %v4499_v15, %v6060_v28  ;;  %v4419_v58 = vsel %vm2095_vm3, %v4389_v13, %v4418_v11 }
 0x3c3   : > { %v4647_v57 = vrot.slane %v4502_v63, %v6054_v17 }
 0x3c5   : > { %v7705_v3 = vpop.xlane.xlu0 %4546  ;;  %v4648_v0 = vsel %vm1950_vm14, %v4647_v57, %v4643_v7 }
 0x3c6   : > { %v7707_v2 = vpop.xlane.xlu1 %4549  ;;  %v4715_v35 = vrot.slane %v7705_v3, %v6060_v28  ;;  %v4675_v3 = vsel %vm1950_vm14, %v4674_v52, %v4670_v22 }
 0x3c7   : > { %v4719_v36 = vrot.slane %v7707_v2, %v6054_v17  ;;  %v4702_v2 = vsel %vm1950_vm14, %v4701_v43, %v4697_v25  ;;  %v4746_v48 = vsel %vm2087_vm15, %v4684_v33, %v4675_v3 }
 0x3c8   : > { %v4747_v29 = vsel %vm2089_vm0, %v4693_v39, %v4746_v48 }
 0x3c9   : > { %v4222_v4 = vpop.xlane.xlu0 %4221  ;;  %v4720_v9 = vsel %vm1950_vm14, %v4719_v36, %v4715_v35  ;;  %v4748_v46 = vsel %vm2091_vm1, %v4702_v2, %v4747_v29 }
 0x3ca   : > { %v4225_v1 = vpop.xlane.xlu1 %4224  ;;  %v4393_v21 = vrot.slane %v4222_v4, %v6060_v28  ;;  %v4742_v4 = vsel %vm2093_vm2, %v4639_v44, %v4741_v20 }
 0x3cb   : > { %v4397_v42 = vrot.slane %v4225_v1, %v6054_v17  ;;  %v4743_v27 = vsel %vm2095_vm3, %v4648_v0, %v4742_v4 }
 0x3cd   : > { %v4505_v5 = vpop.xlane.xlu0 %4504  ;;  %v4398_v32 = vsel %vm1950_vm14, %v4397_v42, %v4393_v21 }
 0x3ce   : > { %v4508_v26 = vpop.xlane.xlu1 %4507  ;;  %v4652_v61 = vrot.slane %v4505_v5, %v6060_v28  ;;  %v4420_v8 = vsel %vm2097_vm5, %v4398_v32, %v4419_v58  ;;  %v4711_v5 = vsel %vm1950_vm14, %v4710_v34, %v4706_v45 }
 0x3cf   : > { %v4656_v23 = vrot.slane %v4508_v26, %v6054_v17  ;;  %v4749_v52 = vsel %vm2093_vm2, %v4711_v5, %v4748_v46 }
 0x3d0   : > { %v4750_v37 = vsel %vm2095_vm3, %v4720_v9, %v4749_v52 }
 0x3d1   : > { %v4553_v55 = vpop.xlane.xlu0 %4552  ;;  %v4657_v31 = vsel %vm1950_vm14, %v4656_v23, %v4652_v61 }
 0x3d2   : > { %v4556_v40 = vpop.xlane.xlu1 %4555  ;;  %v4724_v54 = vrot.slane %v4553_v55, %v6060_v28  ;;  %v4744_v26 = vsel %vm2097_vm5, %v4657_v31, %v4743_v27 }
 0x3d3   : > { %v4728_v47 = vrot.slane %v4556_v40, %v6054_v17 }
 0x3d5   : > { %v4228_v51 = vpop.xlane.xlu0 %4227  ;;  %v4729_v38 = vsel %vm1950_vm14, %v4728_v47, %v4724_v54 }
 0x3d6   : > { %v4231_v56 = vpop.xlane.xlu1 %4230  ;;  %v4402_v16 = vrot.slane %v4228_v51, %v6060_v28  ;;  %v4751_v55 = vsel %vm2097_vm5, %v4729_v38, %v4750_v37 }
 0x3d7   : > { %v4406_v10 = vrot.slane %v4231_v56, %v6054_v17 }
 0x3d9   : > { %v4407_v6 = vsel %vm1950_vm14, %v4406_v10, %v4402_v16  ;;  %v4511_v60 = vpop.xlane.xlu0 %4510 }
 0x3da   : > { %v4421_v12 = vsel %vm2099_vm6, %v4407_v6, %v4420_v8  ;;  %v4514_v15 = vpop.xlane.xlu1 %4513  ;;  %v4661_v63 = vrot.slane %v4511_v60, %v6060_v28 }
 0x3db   : > { %4952 = vst.msk [vmem:[%s5375_s30 + $0x78] sm:$0xff] %vm1812_vm4, %v4421_v12  ;;  %v4665_v1 = vrot.slane %v4514_v15, %v6054_v17 }
 0x3dd   : > { %v4666_v22 = vsel %vm1950_vm14, %v4665_v1, %v4661_v63  ;;  %v4559_v59 = vpop.xlane.xlu0 %4558 }
 0x3de   : > { %v4745_v50 = vsel %vm2099_vm6, %v4666_v22, %v4744_v26  ;;  %v4562_v53 = vpop.xlane.xlu1 %4561  ;;  %v4733_v62 = vrot.slane %v4559_v59, %v6060_v28 }
 0x3df   : > { %4953 = vst.msk [vmem:[%s5375_s30 + $0x80] sm:$0xff] %vm1812_vm4, %v4745_v50  ;;  %v4737_v18 = vrot.slane %v4562_v53, %v6054_v17 }
 0x3e1   : > { %v4738_v14 = vsel %vm1950_vm14, %v4737_v18, %v4733_v62 }
 0x3e2   : > { %v4752_v19 = vsel %vm2099_vm6, %v4738_v14, %v4751_v55 }
 0x3e3   : > { %4954 = vst.msk [vmem:[%s5375_s30 + $0x88] sm:$0xff] %vm1812_vm4, %v4752_v19 }
 0x3e4 PF: > { %s12_s13 = sadd.s32 1, %s5311_s13   ;;  %s7960_s9 = smov %s5303_s11 }
 0x3e5   : > { %p9_p8 = scmp.ge.s32.totalorder %s12_s13, 20   ;;  %s7961_s10 = smov %s5307_s12 }
 0x3e6   : > { %s7962_s11 = smov %s7965_s14  ;;  %s7963_s12 = smov %s7969_s15 }
 0x3e7   :  { %11 = sbr.rel (!%p9_p8) target bundleno = 3 (0x3), region = 76 }

</bundles_post_ra>
